<compile_context>
chip_gen: v7x
topology: tpu7x:2x2x1
jax: 0.10.0
libtpu: 0.0.40
codegen_flags: <defaults>
</compile_context>

<pallas_src>
import functools

import jax
import jax.numpy as jnp
from jax import lax
from jax.experimental import pallas as pl
from jax.experimental.pallas import tpu as pltpu

LANE = 128
SUBLANE = 8


def _round_up(v, m):
    return ((v + m - 1) // m) * m


def _pad2(a, rows, cols):
    return jnp.pad(a, ((0, rows - a.shape[0]), (0, cols - a.shape[1])))


# ----------------------------------------------------------------------------
# Fused kernel: encoder MLP on the consumed row + RK4 ODE integration.
# ----------------------------------------------------------------------------
def _fused_encoder_ode_kernel(n_steps, dt, h_pad, r_pad, unroll,
                              xy_ref,
                              w1_ref, w2_ref, w3_ref,
                              ow1_ref, ow2_ref,
                              bias_ref,
                              out_ref):
    # bias_ref rows: 0=enc_b1(h), 1=enc_b2(h), 2=enc_b3(r), 3=ode_b1(h), 4=ode_b2(r)
    b1 = bias_ref[0:1, :h_pad]
    b2 = bias_ref[1:2, :h_pad]
    b3 = bias_ref[2:3, :r_pad]

    # ---------------- encoder MLP (Linear/ReLU/Linear/ReLU/Linear) -----------
    # Layer 1: tiny K (= x_dim+y_dim), kept in f32 (negligible cost).
    h = jnp.dot(xy_ref[...], w1_ref[...],
                preferred_element_type=jnp.float32) + b1
    h = jnp.maximum(h, 0.0)
    # Layers 2/3: bf16 MXU operands, f32 accumulation.
    h = jnp.dot(h.astype(jnp.bfloat16), w2_ref[...],
                preferred_element_type=jnp.float32) + b2
    h = jnp.maximum(h, 0.0)
    h0 = jnp.dot(h.astype(jnp.bfloat16), w3_ref[...],
                 preferred_element_type=jnp.float32) + b3

    # ---------------- RK4 integration of dy/dt = gradient_net(y) on [0, 1] ---
    ow1 = ow1_ref[...]
    ow2 = ow2_ref[...]
    tb = out_ref.shape[0]
    # hoist bias broadcasts out of the loop (JAX does not CSE broadcast_in_dim)
    ob1b = jnp.broadcast_to(bias_ref[3:4, :h_pad], (tb, h_pad))
    ob2b = jnp.broadcast_to(bias_ref[4:5, :r_pad], (tb, r_pad))
    dt_f = jnp.float32(dt)

    def grad_net(v):
        # bf16 matmul inputs; state / accumulation stay f32.
        z = jnp.tanh(jnp.dot(v.astype(jnp.bfloat16), ow1,
                             preferred_element_type=jnp.float32) + ob1b)
        return jnp.dot(z.astype(jnp.bfloat16), ow2,
                       preferred_element_type=jnp.float32) + ob2b

    def rk4_step(_, v):
        k1 = grad_net(v)
        k2 = grad_net(v + 0.5 * dt_f * k1)
        k3 = grad_net(v + 0.5 * dt_f * k2)
        k4 = grad_net(v + dt_f * k3)
        return v + (dt_f / 6.0) * (k1 + 2.0 * k2 + 2.0 * k3 + k4)

    out_ref[...] = lax.fori_loop(0, n_steps, rk4_step, h0, unroll=unroll)


# ----------------------------------------------------------------------------
# Parameter init (mirrors init_network_weights: N(0, 0.1) weights, zero bias)
# ----------------------------------------------------------------------------
def init_params(key, x_dim, y_dim, h_dim, r_dim):
    ks = jax.random.split(key, 5)
    d_in = x_dim + y_dim

    def linear_init(kw, fan_in, fan_out):
        w = 0.1 * jax.random.normal(kw, (fan_in, fan_out), jnp.float32)
        b = jnp.zeros((1, fan_out), jnp.float32)
        return w, b

    p = {}
    p["enc_w1"], p["enc_b1"] = linear_init(ks[0], d_in, h_dim)
    p["enc_w2"], p["enc_b2"] = linear_init(ks[1], h_dim, h_dim)
    p["enc_w3"], p["enc_b3"] = linear_init(ks[2], h_dim, r_dim)
    p["ode_w1"], p["ode_b1"] = linear_init(ks[3], r_dim, h_dim)
    p["ode_w2"], p["ode_b2"] = linear_init(ks[4], h_dim, r_dim)
    return p


# ----------------------------------------------------------------------------
# One-time weight prep: lane-dense zero-padding (exact), bf16 weight cast,
# bias packing.  Run ONCE, reuse across forward calls.
# ----------------------------------------------------------------------------
def prepare_params(params, x_dim, y_dim):
    d_in = x_dim + y_dim
    h_dim = params["enc_w1"].shape[1]
    r_dim = params["enc_w3"].shape[1]
    # NOTE: if h_dim/r_dim ever exceed 128, round to 256 on v6e/v7x (256x256 MXU).
    h_pad = _round_up(h_dim, LANE)
    r_pad = _round_up(r_dim, LANE)
    p_max = max(h_pad, r_pad)

    prep = {
        "x_dim": x_dim, "y_dim": y_dim,
        "h_dim": h_dim, "r_dim": r_dim,
        "h_pad": h_pad, "r_pad": r_pad,
        # layer-1 weight stays f32 (tiny K dot done in f32 inside the kernel)
        "w1": _pad2(params["enc_w1"], d_in, h_pad),
        "w2": _pad2(params["enc_w2"], h_pad, h_pad).astype(jnp.bfloat16),
        "w3": _pad2(params["enc_w3"], h_pad, r_pad).astype(jnp.bfloat16),
        "ow1": _pad2(params["ode_w1"], r_pad, h_pad).astype(jnp.bfloat16),
        "ow2": _pad2(params["ode_w2"], h_pad, r_pad).astype(jnp.bfloat16),
    }

    bias = jnp.zeros((SUBLANE, p_max), jnp.float32)
    bias = bias.at[0, :h_dim].set(params["enc_b1"][0])
    bias = bias.at[1, :h_dim].set(params["enc_b2"][0])
    bias = bias.at[2, :r_dim].set(params["enc_b3"][0])
    bias = bias.at[3, :h_dim].set(params["ode_b1"][0])
    bias = bias.at[4, :r_dim].set(params["ode_b2"][0])
    prep["bias"] = bias
    return prep


# ----------------------------------------------------------------------------
# Full forward (single fused pallas_call); takes prepared params.
# ----------------------------------------------------------------------------
def neural_ode_encoder_forward(prep, x, y):
    b, n, x_dim = x.shape
    y_dim = y.shape[-1]
    assert x_dim == prep["x_dim"] and y_dim == prep["y_dim"]
    assert n >= 2, "need at least 2 time points (linspace(0,1,N) with N>=2)"

    h_pad, r_pad = prep["h_pad"], prep["r_pad"]
    d_in = x_dim + y_dim

    # After the flip, hidden[:, 0, :] == MLP(x[:, -1, :], y[:, -1, :]); only that
    # row feeds the ODE, so flip + full-sequence MLP collapse to one row/batch.
    xy_last = jnp.concatenate(
        [x[:, -1, :], y[:, -1, :]], axis=-1).astype(jnp.float32)   # (B, d_in)

    # Row tiling: sublane-aligned, capped at 256 (vreg pressure), and >= 2 grid
    # tiles whenever b_pad >= 16 so "parallel" can shard over v7x's 2 TCs.
    b_sub = _round_up(b, SUBLANE)
    if b_sub <= SUBLANE:
        tb = SUBLANE
    else:
        tb = min(256, _round_up(pl.cdiv(b_sub, 2), SUBLANE))
    b_pad = _round_up(b_sub, tb)
    xy_p = jnp.pad(xy_last, ((0, b_pad - b), (0, 0)))

    n_steps = n - 1                     # linspace(0,1,N) -> N-1 RK4 intervals
    dt = 1.0 / n_steps
    # short horizons: full unroll (LLO visibility); long: bounded unroll.
    unroll = True if n_steps <= 8 else 4

    def full_spec(a):
        return pl.BlockSpec(a.shape, lambda i: (0, 0))

    out_padded = pl.pallas_call(
        functools.partial(_fused_encoder_ode_kernel,
                          n_steps, dt, h_pad, r_pad, unroll),
        out_shape=jax.ShapeDtypeStruct((b_pad, r_pad), jnp.float32),
        grid=(b_pad // tb,),
        in_specs=[
            pl.BlockSpec((tb, d_in), lambda i: (i, 0)),
            full_spec(prep["w1"]),
            full_spec(prep["w2"]),
            full_spec(prep["w3"]),
            full_spec(prep["ow1"]),
            full_spec(prep["ow2"]),
            full_spec(prep["bias"]),
        ],
        out_specs=pl.BlockSpec((tb, r_pad), lambda i: (i, 0)),
        compiler_params=pltpu.CompilerParams(
            dimension_semantics=("parallel",),
            # sized for v7x's 64 MiB/TC budget; actual footprint is << this
            vmem_limit_bytes=32 * 1024 * 1024,
        ),
    )(xy_p, prep["w1"], prep["w2"], prep["w3"],
      prep["ow1"], prep["ow2"], prep["bias"])

    return out_padded[:b, :prep["r_dim"]]     # (B, r_dim), ODE state at t = 1


# ----------------------------------------------------------------------------
# Pure-JAX f32 reference (full original semantics: flip, concat, full-seq MLP)
# ----------------------------------------------------------------------------
def reference_forward(params, x, y):
    b, n, _ = x.shape
    xf = jnp.flip(x, axis=1)
    yf = jnp.flip(y, axis=1)
    inp = jnp.concatenate([xf, yf], axis=2).astype(jnp.float32)
    h = jnp.maximum(inp @ params["enc_w1"] + params["enc_b1"], 0.0)
    h = jnp.maximum(h @ params["enc_w2"] + params["enc_b2"], 0.0)
    hidden = h @ params["enc_w3"] + params["enc_b3"]
    y0 = hidden[:, 0, :]

    def grad_net(v):
        z = jnp.tanh(v @ params["ode_w1"] + params["ode_b1"])
        return z @ params["ode_w2"] + params["ode_b2"]

    n_steps = n - 1
    dt = 1.0 / n_steps
    v = y0
    for _ in range(n_steps):
        k1 = grad_net(v)
        k2 = grad_net(v + 0.5 * dt * k1)
        k3 = grad_net(v + 0.5 * dt * k2)
        k4 = grad_net(v + dt * k3)
        v = v + (dt / 6.0) * (k1 + 2.0 * k2 + 2.0 * k3 + k4)
    return v


if __name__ == "__main__":
    # small shapes consistent with the module's forward
    batch_size, num_points = 2, 8
    x_dim, y_dim, h_dim, r_dim = 4, 4, 32, 16

    key = jax.random.PRNGKey(0)
    kx, ky, kp = jax.random.split(key, 3)
    x = jax.random.normal(kx, (batch_size, num_points, x_dim), jnp.float32)
    y = jax.random.normal(ky, (batch_size, num_points, y_dim), jnp.float32)
    params = init_params(kp, x_dim, y_dim, h_dim, r_dim)

    # one-time padded / bf16-cast weight prep (reused across forward calls)
    prep = jax.tree_util.tree_map(
        lambda a: jax.block_until_ready(a) if isinstance(a, jax.Array) else a,
        prepare_params(params, x_dim, y_dim))

    out = neural_ode_encoder_forward(prep, x, y)
    out = jax.block_until_ready(out)

    ref = reference_forward(params, x, y)
    assert out.shape == (batch_size, r_dim)
    # bf16 MXU operands (f32 accumulation/state) vs full-f32 reference
    assert jnp.allclose(out, ref, atol=2e-2, rtol=2e-2), "kernel mismatch vs reference"

    print("KERNEL_OK")
</pallas_src>

<mosaic_0001>
module attributes {stable_mosaic.version = 11 : i64} {
  func.func @_fused_encoder_ode_kernel(%arg0: i32, %arg1: memref<8x8xf32, #tpu.memory_space<vmem>>, %arg2: memref<8x128xf32, #tpu.memory_space<vmem>>, %arg3: memref<128x128xbf16, #tpu.memory_space<vmem>>, %arg4: memref<128x128xbf16, #tpu.memory_space<vmem>>, %arg5: memref<128x128xbf16, #tpu.memory_space<vmem>>, %arg6: memref<128x128xbf16, #tpu.memory_space<vmem>>, %arg7: memref<8x128xf32, #tpu.memory_space<vmem>>, %arg8: memref<8x128xf32, #tpu.memory_space<vmem>>) attributes {dimension_semantics = [#tpu.dimension_semantics<parallel>], iteration_bounds = array<i64: 1>, scalar_prefetch = 0 : i64, scratch_operands = 0 : i64, tpu.core_type = #tpu.core_type<tc>, window_params = [{transform_indices = @transform_0, window_bounds = array<i64: 8, 8>}, {pipeline_mode = #tpu.pipeline_mode<synchronous>, transform_indices = @transform_1, window_bounds = array<i64: 8, 128>}, {pipeline_mode = #tpu.pipeline_mode<synchronous>, transform_indices = @transform_2, window_bounds = array<i64: 128, 128>}, {pipeline_mode = #tpu.pipeline_mode<synchronous>, transform_indices = @transform_3, window_bounds = array<i64: 128, 128>}, {pipeline_mode = #tpu.pipeline_mode<synchronous>, transform_indices = @transform_4, window_bounds = array<i64: 128, 128>}, {pipeline_mode = #tpu.pipeline_mode<synchronous>, transform_indices = @transform_5, window_bounds = array<i64: 128, 128>}, {pipeline_mode = #tpu.pipeline_mode<synchronous>, transform_indices = @transform_6, window_bounds = array<i64: 8, 128>}, {transform_indices = @transform_7, window_bounds = array<i64: 8, 128>}]} {
    %c0 = arith.constant 0 : index
    %c0_0 = arith.constant 0 : index
    %0 = vector.load %arg7[%c0, %c0_0] : memref<8x128xf32, #tpu.memory_space<vmem>>, vector<1x128xf32>
    %c1 = arith.constant 1 : index
    %c0_1 = arith.constant 0 : index
    %1 = vector.load %arg7[%c1, %c0_1] : memref<8x128xf32, #tpu.memory_space<vmem>>, vector<1x128xf32>
    %c2 = arith.constant 2 : index
    %c0_2 = arith.constant 0 : index
    %2 = vector.load %arg7[%c2, %c0_2] : memref<8x128xf32, #tpu.memory_space<vmem>>, vector<1x128xf32>
    %c0_3 = arith.constant 0 : index
    %c0_4 = arith.constant 0 : index
    %3 = vector.load %arg1[%c0_3, %c0_4] : memref<8x8xf32, #tpu.memory_space<vmem>>, vector<8x8xf32>
    %c0_5 = arith.constant 0 : index
    %c0_6 = arith.constant 0 : index
    %4 = vector.load %arg2[%c0_5, %c0_6] : memref<8x128xf32, #tpu.memory_space<vmem>>, vector<8x128xf32>
    %cst = arith.constant dense<0.000000e+00> : vector<8x128xf32>
    %5 = tpu.matmul %3, %4, %cst {dimension_numbers = #tpu.dot_dimension_numbers<[1], [0], [0], [1], [0, 0, 1, 1], [], []>} : vector<8x8xf32>, vector<8x128xf32>, vector<8x128xf32> -> vector<8x128xf32>
    %6 = vector.broadcast %0 : vector<1x128xf32> to vector<8x128xf32>
    %7 = arith.addf %5, %6 : vector<8x128xf32>
    %cst_7 = arith.constant 0.000000e+00 : f32
    %8 = vector.broadcast %cst_7 : f32 to vector<8x128xf32>
    %9 = arith.maximumf %7, %8 : vector<8x128xf32>
    %10 = arith.truncf %9 : vector<8x128xf32> to vector<8x128xbf16>
    %c0_8 = arith.constant 0 : index
    %c0_9 = arith.constant 0 : index
    %11 = vector.load %arg3[%c0_8, %c0_9] : memref<128x128xbf16, #tpu.memory_space<vmem>>, vector<128x128xbf16>
    %cst_10 = arith.constant dense<0.000000e+00> : vector<8x128xf32>
    %12 = tpu.matmul %10, %11, %cst_10 {dimension_numbers = #tpu.dot_dimension_numbers<[1], [0], [0], [1], [0, 0, 1, 1], [], []>} : vector<8x128xbf16>, vector<128x128xbf16>, vector<8x128xf32> -> vector<8x128xf32>
    %13 = vector.broadcast %1 : vector<1x128xf32> to vector<8x128xf32>
    %14 = arith.addf %12, %13 : vector<8x128xf32>
    %cst_11 = arith.constant 0.000000e+00 : f32
    %15 = vector.broadcast %cst_11 : f32 to vector<8x128xf32>
    %16 = arith.maximumf %14, %15 : vector<8x128xf32>
    %17 = arith.truncf %16 : vector<8x128xf32> to vector<8x128xbf16>
    %c0_12 = arith.constant 0 : index
    %c0_13 = arith.constant 0 : index
    %18 = vector.load %arg4[%c0_12, %c0_13] : memref<128x128xbf16, #tpu.memory_space<vmem>>, vector<128x128xbf16>
    %cst_14 = arith.constant dense<0.000000e+00> : vector<8x128xf32>
    %19 = tpu.matmul %17, %18, %cst_14 {dimension_numbers = #tpu.dot_dimension_numbers<[1], [0], [0], [1], [0, 0, 1, 1], [], []>} : vector<8x128xbf16>, vector<128x128xbf16>, vector<8x128xf32> -> vector<8x128xf32>
    %20 = vector.broadcast %2 : vector<1x128xf32> to vector<8x128xf32>
    %21 = arith.addf %19, %20 : vector<8x128xf32>
    %c0_15 = arith.constant 0 : index
    %c0_16 = arith.constant 0 : index
    %22 = vector.load %arg5[%c0_15, %c0_16] : memref<128x128xbf16, #tpu.memory_space<vmem>>, vector<128x128xbf16>
    %c0_17 = arith.constant 0 : index
    %c0_18 = arith.constant 0 : index
    %23 = vector.load %arg6[%c0_17, %c0_18] : memref<128x128xbf16, #tpu.memory_space<vmem>>, vector<128x128xbf16>
    %c3 = arith.constant 3 : index
    %c0_19 = arith.constant 0 : index
    %24 = vector.load %arg7[%c3, %c0_19] : memref<8x128xf32, #tpu.memory_space<vmem>>, vector<1x128xf32>
    %25 = vector.shape_cast %24 : vector<1x128xf32> to vector<1x128xf32>
    %26 = vector.broadcast %25 : vector<1x128xf32> to vector<8x128xf32>
    %c4 = arith.constant 4 : index
    %c0_20 = arith.constant 0 : index
    %27 = vector.load %arg7[%c4, %c0_20] : memref<8x128xf32, #tpu.memory_space<vmem>>, vector<1x128xf32>
    %28 = vector.shape_cast %27 : vector<1x128xf32> to vector<1x128xf32>
    %29 = vector.broadcast %28 : vector<1x128xf32> to vector<8x128xf32>
    %cst_21 = arith.constant 0.142857149 : f32
    %c0_i32 = arith.constant 0 : i32
    %30 = arith.truncf %21 : vector<8x128xf32> to vector<8x128xbf16>
    %cst_22 = arith.constant dense<0.000000e+00> : vector<8x128xf32>
    %31 = tpu.matmul %30, %22, %cst_22 {dimension_numbers = #tpu.dot_dimension_numbers<[1], [0], [0], [1], [0, 0, 1, 1], [], []>} : vector<8x128xbf16>, vector<128x128xbf16>, vector<8x128xf32> -> vector<8x128xf32>
    %32 = arith.addf %31, %26 : vector<8x128xf32>
    %33 = math.tanh %32 : vector<8x128xf32>
    %34 = arith.truncf %33 : vector<8x128xf32> to vector<8x128xbf16>
    %cst_23 = arith.constant dense<0.000000e+00> : vector<8x128xf32>
    %35 = tpu.matmul %34, %23, %cst_23 {dimension_numbers = #tpu.dot_dimension_numbers<[1], [0], [0], [1], [0, 0, 1, 1], [], []>} : vector<8x128xbf16>, vector<128x128xbf16>, vector<8x128xf32> -> vector<8x128xf32>
    %36 = arith.addf %35, %29 : vector<8x128xf32>
    %cst_24 = arith.constant 5.000000e-01 : f32
    %37 = arith.mulf %cst_24, %cst_21 : f32
    %38 = vector.broadcast %37 : f32 to vector<8x128xf32>
    %39 = arith.mulf %38, %36 : vector<8x128xf32>
    %40 = arith.addf %21, %39 : vector<8x128xf32>
    %41 = arith.truncf %40 : vector<8x128xf32> to vector<8x128xbf16>
    %cst_25 = arith.constant dense<0.000000e+00> : vector<8x128xf32>
    %42 = tpu.matmul %41, %22, %cst_25 {dimension_numbers = #tpu.dot_dimension_numbers<[1], [0], [0], [1], [0, 0, 1, 1], [], []>} : vector<8x128xbf16>, vector<128x128xbf16>, vector<8x128xf32> -> vector<8x128xf32>
    %43 = arith.addf %42, %26 : vector<8x128xf32>
    %44 = math.tanh %43 : vector<8x128xf32>
    %45 = arith.truncf %44 : vector<8x128xf32> to vector<8x128xbf16>
    %cst_26 = arith.constant dense<0.000000e+00> : vector<8x128xf32>
    %46 = tpu.matmul %45, %23, %cst_26 {dimension_numbers = #tpu.dot_dimension_numbers<[1], [0], [0], [1], [0, 0, 1, 1], [], []>} : vector<8x128xbf16>, vector<128x128xbf16>, vector<8x128xf32> -> vector<8x128xf32>
    %47 = arith.addf %46, %29 : vector<8x128xf32>
    %cst_27 = arith.constant 5.000000e-01 : f32
    %48 = arith.mulf %cst_27, %cst_21 : f32
    %49 = vector.broadcast %48 : f32 to vector<8x128xf32>
    %50 = arith.mulf %49, %47 : vector<8x128xf32>
    %51 = arith.addf %21, %50 : vector<8x128xf32>
    %52 = arith.truncf %51 : vector<8x128xf32> to vector<8x128xbf16>
    %cst_28 = arith.constant dense<0.000000e+00> : vector<8x128xf32>
    %53 = tpu.matmul %52, %22, %cst_28 {dimension_numbers = #tpu.dot_dimension_numbers<[1], [0], [0], [1], [0, 0, 1, 1], [], []>} : vector<8x128xbf16>, vector<128x128xbf16>, vector<8x128xf32> -> vector<8x128xf32>
    %54 = arith.addf %53, %26 : vector<8x128xf32>
    %55 = math.tanh %54 : vector<8x128xf32>
    %56 = arith.truncf %55 : vector<8x128xf32> to vector<8x128xbf16>
    %cst_29 = arith.constant dense<0.000000e+00> : vector<8x128xf32>
    %57 = tpu.matmul %56, %23, %cst_29 {dimension_numbers = #tpu.dot_dimension_numbers<[1], [0], [0], [1], [0, 0, 1, 1], [], []>} : vector<8x128xbf16>, vector<128x128xbf16>, vector<8x128xf32> -> vector<8x128xf32>
    %58 = arith.addf %57, %29 : vector<8x128xf32>
    %59 = vector.broadcast %cst_21 : f32 to vector<8x128xf32>
    %60 = arith.mulf %59, %58 : vector<8x128xf32>
    %61 = arith.addf %21, %60 : vector<8x128xf32>
    %62 = arith.truncf %61 : vector<8x128xf32> to vector<8x128xbf16>
    %cst_30 = arith.constant dense<0.000000e+00> : vector<8x128xf32>
    %63 = tpu.matmul %62, %22, %cst_30 {dimension_numbers = #tpu.dot_dimension_numbers<[1], [0], [0], [1], [0, 0, 1, 1], [], []>} : vector<8x128xbf16>, vector<128x128xbf16>, vector<8x128xf32> -> vector<8x128xf32>
    %64 = arith.addf %63, %26 : vector<8x128xf32>
    %65 = math.tanh %64 : vector<8x128xf32>
    %66 = arith.truncf %65 : vector<8x128xf32> to vector<8x128xbf16>
    %cst_31 = arith.constant dense<0.000000e+00> : vector<8x128xf32>
    %67 = tpu.matmul %66, %23, %cst_31 {dimension_numbers = #tpu.dot_dimension_numbers<[1], [0], [0], [1], [0, 0, 1, 1], [], []>} : vector<8x128xbf16>, vector<128x128xbf16>, vector<8x128xf32> -> vector<8x128xf32>
    %68 = arith.addf %67, %29 : vector<8x128xf32>
    %cst_32 = arith.constant 6.000000e+00 : f32
    %69 = arith.divf %cst_21, %cst_32 : f32
    %cst_33 = arith.constant 2.000000e+00 : f32
    %70 = vector.broadcast %cst_33 : f32 to vector<8x128xf32>
    %71 = arith.mulf %70, %47 : vector<8x128xf32>
    %72 = arith.addf %36, %71 : vector<8x128xf32>
    %cst_34 = arith.constant 2.000000e+00 : f32
    %73 = vector.broadcast %cst_34 : f32 to vector<8x128xf32>
    %74 = arith.mulf %73, %58 : vector<8x128xf32>
    %75 = arith.addf %72, %74 : vector<8x128xf32>
    %76 = arith.addf %75, %68 : vector<8x128xf32>
    %77 = vector.broadcast %69 : f32 to vector<8x128xf32>
    %78 = arith.mulf %77, %76 : vector<8x128xf32>
    %79 = arith.addf %21, %78 : vector<8x128xf32>
    %c1_i32 = arith.constant 1 : i32
    %80 = arith.truncf %79 : vector<8x128xf32> to vector<8x128xbf16>
    %cst_35 = arith.constant dense<0.000000e+00> : vector<8x128xf32>
    %81 = tpu.matmul %80, %22, %cst_35 {dimension_numbers = #tpu.dot_dimension_numbers<[1], [0], [0], [1], [0, 0, 1, 1], [], []>} : vector<8x128xbf16>, vector<128x128xbf16>, vector<8x128xf32> -> vector<8x128xf32>
    %82 = arith.addf %81, %26 : vector<8x128xf32>
    %83 = math.tanh %82 : vector<8x128xf32>
    %84 = arith.truncf %83 : vector<8x128xf32> to vector<8x128xbf16>
    %cst_36 = arith.constant dense<0.000000e+00> : vector<8x128xf32>
    %85 = tpu.matmul %84, %23, %cst_36 {dimension_numbers = #tpu.dot_dimension_numbers<[1], [0], [0], [1], [0, 0, 1, 1], [], []>} : vector<8x128xbf16>, vector<128x128xbf16>, vector<8x128xf32> -> vector<8x128xf32>
    %86 = arith.addf %85, %29 : vector<8x128xf32>
    %cst_37 = arith.constant 5.000000e-01 : f32
    %87 = arith.mulf %cst_37, %cst_21 : f32
    %88 = vector.broadcast %87 : f32 to vector<8x128xf32>
    %89 = arith.mulf %88, %86 : vector<8x128xf32>
    %90 = arith.addf %79, %89 : vector<8x128xf32>
    %91 = arith.truncf %90 : vector<8x128xf32> to vector<8x128xbf16>
    %cst_38 = arith.constant dense<0.000000e+00> : vector<8x128xf32>
    %92 = tpu.matmul %91, %22, %cst_38 {dimension_numbers = #tpu.dot_dimension_numbers<[1], [0], [0], [1], [0, 0, 1, 1], [], []>} : vector<8x128xbf16>, vector<128x128xbf16>, vector<8x128xf32> -> vector<8x128xf32>
    %93 = arith.addf %92, %26 : vector<8x128xf32>
    %94 = math.tanh %93 : vector<8x128xf32>
    %95 = arith.truncf %94 : vector<8x128xf32> to vector<8x128xbf16>
    %cst_39 = arith.constant dense<0.000000e+00> : vector<8x128xf32>
    %96 = tpu.matmul %95, %23, %cst_39 {dimension_numbers = #tpu.dot_dimension_numbers<[1], [0], [0], [1], [0, 0, 1, 1], [], []>} : vector<8x128xbf16>, vector<128x128xbf16>, vector<8x128xf32> -> vector<8x128xf32>
    %97 = arith.addf %96, %29 : vector<8x128xf32>
    %cst_40 = arith.constant 5.000000e-01 : f32
    %98 = arith.mulf %cst_40, %cst_21 : f32
    %99 = vector.broadcast %98 : f32 to vector<8x128xf32>
    %100 = arith.mulf %99, %97 : vector<8x128xf32>
    %101 = arith.addf %79, %100 : vector<8x128xf32>
    %102 = arith.truncf %101 : vector<8x128xf32> to vector<8x128xbf16>
    %cst_41 = arith.constant dense<0.000000e+00> : vector<8x128xf32>
    %103 = tpu.matmul %102, %22, %cst_41 {dimension_numbers = #tpu.dot_dimension_numbers<[1], [0], [0], [1], [0, 0, 1, 1], [], []>} : vector<8x128xbf16>, vector<128x128xbf16>, vector<8x128xf32> -> vector<8x128xf32>
    %104 = arith.addf %103, %26 : vector<8x128xf32>
    %105 = math.tanh %104 : vector<8x128xf32>
    %106 = arith.truncf %105 : vector<8x128xf32> to vector<8x128xbf16>
    %cst_42 = arith.constant dense<0.000000e+00> : vector<8x128xf32>
    %107 = tpu.matmul %106, %23, %cst_42 {dimension_numbers = #tpu.dot_dimension_numbers<[1], [0], [0], [1], [0, 0, 1, 1], [], []>} : vector<8x128xbf16>, vector<128x128xbf16>, vector<8x128xf32> -> vector<8x128xf32>
    %108 = arith.addf %107, %29 : vector<8x128xf32>
    %109 = vector.broadcast %cst_21 : f32 to vector<8x128xf32>
    %110 = arith.mulf %109, %108 : vector<8x128xf32>
    %111 = arith.addf %79, %110 : vector<8x128xf32>
    %112 = arith.truncf %111 : vector<8x128xf32> to vector<8x128xbf16>
    %cst_43 = arith.constant dense<0.000000e+00> : vector<8x128xf32>
    %113 = tpu.matmul %112, %22, %cst_43 {dimension_numbers = #tpu.dot_dimension_numbers<[1], [0], [0], [1], [0, 0, 1, 1], [], []>} : vector<8x128xbf16>, vector<128x128xbf16>, vector<8x128xf32> -> vector<8x128xf32>
    %114 = arith.addf %113, %26 : vector<8x128xf32>
    %115 = math.tanh %114 : vector<8x128xf32>
    %116 = arith.truncf %115 : vector<8x128xf32> to vector<8x128xbf16>
    %cst_44 = arith.constant dense<0.000000e+00> : vector<8x128xf32>
    %117 = tpu.matmul %116, %23, %cst_44 {dimension_numbers = #tpu.dot_dimension_numbers<[1], [0], [0], [1], [0, 0, 1, 1], [], []>} : vector<8x128xbf16>, vector<128x128xbf16>, vector<8x128xf32> -> vector<8x128xf32>
    %118 = arith.addf %117, %29 : vector<8x128xf32>
    %cst_45 = arith.constant 6.000000e+00 : f32
    %119 = arith.divf %cst_21, %cst_45 : f32
    %cst_46 = arith.constant 2.000000e+00 : f32
    %120 = vector.broadcast %cst_46 : f32 to vector<8x128xf32>
    %121 = arith.mulf %120, %97 : vector<8x128xf32>
    %122 = arith.addf %86, %121 : vector<8x128xf32>
    %cst_47 = arith.constant 2.000000e+00 : f32
    %123 = vector.broadcast %cst_47 : f32 to vector<8x128xf32>
    %124 = arith.mulf %123, %108 : vector<8x128xf32>
    %125 = arith.addf %122, %124 : vector<8x128xf32>
    %126 = arith.addf %125, %118 : vector<8x128xf32>
    %127 = vector.broadcast %119 : f32 to vector<8x128xf32>
    %128 = arith.mulf %127, %126 : vector<8x128xf32>
    %129 = arith.addf %79, %128 : vector<8x128xf32>
    %c2_i32 = arith.constant 2 : i32
    %130 = arith.truncf %129 : vector<8x128xf32> to vector<8x128xbf16>
    %cst_48 = arith.constant dense<0.000000e+00> : vector<8x128xf32>
    %131 = tpu.matmul %130, %22, %cst_48 {dimension_numbers = #tpu.dot_dimension_numbers<[1], [0], [0], [1], [0, 0, 1, 1], [], []>} : vector<8x128xbf16>, vector<128x128xbf16>, vector<8x128xf32> -> vector<8x128xf32>
    %132 = arith.addf %131, %26 : vector<8x128xf32>
    %133 = math.tanh %132 : vector<8x128xf32>
    %134 = arith.truncf %133 : vector<8x128xf32> to vector<8x128xbf16>
    %cst_49 = arith.constant dense<0.000000e+00> : vector<8x128xf32>
    %135 = tpu.matmul %134, %23, %cst_49 {dimension_numbers = #tpu.dot_dimension_numbers<[1], [0], [0], [1], [0, 0, 1, 1], [], []>} : vector<8x128xbf16>, vector<128x128xbf16>, vector<8x128xf32> -> vector<8x128xf32>
    %136 = arith.addf %135, %29 : vector<8x128xf32>
    %cst_50 = arith.constant 5.000000e-01 : f32
    %137 = arith.mulf %cst_50, %cst_21 : f32
    %138 = vector.broadcast %137 : f32 to vector<8x128xf32>
    %139 = arith.mulf %138, %136 : vector<8x128xf32>
    %140 = arith.addf %129, %139 : vector<8x128xf32>
    %141 = arith.truncf %140 : vector<8x128xf32> to vector<8x128xbf16>
    %cst_51 = arith.constant dense<0.000000e+00> : vector<8x128xf32>
    %142 = tpu.matmul %141, %22, %cst_51 {dimension_numbers = #tpu.dot_dimension_numbers<[1], [0], [0], [1], [0, 0, 1, 1], [], []>} : vector<8x128xbf16>, vector<128x128xbf16>, vector<8x128xf32> -> vector<8x128xf32>
    %143 = arith.addf %142, %26 : vector<8x128xf32>
    %144 = math.tanh %143 : vector<8x128xf32>
    %145 = arith.truncf %144 : vector<8x128xf32> to vector<8x128xbf16>
    %cst_52 = arith.constant dense<0.000000e+00> : vector<8x128xf32>
    %146 = tpu.matmul %145, %23, %cst_52 {dimension_numbers = #tpu.dot_dimension_numbers<[1], [0], [0], [1], [0, 0, 1, 1], [], []>} : vector<8x128xbf16>, vector<128x128xbf16>, vector<8x128xf32> -> vector<8x128xf32>
    %147 = arith.addf %146, %29 : vector<8x128xf32>
    %cst_53 = arith.constant 5.000000e-01 : f32
    %148 = arith.mulf %cst_53, %cst_21 : f32
    %149 = vector.broadcast %148 : f32 to vector<8x128xf32>
    %150 = arith.mulf %149, %147 : vector<8x128xf32>
    %151 = arith.addf %129, %150 : vector<8x128xf32>
    %152 = arith.truncf %151 : vector<8x128xf32> to vector<8x128xbf16>
    %cst_54 = arith.constant dense<0.000000e+00> : vector<8x128xf32>
    %153 = tpu.matmul %152, %22, %cst_54 {dimension_numbers = #tpu.dot_dimension_numbers<[1], [0], [0], [1], [0, 0, 1, 1], [], []>} : vector<8x128xbf16>, vector<128x128xbf16>, vector<8x128xf32> -> vector<8x128xf32>
    %154 = arith.addf %153, %26 : vector<8x128xf32>
    %155 = math.tanh %154 : vector<8x128xf32>
    %156 = arith.truncf %155 : vector<8x128xf32> to vector<8x128xbf16>
    %cst_55 = arith.constant dense<0.000000e+00> : vector<8x128xf32>
    %157 = tpu.matmul %156, %23, %cst_55 {dimension_numbers = #tpu.dot_dimension_numbers<[1], [0], [0], [1], [0, 0, 1, 1], [], []>} : vector<8x128xbf16>, vector<128x128xbf16>, vector<8x128xf32> -> vector<8x128xf32>
    %158 = arith.addf %157, %29 : vector<8x128xf32>
    %159 = vector.broadcast %cst_21 : f32 to vector<8x128xf32>
    %160 = arith.mulf %159, %158 : vector<8x128xf32>
    %161 = arith.addf %129, %160 : vector<8x128xf32>
    %162 = arith.truncf %161 : vector<8x128xf32> to vector<8x128xbf16>
    %cst_56 = arith.constant dense<0.000000e+00> : vector<8x128xf32>
    %163 = tpu.matmul %162, %22, %cst_56 {dimension_numbers = #tpu.dot_dimension_numbers<[1], [0], [0], [1], [0, 0, 1, 1], [], []>} : vector<8x128xbf16>, vector<128x128xbf16>, vector<8x128xf32> -> vector<8x128xf32>
    %164 = arith.addf %163, %26 : vector<8x128xf32>
    %165 = math.tanh %164 : vector<8x128xf32>
    %166 = arith.truncf %165 : vector<8x128xf32> to vector<8x128xbf16>
    %cst_57 = arith.constant dense<0.000000e+00> : vector<8x128xf32>
    %167 = tpu.matmul %166, %23, %cst_57 {dimension_numbers = #tpu.dot_dimension_numbers<[1], [0], [0], [1], [0, 0, 1, 1], [], []>} : vector<8x128xbf16>, vector<128x128xbf16>, vector<8x128xf32> -> vector<8x128xf32>
    %168 = arith.addf %167, %29 : vector<8x128xf32>
    %cst_58 = arith.constant 6.000000e+00 : f32
    %169 = arith.divf %cst_21, %cst_58 : f32
    %cst_59 = arith.constant 2.000000e+00 : f32
    %170 = vector.broadcast %cst_59 : f32 to vector<8x128xf32>
    %171 = arith.mulf %170, %147 : vector<8x128xf32>
    %172 = arith.addf %136, %171 : vector<8x128xf32>
    %cst_60 = arith.constant 2.000000e+00 : f32
    %173 = vector.broadcast %cst_60 : f32 to vector<8x128xf32>
    %174 = arith.mulf %173, %158 : vector<8x128xf32>
    %175 = arith.addf %172, %174 : vector<8x128xf32>
    %176 = arith.addf %175, %168 : vector<8x128xf32>
    %177 = vector.broadcast %169 : f32 to vector<8x128xf32>
    %178 = arith.mulf %177, %176 : vector<8x128xf32>
    %179 = arith.addf %129, %178 : vector<8x128xf32>
    %c3_i32 = arith.constant 3 : i32
    %180 = arith.truncf %179 : vector<8x128xf32> to vector<8x128xbf16>
    %cst_61 = arith.constant dense<0.000000e+00> : vector<8x128xf32>
    %181 = tpu.matmul %180, %22, %cst_61 {dimension_numbers = #tpu.dot_dimension_numbers<[1], [0], [0], [1], [0, 0, 1, 1], [], []>} : vector<8x128xbf16>, vector<128x128xbf16>, vector<8x128xf32> -> vector<8x128xf32>
    %182 = arith.addf %181, %26 : vector<8x128xf32>
    %183 = math.tanh %182 : vector<8x128xf32>
    %184 = arith.truncf %183 : vector<8x128xf32> to vector<8x128xbf16>
    %cst_62 = arith.constant dense<0.000000e+00> : vector<8x128xf32>
    %185 = tpu.matmul %184, %23, %cst_62 {dimension_numbers = #tpu.dot_dimension_numbers<[1], [0], [0], [1], [0, 0, 1, 1], [], []>} : vector<8x128xbf16>, vector<128x128xbf16>, vector<8x128xf32> -> vector<8x128xf32>
    %186 = arith.addf %185, %29 : vector<8x128xf32>
    %cst_63 = arith.constant 5.000000e-01 : f32
    %187 = arith.mulf %cst_63, %cst_21 : f32
    %188 = vector.broadcast %187 : f32 to vector<8x128xf32>
    %189 = arith.mulf %188, %186 : vector<8x128xf32>
    %190 = arith.addf %179, %189 : vector<8x128xf32>
    %191 = arith.truncf %190 : vector<8x128xf32> to vector<8x128xbf16>
    %cst_64 = arith.constant dense<0.000000e+00> : vector<8x128xf32>
    %192 = tpu.matmul %191, %22, %cst_64 {dimension_numbers = #tpu.dot_dimension_numbers<[1], [0], [0], [1], [0, 0, 1, 1], [], []>} : vector<8x128xbf16>, vector<128x128xbf16>, vector<8x128xf32> -> vector<8x128xf32>
    %193 = arith.addf %192, %26 : vector<8x128xf32>
    %194 = math.tanh %193 : vector<8x128xf32>
    %195 = arith.truncf %194 : vector<8x128xf32> to vector<8x128xbf16>
    %cst_65 = arith.constant dense<0.000000e+00> : vector<8x128xf32>
    %196 = tpu.matmul %195, %23, %cst_65 {dimension_numbers = #tpu.dot_dimension_numbers<[1], [0], [0], [1], [0, 0, 1, 1], [], []>} : vector<8x128xbf16>, vector<128x128xbf16>, vector<8x128xf32> -> vector<8x128xf32>
    %197 = arith.addf %196, %29 : vector<8x128xf32>
    %cst_66 = arith.constant 5.000000e-01 : f32
    %198 = arith.mulf %cst_66, %cst_21 : f32
    %199 = vector.broadcast %198 : f32 to vector<8x128xf32>
    %200 = arith.mulf %199, %197 : vector<8x128xf32>
    %201 = arith.addf %179, %200 : vector<8x128xf32>
    %202 = arith.truncf %201 : vector<8x128xf32> to vector<8x128xbf16>
    %cst_67 = arith.constant dense<0.000000e+00> : vector<8x128xf32>
    %203 = tpu.matmul %202, %22, %cst_67 {dimension_numbers = #tpu.dot_dimension_numbers<[1], [0], [0], [1], [0, 0, 1, 1], [], []>} : vector<8x128xbf16>, vector<128x128xbf16>, vector<8x128xf32> -> vector<8x128xf32>
    %204 = arith.addf %203, %26 : vector<8x128xf32>
    %205 = math.tanh %204 : vector<8x128xf32>
    %206 = arith.truncf %205 : vector<8x128xf32> to vector<8x128xbf16>
    %cst_68 = arith.constant dense<0.000000e+00> : vector<8x128xf32>
    %207 = tpu.matmul %206, %23, %cst_68 {dimension_numbers = #tpu.dot_dimension_numbers<[1], [0], [0], [1], [0, 0, 1, 1], [], []>} : vector<8x128xbf16>, vector<128x128xbf16>, vector<8x128xf32> -> vector<8x128xf32>
    %208 = arith.addf %207, %29 : vector<8x128xf32>
    %209 = vector.broadcast %cst_21 : f32 to vector<8x128xf32>
    %210 = arith.mulf %209, %208 : vector<8x128xf32>
    %211 = arith.addf %179, %210 : vector<8x128xf32>
    %212 = arith.truncf %211 : vector<8x128xf32> to vector<8x128xbf16>
    %cst_69 = arith.constant dense<0.000000e+00> : vector<8x128xf32>
    %213 = tpu.matmul %212, %22, %cst_69 {dimension_numbers = #tpu.dot_dimension_numbers<[1], [0], [0], [1], [0, 0, 1, 1], [], []>} : vector<8x128xbf16>, vector<128x128xbf16>, vector<8x128xf32> -> vector<8x128xf32>
    %214 = arith.addf %213, %26 : vector<8x128xf32>
    %215 = math.tanh %214 : vector<8x128xf32>
    %216 = arith.truncf %215 : vector<8x128xf32> to vector<8x128xbf16>
    %cst_70 = arith.constant dense<0.000000e+00> : vector<8x128xf32>
    %217 = tpu.matmul %216, %23, %cst_70 {dimension_numbers = #tpu.dot_dimension_numbers<[1], [0], [0], [1], [0, 0, 1, 1], [], []>} : vector<8x128xbf16>, vector<128x128xbf16>, vector<8x128xf32> -> vector<8x128xf32>
    %218 = arith.addf %217, %29 : vector<8x128xf32>
    %cst_71 = arith.constant 6.000000e+00 : f32
    %219 = arith.divf %cst_21, %cst_71 : f32
    %cst_72 = arith.constant 2.000000e+00 : f32
    %220 = vector.broadcast %cst_72 : f32 to vector<8x128xf32>
    %221 = arith.mulf %220, %197 : vector<8x128xf32>
    %222 = arith.addf %186, %221 : vector<8x128xf32>
    %cst_73 = arith.constant 2.000000e+00 : f32
    %223 = vector.broadcast %cst_73 : f32 to vector<8x128xf32>
    %224 = arith.mulf %223, %208 : vector<8x128xf32>
    %225 = arith.addf %222, %224 : vector<8x128xf32>
    %226 = arith.addf %225, %218 : vector<8x128xf32>
    %227 = vector.broadcast %219 : f32 to vector<8x128xf32>
    %228 = arith.mulf %227, %226 : vector<8x128xf32>
    %229 = arith.addf %179, %228 : vector<8x128xf32>
    %c4_i32 = arith.constant 4 : i32
    %230 = arith.truncf %229 : vector<8x128xf32> to vector<8x128xbf16>
    %cst_74 = arith.constant dense<0.000000e+00> : vector<8x128xf32>
    %231 = tpu.matmul %230, %22, %cst_74 {dimension_numbers = #tpu.dot_dimension_numbers<[1], [0], [0], [1], [0, 0, 1, 1], [], []>} : vector<8x128xbf16>, vector<128x128xbf16>, vector<8x128xf32> -> vector<8x128xf32>
    %232 = arith.addf %231, %26 : vector<8x128xf32>
    %233 = math.tanh %232 : vector<8x128xf32>
    %234 = arith.truncf %233 : vector<8x128xf32> to vector<8x128xbf16>
    %cst_75 = arith.constant dense<0.000000e+00> : vector<8x128xf32>
    %235 = tpu.matmul %234, %23, %cst_75 {dimension_numbers = #tpu.dot_dimension_numbers<[1], [0], [0], [1], [0, 0, 1, 1], [], []>} : vector<8x128xbf16>, vector<128x128xbf16>, vector<8x128xf32> -> vector<8x128xf32>
    %236 = arith.addf %235, %29 : vector<8x128xf32>
    %cst_76 = arith.constant 5.000000e-01 : f32
    %237 = arith.mulf %cst_76, %cst_21 : f32
    %238 = vector.broadcast %237 : f32 to vector<8x128xf32>
    %239 = arith.mulf %238, %236 : vector<8x128xf32>
    %240 = arith.addf %229, %239 : vector<8x128xf32>
    %241 = arith.truncf %240 : vector<8x128xf32> to vector<8x128xbf16>
    %cst_77 = arith.constant dense<0.000000e+00> : vector<8x128xf32>
    %242 = tpu.matmul %241, %22, %cst_77 {dimension_numbers = #tpu.dot_dimension_numbers<[1], [0], [0], [1], [0, 0, 1, 1], [], []>} : vector<8x128xbf16>, vector<128x128xbf16>, vector<8x128xf32> -> vector<8x128xf32>
    %243 = arith.addf %242, %26 : vector<8x128xf32>
    %244 = math.tanh %243 : vector<8x128xf32>
    %245 = arith.truncf %244 : vector<8x128xf32> to vector<8x128xbf16>
    %cst_78 = arith.constant dense<0.000000e+00> : vector<8x128xf32>
    %246 = tpu.matmul %245, %23, %cst_78 {dimension_numbers = #tpu.dot_dimension_numbers<[1], [0], [0], [1], [0, 0, 1, 1], [], []>} : vector<8x128xbf16>, vector<128x128xbf16>, vector<8x128xf32> -> vector<8x128xf32>
    %247 = arith.addf %246, %29 : vector<8x128xf32>
    %cst_79 = arith.constant 5.000000e-01 : f32
    %248 = arith.mulf %cst_79, %cst_21 : f32
    %249 = vector.broadcast %248 : f32 to vector<8x128xf32>
    %250 = arith.mulf %249, %247 : vector<8x128xf32>
    %251 = arith.addf %229, %250 : vector<8x128xf32>
    %252 = arith.truncf %251 : vector<8x128xf32> to vector<8x128xbf16>
    %cst_80 = arith.constant dense<0.000000e+00> : vector<8x128xf32>
    %253 = tpu.matmul %252, %22, %cst_80 {dimension_numbers = #tpu.dot_dimension_numbers<[1], [0], [0], [1], [0, 0, 1, 1], [], []>} : vector<8x128xbf16>, vector<128x128xbf16>, vector<8x128xf32> -> vector<8x128xf32>
    %254 = arith.addf %253, %26 : vector<8x128xf32>
    %255 = math.tanh %254 : vector<8x128xf32>
    %256 = arith.truncf %255 : vector<8x128xf32> to vector<8x128xbf16>
    %cst_81 = arith.constant dense<0.000000e+00> : vector<8x128xf32>
    %257 = tpu.matmul %256, %23, %cst_81 {dimension_numbers = #tpu.dot_dimension_numbers<[1], [0], [0], [1], [0, 0, 1, 1], [], []>} : vector<8x128xbf16>, vector<128x128xbf16>, vector<8x128xf32> -> vector<8x128xf32>
    %258 = arith.addf %257, %29 : vector<8x128xf32>
    %259 = vector.broadcast %cst_21 : f32 to vector<8x128xf32>
    %260 = arith.mulf %259, %258 : vector<8x128xf32>
    %261 = arith.addf %229, %260 : vector<8x128xf32>
    %262 = arith.truncf %261 : vector<8x128xf32> to vector<8x128xbf16>
    %cst_82 = arith.constant dense<0.000000e+00> : vector<8x128xf32>
    %263 = tpu.matmul %262, %22, %cst_82 {dimension_numbers = #tpu.dot_dimension_numbers<[1], [0], [0], [1], [0, 0, 1, 1], [], []>} : vector<8x128xbf16>, vector<128x128xbf16>, vector<8x128xf32> -> vector<8x128xf32>
    %264 = arith.addf %263, %26 : vector<8x128xf32>
    %265 = math.tanh %264 : vector<8x128xf32>
    %266 = arith.truncf %265 : vector<8x128xf32> to vector<8x128xbf16>
    %cst_83 = arith.constant dense<0.000000e+00> : vector<8x128xf32>
    %267 = tpu.matmul %266, %23, %cst_83 {dimension_numbers = #tpu.dot_dimension_numbers<[1], [0], [0], [1], [0, 0, 1, 1], [], []>} : vector<8x128xbf16>, vector<128x128xbf16>, vector<8x128xf32> -> vector<8x128xf32>
    %268 = arith.addf %267, %29 : vector<8x128xf32>
    %cst_84 = arith.constant 6.000000e+00 : f32
    %269 = arith.divf %cst_21, %cst_84 : f32
    %cst_85 = arith.constant 2.000000e+00 : f32
    %270 = vector.broadcast %cst_85 : f32 to vector<8x128xf32>
    %271 = arith.mulf %270, %247 : vector<8x128xf32>
    %272 = arith.addf %236, %271 : vector<8x128xf32>
    %cst_86 = arith.constant 2.000000e+00 : f32
    %273 = vector.broadcast %cst_86 : f32 to vector<8x128xf32>
    %274 = arith.mulf %273, %258 : vector<8x128xf32>
    %275 = arith.addf %272, %274 : vector<8x128xf32>
    %276 = arith.addf %275, %268 : vector<8x128xf32>
    %277 = vector.broadcast %269 : f32 to vector<8x128xf32>
    %278 = arith.mulf %277, %276 : vector<8x128xf32>
    %279 = arith.addf %229, %278 : vector<8x128xf32>
    %c5_i32 = arith.constant 5 : i32
    %280 = arith.truncf %279 : vector<8x128xf32> to vector<8x128xbf16>
    %cst_87 = arith.constant dense<0.000000e+00> : vector<8x128xf32>
    %281 = tpu.matmul %280, %22, %cst_87 {dimension_numbers = #tpu.dot_dimension_numbers<[1], [0], [0], [1], [0, 0, 1, 1], [], []>} : vector<8x128xbf16>, vector<128x128xbf16>, vector<8x128xf32> -> vector<8x128xf32>
    %282 = arith.addf %281, %26 : vector<8x128xf32>
    %283 = math.tanh %282 : vector<8x128xf32>
    %284 = arith.truncf %283 : vector<8x128xf32> to vector<8x128xbf16>
    %cst_88 = arith.constant dense<0.000000e+00> : vector<8x128xf32>
    %285 = tpu.matmul %284, %23, %cst_88 {dimension_numbers = #tpu.dot_dimension_numbers<[1], [0], [0], [1], [0, 0, 1, 1], [], []>} : vector<8x128xbf16>, vector<128x128xbf16>, vector<8x128xf32> -> vector<8x128xf32>
    %286 = arith.addf %285, %29 : vector<8x128xf32>
    %cst_89 = arith.constant 5.000000e-01 : f32
    %287 = arith.mulf %cst_89, %cst_21 : f32
    %288 = vector.broadcast %287 : f32 to vector<8x128xf32>
    %289 = arith.mulf %288, %286 : vector<8x128xf32>
    %290 = arith.addf %279, %289 : vector<8x128xf32>
    %291 = arith.truncf %290 : vector<8x128xf32> to vector<8x128xbf16>
    %cst_90 = arith.constant dense<0.000000e+00> : vector<8x128xf32>
    %292 = tpu.matmul %291, %22, %cst_90 {dimension_numbers = #tpu.dot_dimension_numbers<[1], [0], [0], [1], [0, 0, 1, 1], [], []>} : vector<8x128xbf16>, vector<128x128xbf16>, vector<8x128xf32> -> vector<8x128xf32>
    %293 = arith.addf %292, %26 : vector<8x128xf32>
    %294 = math.tanh %293 : vector<8x128xf32>
    %295 = arith.truncf %294 : vector<8x128xf32> to vector<8x128xbf16>
    %cst_91 = arith.constant dense<0.000000e+00> : vector<8x128xf32>
    %296 = tpu.matmul %295, %23, %cst_91 {dimension_numbers = #tpu.dot_dimension_numbers<[1], [0], [0], [1], [0, 0, 1, 1], [], []>} : vector<8x128xbf16>, vector<128x128xbf16>, vector<8x128xf32> -> vector<8x128xf32>
    %297 = arith.addf %296, %29 : vector<8x128xf32>
    %cst_92 = arith.constant 5.000000e-01 : f32
    %298 = arith.mulf %cst_92, %cst_21 : f32
    %299 = vector.broadcast %298 : f32 to vector<8x128xf32>
    %300 = arith.mulf %299, %297 : vector<8x128xf32>
    %301 = arith.addf %279, %300 : vector<8x128xf32>
    %302 = arith.truncf %301 : vector<8x128xf32> to vector<8x128xbf16>
    %cst_93 = arith.constant dense<0.000000e+00> : vector<8x128xf32>
    %303 = tpu.matmul %302, %22, %cst_93 {dimension_numbers = #tpu.dot_dimension_numbers<[1], [0], [0], [1], [0, 0, 1, 1], [], []>} : vector<8x128xbf16>, vector<128x128xbf16>, vector<8x128xf32> -> vector<8x128xf32>
    %304 = arith.addf %303, %26 : vector<8x128xf32>
    %305 = math.tanh %304 : vector<8x128xf32>
    %306 = arith.truncf %305 : vector<8x128xf32> to vector<8x128xbf16>
    %cst_94 = arith.constant dense<0.000000e+00> : vector<8x128xf32>
    %307 = tpu.matmul %306, %23, %cst_94 {dimension_numbers = #tpu.dot_dimension_numbers<[1], [0], [0], [1], [0, 0, 1, 1], [], []>} : vector<8x128xbf16>, vector<128x128xbf16>, vector<8x128xf32> -> vector<8x128xf32>
    %308 = arith.addf %307, %29 : vector<8x128xf32>
    %309 = vector.broadcast %cst_21 : f32 to vector<8x128xf32>
    %310 = arith.mulf %309, %308 : vector<8x128xf32>
    %311 = arith.addf %279, %310 : vector<8x128xf32>
    %312 = arith.truncf %311 : vector<8x128xf32> to vector<8x128xbf16>
    %cst_95 = arith.constant dense<0.000000e+00> : vector<8x128xf32>
    %313 = tpu.matmul %312, %22, %cst_95 {dimension_numbers = #tpu.dot_dimension_numbers<[1], [0], [0], [1], [0, 0, 1, 1], [], []>} : vector<8x128xbf16>, vector<128x128xbf16>, vector<8x128xf32> -> vector<8x128xf32>
    %314 = arith.addf %313, %26 : vector<8x128xf32>
    %315 = math.tanh %314 : vector<8x128xf32>
    %316 = arith.truncf %315 : vector<8x128xf32> to vector<8x128xbf16>
    %cst_96 = arith.constant dense<0.000000e+00> : vector<8x128xf32>
    %317 = tpu.matmul %316, %23, %cst_96 {dimension_numbers = #tpu.dot_dimension_numbers<[1], [0], [0], [1], [0, 0, 1, 1], [], []>} : vector<8x128xbf16>, vector<128x128xbf16>, vector<8x128xf32> -> vector<8x128xf32>
    %318 = arith.addf %317, %29 : vector<8x128xf32>
    %cst_97 = arith.constant 6.000000e+00 : f32
    %319 = arith.divf %cst_21, %cst_97 : f32
    %cst_98 = arith.constant 2.000000e+00 : f32
    %320 = vector.broadcast %cst_98 : f32 to vector<8x128xf32>
    %321 = arith.mulf %320, %297 : vector<8x128xf32>
    %322 = arith.addf %286, %321 : vector<8x128xf32>
    %cst_99 = arith.constant 2.000000e+00 : f32
    %323 = vector.broadcast %cst_99 : f32 to vector<8x128xf32>
    %324 = arith.mulf %323, %308 : vector<8x128xf32>
    %325 = arith.addf %322, %324 : vector<8x128xf32>
    %326 = arith.addf %325, %318 : vector<8x128xf32>
    %327 = vector.broadcast %319 : f32 to vector<8x128xf32>
    %328 = arith.mulf %327, %326 : vector<8x128xf32>
    %329 = arith.addf %279, %328 : vector<8x128xf32>
    %c6_i32 = arith.constant 6 : i32
    %330 = arith.truncf %329 : vector<8x128xf32> to vector<8x128xbf16>
    %cst_100 = arith.constant dense<0.000000e+00> : vector<8x128xf32>
    %331 = tpu.matmul %330, %22, %cst_100 {dimension_numbers = #tpu.dot_dimension_numbers<[1], [0], [0], [1], [0, 0, 1, 1], [], []>} : vector<8x128xbf16>, vector<128x128xbf16>, vector<8x128xf32> -> vector<8x128xf32>
    %332 = arith.addf %331, %26 : vector<8x128xf32>
    %333 = math.tanh %332 : vector<8x128xf32>
    %334 = arith.truncf %333 : vector<8x128xf32> to vector<8x128xbf16>
    %cst_101 = arith.constant dense<0.000000e+00> : vector<8x128xf32>
    %335 = tpu.matmul %334, %23, %cst_101 {dimension_numbers = #tpu.dot_dimension_numbers<[1], [0], [0], [1], [0, 0, 1, 1], [], []>} : vector<8x128xbf16>, vector<128x128xbf16>, vector<8x128xf32> -> vector<8x128xf32>
    %336 = arith.addf %335, %29 : vector<8x128xf32>
    %cst_102 = arith.constant 5.000000e-01 : f32
    %337 = arith.mulf %cst_102, %cst_21 : f32
    %338 = vector.broadcast %337 : f32 to vector<8x128xf32>
    %339 = arith.mulf %338, %336 : vector<8x128xf32>
    %340 = arith.addf %329, %339 : vector<8x128xf32>
    %341 = arith.truncf %340 : vector<8x128xf32> to vector<8x128xbf16>
    %cst_103 = arith.constant dense<0.000000e+00> : vector<8x128xf32>
    %342 = tpu.matmul %341, %22, %cst_103 {dimension_numbers = #tpu.dot_dimension_numbers<[1], [0], [0], [1], [0, 0, 1, 1], [], []>} : vector<8x128xbf16>, vector<128x128xbf16>, vector<8x128xf32> -> vector<8x128xf32>
    %343 = arith.addf %342, %26 : vector<8x128xf32>
    %344 = math.tanh %343 : vector<8x128xf32>
    %345 = arith.truncf %344 : vector<8x128xf32> to vector<8x128xbf16>
    %cst_104 = arith.constant dense<0.000000e+00> : vector<8x128xf32>
    %346 = tpu.matmul %345, %23, %cst_104 {dimension_numbers = #tpu.dot_dimension_numbers<[1], [0], [0], [1], [0, 0, 1, 1], [], []>} : vector<8x128xbf16>, vector<128x128xbf16>, vector<8x128xf32> -> vector<8x128xf32>
    %347 = arith.addf %346, %29 : vector<8x128xf32>
    %cst_105 = arith.constant 5.000000e-01 : f32
    %348 = arith.mulf %cst_105, %cst_21 : f32
    %349 = vector.broadcast %348 : f32 to vector<8x128xf32>
    %350 = arith.mulf %349, %347 : vector<8x128xf32>
    %351 = arith.addf %329, %350 : vector<8x128xf32>
    %352 = arith.truncf %351 : vector<8x128xf32> to vector<8x128xbf16>
    %cst_106 = arith.constant dense<0.000000e+00> : vector<8x128xf32>
    %353 = tpu.matmul %352, %22, %cst_106 {dimension_numbers = #tpu.dot_dimension_numbers<[1], [0], [0], [1], [0, 0, 1, 1], [], []>} : vector<8x128xbf16>, vector<128x128xbf16>, vector<8x128xf32> -> vector<8x128xf32>
    %354 = arith.addf %353, %26 : vector<8x128xf32>
    %355 = math.tanh %354 : vector<8x128xf32>
    %356 = arith.truncf %355 : vector<8x128xf32> to vector<8x128xbf16>
    %cst_107 = arith.constant dense<0.000000e+00> : vector<8x128xf32>
    %357 = tpu.matmul %356, %23, %cst_107 {dimension_numbers = #tpu.dot_dimension_numbers<[1], [0], [0], [1], [0, 0, 1, 1], [], []>} : vector<8x128xbf16>, vector<128x128xbf16>, vector<8x128xf32> -> vector<8x128xf32>
    %358 = arith.addf %357, %29 : vector<8x128xf32>
    %359 = vector.broadcast %cst_21 : f32 to vector<8x128xf32>
    %360 = arith.mulf %359, %358 : vector<8x128xf32>
    %361 = arith.addf %329, %360 : vector<8x128xf32>
    %362 = arith.truncf %361 : vector<8x128xf32> to vector<8x128xbf16>
    %cst_108 = arith.constant dense<0.000000e+00> : vector<8x128xf32>
    %363 = tpu.matmul %362, %22, %cst_108 {dimension_numbers = #tpu.dot_dimension_numbers<[1], [0], [0], [1], [0, 0, 1, 1], [], []>} : vector<8x128xbf16>, vector<128x128xbf16>, vector<8x128xf32> -> vector<8x128xf32>
    %364 = arith.addf %363, %26 : vector<8x128xf32>
    %365 = math.tanh %364 : vector<8x128xf32>
    %366 = arith.truncf %365 : vector<8x128xf32> to vector<8x128xbf16>
    %cst_109 = arith.constant dense<0.000000e+00> : vector<8x128xf32>
    %367 = tpu.matmul %366, %23, %cst_109 {dimension_numbers = #tpu.dot_dimension_numbers<[1], [0], [0], [1], [0, 0, 1, 1], [], []>} : vector<8x128xbf16>, vector<128x128xbf16>, vector<8x128xf32> -> vector<8x128xf32>
    %368 = arith.addf %367, %29 : vector<8x128xf32>
    %cst_110 = arith.constant 6.000000e+00 : f32
    %369 = arith.divf %cst_21, %cst_110 : f32
    %cst_111 = arith.constant 2.000000e+00 : f32
    %370 = vector.broadcast %cst_111 : f32 to vector<8x128xf32>
    %371 = arith.mulf %370, %347 : vector<8x128xf32>
    %372 = arith.addf %336, %371 : vector<8x128xf32>
    %cst_112 = arith.constant 2.000000e+00 : f32
    %373 = vector.broadcast %cst_112 : f32 to vector<8x128xf32>
    %374 = arith.mulf %373, %358 : vector<8x128xf32>
    %375 = arith.addf %372, %374 : vector<8x128xf32>
    %376 = arith.addf %375, %368 : vector<8x128xf32>
    %377 = vector.broadcast %369 : f32 to vector<8x128xf32>
    %378 = arith.mulf %377, %376 : vector<8x128xf32>
    %379 = arith.addf %329, %378 : vector<8x128xf32>
    %c0_113 = arith.constant 0 : index
    %c0_114 = arith.constant 0 : index
    %380 = vector.load %arg8[%c0_113, %c0_114] : memref<8x128xf32, #tpu.memory_space<vmem>>, vector<8x128xf32>
    tpu.vector_store %arg8[%c0_113, %c0_114], %379 {strides = array<i32>} : memref<8x128xf32, #tpu.memory_space<vmem>>, vector<8x128xf32>,
    return
  }
  func.func @transform_0(%arg0: i32) -> (i32, i32) {
    %c0_i32 = arith.constant 0 : i32
    %c0_i32_0 = arith.constant 0 : i32
    return %arg0, %c0_i32 : i32, i32
  }
  func.func @transform_1(%arg0: i32) -> (i32, i32) {
    %c0_i32 = arith.constant 0 : i32
    %c0_i32_0 = arith.constant 0 : i32
    %c0_i32_1 = arith.constant 0 : i32
    return %c0_i32, %c0_i32_0 : i32, i32
  }
  func.func @transform_2(%arg0: i32) -> (i32, i32) {
    %c0_i32 = arith.constant 0 : i32
    %c0_i32_0 = arith.constant 0 : i32
    %c0_i32_1 = arith.constant 0 : i32
    return %c0_i32, %c0_i32_0 : i32, i32
  }
  func.func @transform_3(%arg0: i32) -> (i32, i32) {
    %c0_i32 = arith.constant 0 : i32
    %c0_i32_0 = arith.constant 0 : i32
    %c0_i32_1 = arith.constant 0 : i32
    return %c0_i32, %c0_i32_0 : i32, i32
  }
  func.func @transform_4(%arg0: i32) -> (i32, i32) {
    %c0_i32 = arith.constant 0 : i32
    %c0_i32_0 = arith.constant 0 : i32
    %c0_i32_1 = arith.constant 0 : i32
    return %c0_i32, %c0_i32_0 : i32, i32
  }
  func.func @transform_5(%arg0: i32) -> (i32, i32) {
    %c0_i32 = arith.constant 0 : i32
    %c0_i32_0 = arith.constant 0 : i32
    %c0_i32_1 = arith.constant 0 : i32
    return %c0_i32, %c0_i32_0 : i32, i32
  }
  func.func @transform_6(%arg0: i32) -> (i32, i32) {
    %c0_i32 = arith.constant 0 : i32
    %c0_i32_0 = arith.constant 0 : i32
    %c0_i32_1 = arith.constant 0 : i32
    return %c0_i32, %c0_i32_0 : i32, i32
  }
  func.func @transform_7(%arg0: i32) -> (i32, i32) {
    %c0_i32 = arith.constant 0 : i32
    %c0_i32_0 = arith.constant 0 : i32
    return %arg0, %c0_i32 : i32, i32
  }
}

</mosaic_0001>

<bundles_post_ra>
// kernel: tpu_custom_call.1
= control target key start
LH: loop header
LB: loop body
LE: loop exit
PB: predicated region body
PF: predicated region fallthrough
CT: control target
= control target key end

     0   :  { %12 = vsyncpa [#allocation3], 0  ;;  %s6460_s0 = inlined_call_operand.hbm [shape: f32[8,8], index: 0, kind: input, shape index: {}]   ;;  %s6461_s1 = inlined_call_operand.hbm [shape: f32[8,128], index: 1, kind: input, shape index: {}]   ;;  %s6462_s2 = inlined_call_operand.hbm [shape: bf16[128,128], index: 2, kind: input, shape index: {}]   ;;  %s6463_s3 = inlined_call_operand.hbm [shape: bf16[128,128], index: 3, kind: input, shape index: {}]   ;;  %s6464_s4 = inlined_call_operand.hbm [shape: bf16[128,128], index: 4, kind: input, shape index: {}]   ;;  %s6465_s5 = inlined_call_operand.hbm [shape: bf16[128,128], index: 5, kind: input, shape index: {}]   ;;  %s6466_s6 = inlined_call_operand.vmem [shape: f32[8,128], index: 6, kind: input, shape index: {}]   ;;  %s6467_s7 = inlined_call_operand.hbm [shape: f32[8,128], index: 7, kind: output, shape index: {}]  }
   0x1   :  { %13 = vsyncpa [#allocation6], 0 }
   0x2   :  { %14 = vsyncpa [#allocation9], 0 }
   0x3   :  { %15 = vsyncpa [#allocation12], 0 }
   0x4   :  { %16 = vsyncpa [#allocation4], 0  ;;  %s5007_s24 = smov [#allocation5]   ;;  %s4843_s28 = scalar_lea.hbm %s6461_s1, 128 }
   0x5   :  { %s33_s25 = sshll.u32 %s5007_s24, 4  ;;  %p4844_p0 = scmp.ne.s32.totalorder %s6461_s1, %s4843_s28  ;;  %s34_s25 = int_to_ptr.vmem [resolvable:$true] %s33_s25 }
   0x6   :  { %p4847_p1 = scmp.lt.u32.totalorder %s4843_s28, %s6461_s1 }
   0x8   :  { %p4849_p2 = pnand %p4847_p1, %p4844_p0 }
   0xa   :  { %4852 = shalt.err (!%p4849_p2)
}
   0xb   :  { %s4853_s10 = scalar_lea.vmem %s34_s25, 128  ;;  %p4858_p4 = scmp.lt.s32.totalorder %s34_s25, %s34_s25 }
   0xc   :  { %p4854_p3 = scmp.ne.s32.totalorder %s34_s25, %s4853_s10  ;;  %p4859_p5 = scmp.lt.s32.totalorder %s4853_s10, %s4853_s10 }
   0xe   :  { %p4860_p6 = por %p4859_p5, %p4858_p4 }
  0x10   :  { %p4861_p7 = pnand %p4860_p6, %p4854_p3 }
  0x12   :  { %4864 = shalt.err (!%p4861_p7)
}
  0x13   :  { %36 = dma.hbm_to_vmem [thread:$0]  %s6461_s1, 128, %s34_s25, [#allocation6]  }
  0x14   :  { %s5008_s13 = smov [#allocation8]   ;;  %s5009_s15 = smov [#allocation2]  }
  0x15   :  { %s54_s14 = sshll.u32 %s5008_s13, 4  ;;  %s23_s16 = sshll.u32 %s5009_s15, 4  ;;  %s55_s14 = int_to_ptr.vmem [resolvable:$true] %s54_s14  ;;  %s24_s16 = int_to_ptr.vmem [resolvable:$true] %s23_s16 }
  0x16   :  { %s4865_s19 = scalar_lea.hbm %s6463_s3, 1024 }
  0x17   :  { %p4866_p8 = scmp.ne.s32.totalorder %s6463_s3, %s4865_s19  ;;  %p4869_p9 = scmp.lt.u32.totalorder %s4865_s19, %s6463_s3 }
  0x19   :  { %p4871_p10 = pnand %p4869_p9, %p4866_p8 }
  0x1b   :  { %4874 = shalt.err (!%p4871_p10)
}
  0x1c   :  { %s4875_s1 = scalar_lea.vmem %s55_s14, 1024  ;;  %p4880_p12 = scmp.lt.s32.totalorder %s55_s14, %s55_s14 }
  0x1d   :  { %p4876_p11 = scmp.ne.s32.totalorder %s55_s14, %s4875_s1  ;;  %p4881_p13 = scmp.lt.s32.totalorder %s4875_s1, %s4875_s1 }
  0x1f   :  { %p4882_p0 = por %p4881_p13, %p4880_p12 }
  0x21   :  { %p4883_p1 = pnand %p4882_p0, %p4876_p11 }
  0x23   :  { %4886 = shalt.err (!%p4883_p1)
}
  0x24   :  { %s5010_s24 = smov 64   ;;  %s5011_s25 = smov 4  }
  0x25   :  { %60 = dma.hbm_to_vmem [thread:$0]  %s6463_s3, 1024, %s55_s14, [#allocation9], %s5010_s24, %s5010_s24, %s5011_s25  }
  0x26   :  { %s4887_s30 = scalar_lea.hbm %s6460_s0, 128 }
  0x27   :  { %p4888_p2 = scmp.ne.s32.totalorder %s6460_s0, %s4887_s30  ;;  %p4891_p3 = scmp.lt.u32.totalorder %s4887_s30, %s6460_s0 }
  0x29   :  { %p4893_p4 = pnand %p4891_p3, %p4888_p2 }
  0x2b   :  { %4896 = shalt.err (!%p4893_p4)
}
  0x2c   :  { %s4897_s12 = scalar_lea.vmem %s24_s16, 128  ;;  %p4902_p6 = scmp.lt.s32.totalorder %s24_s16, %s24_s16 }
  0x2d   :  { %p4898_p5 = scmp.ne.s32.totalorder %s24_s16, %s4897_s12  ;;  %p4903_p7 = scmp.lt.s32.totalorder %s4897_s12, %s4897_s12 }
  0x2f   :  { %p4904_p8 = por %p4903_p7, %p4902_p6 }
  0x31   :  { %p4905_p9 = pnand %p4904_p8, %p4898_p5 }
  0x33   :  { %4908 = shalt.err (!%p4905_p9)
}
  0x34   :  { %26 = dma.hbm_to_vmem [thread:$0]  %s6460_s0, 128, %s24_s16, [#allocation3]  }
  0x35   :  { %s5012_s14 = smov [#allocation7]   ;;  %s5013_s17 = smov [#allocation10]  }
  0x36   :  { %s42_s15 = sshll.u32 %s5012_s14, 4  ;;  %s66_s18 = sshll.u32 %s5013_s17, 4  ;;  %s43_s15 = int_to_ptr.vmem [resolvable:$true] %s42_s15  ;;  %s67_s18 = int_to_ptr.vmem [resolvable:$true] %s66_s18 }
  0x37   :  { %s4909_s21 = scalar_lea.hbm %s6462_s2, 1024 }
  0x38   :  { %p4910_p10 = scmp.ne.s32.totalorder %s6462_s2, %s4909_s21  ;;  %p4913_p11 = scmp.lt.u32.totalorder %s4909_s21, %s6462_s2 }
  0x3a   :  { %p4915_p12 = pnand %p4913_p11, %p4910_p10 }
  0x3c   :  { %4918 = shalt.err (!%p4915_p12)
}
  0x3d   :  { %s4919_s0 = scalar_lea.vmem %s43_s15, 1024  ;;  %p4924_p0 = scmp.lt.s32.totalorder %s43_s15, %s43_s15 }
  0x3e   :  { %p4920_p13 = scmp.ne.s32.totalorder %s43_s15, %s4919_s0  ;;  %p4925_p1 = scmp.lt.s32.totalorder %s4919_s0, %s4919_s0 }
  0x40   :  { %p4926_p2 = por %p4925_p1, %p4924_p0 }
  0x42   :  { %p4927_p3 = pnand %p4926_p2, %p4920_p13 }
  0x44   :  { %4930 = shalt.err (!%p4927_p3)
}
  0x45   :  { %48 = dma.hbm_to_vmem [thread:$0]  %s6462_s2, 1024, %s43_s15, [#allocation6], %s5010_s24, %s5010_s24, %s5011_s25  }
  0x46   :  { %s4931_s30 = scalar_lea.hbm %s6464_s4, 1024 }
  0x47   :  { %p4932_p4 = scmp.ne.s32.totalorder %s6464_s4, %s4931_s30  ;;  %p4935_p5 = scmp.lt.u32.totalorder %s4931_s30, %s6464_s4 }
  0x49   :  { %p4937_p6 = pnand %p4935_p5, %p4932_p4 }
  0x4b   :  { %4940 = shalt.err (!%p4937_p6)
}
  0x4c   :  { %s4941_s12 = scalar_lea.vmem %s67_s18, 1024  ;;  %p4946_p8 = scmp.lt.s32.totalorder %s67_s18, %s67_s18 }
  0x4d   :  { %p4942_p7 = scmp.ne.s32.totalorder %s67_s18, %s4941_s12  ;;  %p4947_p9 = scmp.lt.s32.totalorder %s4941_s12, %s4941_s12 }
  0x4f   :  { %p4948_p10 = por %p4947_p9, %p4946_p8 }
  0x51   :  { %p4949_p11 = pnand %p4948_p10, %p4942_p7 }
  0x53   :  { %4952 = shalt.err (!%p4949_p11)
}
  0x54   :  { %72 = dma.hbm_to_vmem [thread:$0]  %s6464_s4, 1024, %s67_s18, [#allocation9], %s5010_s24, %s5010_s24, %s5011_s25  }
  0x55   :  { %s5014_s13 = smov [#allocation11]   ;;  %s4953_s19 = scalar_lea.hbm %s6465_s5, 1024 }
  0x56   :  { %s78_s14 = sshll.u32 %s5014_s13, 4  ;;  %p4954_p12 = scmp.ne.s32.totalorder %s6465_s5, %s4953_s19  ;;  %s79_s14 = int_to_ptr.vmem [resolvable:$true] %s78_s14 }
  0x57   :  { %p4957_p13 = scmp.lt.u32.totalorder %s4953_s19, %s6465_s5 }
  0x59   :  { %p4959_p0 = pnand %p4957_p13, %p4954_p12 }
  0x5b   :  { %4962 = shalt.err (!%p4959_p0)
}
  0x5c   :  { %s4963_s1 = scalar_lea.vmem %s79_s14, 1024  ;;  %p4968_p2 = scmp.lt.s32.totalorder %s79_s14, %s79_s14 }
  0x5d   :  { %p4964_p1 = scmp.ne.s32.totalorder %s79_s14, %s4963_s1  ;;  %p4969_p3 = scmp.lt.s32.totalorder %s4963_s1, %s4963_s1 }
  0x5f   :  { %p4970_p4 = por %p4969_p3, %p4968_p2 }
  0x61   :  { %p4971_p5 = pnand %p4970_p4, %p4964_p1 }
  0x63   :  { %4974 = shalt.err (!%p4971_p5)
}
  0x64   :  { %84 = dma.hbm_to_vmem [thread:$0]  %s6465_s5, 1024, %s79_s14, [#allocation12], %s5010_s24, %s5010_s24, %s5011_s25  }
  0x65   :  { %4997 = dma.done.wait [#allocation3], 128  }
  0x66   :  { %4998 = vsyncadd [#allocation3], 4294967168 }
  0x67   :  { %4999 = dma.done.wait [#allocation6], 1152  }
  0x68   :  { %5000 = vsyncadd [#allocation6], 4294966144 }
  0x69   :  { %5001 = dma.done.wait [#allocation9], 2048  }
  0x6a   :  { %5002 = vsyncadd [#allocation9], 4294965248 }
  0x6b   :  { %5003 = dma.done.wait [#allocation12], 1024  }
  0x6c   :  { %5004 = vsyncadd [#allocation12], 4294966272  ;;  %v5015_v0 = vmov 0.0   ;;  %vm5016_vm0 = vmmov 0   ;;  %vm115_vm1 = vcmask 64512   ;;  %v110_v1 = vld [vmem:[#allocation5] sm:$0xff] }
  0x6d   :  { %3543 = vmatprep.subr.mxu0 %v5015_v0  ;;  %3545 = vmatprep.mubr.msk.f32.mxu0 %vm5016_vm0, %v5015_v0  ;;  %v109_v2 = vld [vmem:[#allocation2] sm:$0xff]  ;;  %v4719_v3 = vld [vmem:[#allocation7] sm:$0xff]   ;;  %v4720_v4 = vld [vmem:[#allocation7 + $0x8] sm:$0xff]  }
  0x6e   :  { %3548 = vmatprep.subr.bf16.mxu1 %v5015_v0  ;;  %3564 = vmatprep.mubr.msk.bf16.mxu1 %vm5016_vm0, %v5015_v0  ;;  %v4721_v5 = vld [vmem:[#allocation7 + $0x10] sm:$0xff]   ;;  %v4722_v6 = vld [vmem:[#allocation7 + $0x18] sm:$0xff]   ;;  %v4723_v7 = vld [vmem:[#allocation7 + $0x20] sm:$0xff]  }
  0x6f   :  { %3544 = vmatpush3.msra.mxu0 %v110_v1  ;;  %3549 = vmatpush3.bf16.msra.mxu1 %v4719_v3  ;;  %v4724_v8 = vld [vmem:[#allocation7 + $0x28] sm:$0xff]   ;;  %v4725_v9 = vld [vmem:[#allocation7 + $0x30] sm:$0xff]   ;;  %v4726_v10 = vld [vmem:[#allocation7 + $0x38] sm:$0xff]  }
  0x70   :  { %3546 = vmatmul.mubr.msk.f32.vlgmr.msra.gmra.mrb[0].mxu0 %vm115_vm1, %v109_v2  ;;  %3568 = vmatprep.subr.bf16.mxu0 %v5015_v0  ;;  %v4727_v11 = vld [vmem:[#allocation8] sm:$0xff]   ;;  %v4728_v12 = vld [vmem:[#allocation8 + $0x8] sm:$0xff]   ;;  %v4729_v13 = vld [vmem:[#allocation8 + $0x10] sm:$0xff]  }
  0x71   :  { %3584 = vmatprep.mubr.msk.bf16.mxu0 %vm5016_vm0, %v5015_v0  ;;  %3550 = vmatprep.subr.bf16.mxu1 %v5015_v0  ;;  %v4730_v14 = vld [vmem:[#allocation8 + $0x18] sm:$0xff]   ;;  %v4731_v15 = vld [vmem:[#allocation8 + $0x20] sm:$0xff]   ;;  %v4732_v16 = vld [vmem:[#allocation8 + $0x28] sm:$0xff]  }
  0x72   :  { %3569 = vmatpush3.bf16.msra.mxu0 %v4727_v11  ;;  %v2981_v17 = vld [vmem:[%s6466_s6] ss:$0 sm:$0xff]  ;;  %v4734_v24 = vld [vmem:[#allocation8 + $0x38] sm:$0xff]   ;;  %v5172_v25 = vld [vmem:[#allocation10] sm:$0xff]  }
  0x73   :  { %3551 = vmatpush3.bf16.msra.mxu1 %v4720_v4  ;;  %3570 = vmatprep.subr.bf16.mxu0 %v5015_v0  ;;  %v4733_v23 = vld [vmem:[#allocation8 + $0x30] sm:$0xff]   ;;  %v5175_v26 = vld [vmem:[#allocation10 + $0x8] sm:$0xff]   ;;  %v5183_v28 = vld [vmem:[#allocation10 + $0x18] sm:$0xff]  }
  0x74   :  { %3552 = vmatprep.subr.bf16.mxu1 %v5015_v0  ;;  %v5179_v27 = vld [vmem:[#allocation10 + $0x10] sm:$0xff]   ;;  %v5187_v29 = vld [vmem:[#allocation10 + $0x20] sm:$0xff]   ;;  %v5191_v30 = vld [vmem:[#allocation10 + $0x28] sm:$0xff]  }
  0x75   :  { %v5195_v31 = vld [vmem:[#allocation10 + $0x30] sm:$0xff]   ;;  %v5205_v40 = vld [vmem:[#allocation10 + $0x38] sm:$0xff]   ;;  %v5209_v41 = vld [vmem:[#allocation11] sm:$0xff]  }
  0x76   :  { %3571 = vmatpush3.bf16.msra.mxu0 %v4728_v12  ;;  %v2983_v32 = vld [vmem:[%s6466_s6 + $0x1] ss:$0 sm:$0xff]  ;;  %v5212_v42 = vld [vmem:[#allocation11 + $0x8] sm:$0xff]   ;;  %v5220_v44 = vld [vmem:[#allocation11 + $0x18] sm:$0xff]  }
  0x77   :  { %3553 = vmatpush3.bf16.msra.mxu1 %v4721_v5  ;;  %3572 = vmatprep.subr.bf16.mxu0 %v5015_v0  ;;  %v5216_v43 = vld [vmem:[#allocation11 + $0x10] sm:$0xff]   ;;  %v5250_v52 = vld [vmem:[#allocation11 + $0x20] sm:$0xff]   ;;  %v5254_v53 = vld [vmem:[#allocation11 + $0x28] sm:$0xff]  }
  0x78   :  { %3554 = vmatprep.subr.bf16.mxu1 %v5015_v0  ;;  %v2992_v45 = vld [vmem:[%s6466_s6 + $0x2] ss:$0 sm:$0xff]  ;;  %v5262_v55 = vld [vmem:[#allocation11 + $0x38] sm:$0xff]   ;;  %v5269_v56 = vld [vmem:[%s6466_s6 + $0x3] ss:$0 sm:$0xff] }
  0x79   :  { %v5258_v54 = vld [vmem:[#allocation11 + $0x30] sm:$0xff]  }
  0x7a   :  { %3573 = vmatpush3.bf16.msra.mxu0 %v4729_v13  ;;  %v5293_v1 = vld [vmem:[%s6466_s6 + $0x4] ss:$0 sm:$0xff] }
  0x7b   :  { %3555 = vmatpush3.bf16.msra.mxu1 %v4722_v6  ;;  %3574 = vmatprep.subr.bf16.mxu0 %v5015_v0 }
  0x7c   :  { %3556 = vmatprep.subr.bf16.mxu1 %v5015_v0 }
  0x7e   :  { %3575 = vmatpush3.bf16.msra.mxu0 %v4730_v14 }
  0x7f   :  { %3557 = vmatpush3.bf16.msra.mxu1 %v4723_v7  ;;  %3576 = vmatprep.subr.bf16.mxu0 %v5015_v0 }
  0x80   :  { %3558 = vmatprep.subr.bf16.mxu1 %v5015_v0 }
  0x82   :  { %3577 = vmatpush3.bf16.msra.mxu0 %v4731_v15 }
  0x83   :  { %3559 = vmatpush3.bf16.msra.mxu1 %v4724_v8  ;;  %3578 = vmatprep.subr.bf16.mxu0 %v5015_v0 }
  0x84   :  { %3560 = vmatprep.subr.bf16.mxu1 %v5015_v0 }
  0x86   :  { %3579 = vmatpush3.bf16.msra.mxu0 %v4732_v16 }
  0x87   :  { %3561 = vmatpush3.bf16.msra.mxu1 %v4725_v9  ;;  %3580 = vmatprep.subr.bf16.mxu0 %v5015_v0 }
  0x88   :  { %3562 = vmatprep.subr.bf16.mxu1 %v5015_v0 }
  0x8a   :  { %3581 = vmatpush3.bf16.msra.mxu0 %v4733_v23 }
  0x8b   :  { %3563 = vmatpush3.bf16.msra.mxu1 %v4726_v10  ;;  %3582 = vmatprep.subr.bf16.mxu0 %v5015_v0 }
  0x8c   :  { %3588 = vmatprep.subr.bf16.mxu1 %v5015_v0 }
  0x8e   :  { %3583 = vmatpush3.bf16.msra.mxu0 %v4734_v24 }
  0x8f   :  { %3608 = vmatprep.subr.bf16.mxu0 %v5015_v0 }
 0x143   :  { %v185_v18 = vpop.f32.mrb[0].mxu0 }
 0x144   :  { %v186_v19 = vadd.f32 %v2981_v17, %v185_v18  ;;  %v3547_v20 = vpop.f32.mrb[1].mxu0 }
 0x146   :  { %v189_v21 = vmax.f32 %v186_v19, 0.0 }
 0x148   :  { %v190_v22 = vpack.c.bf16 %v189_v21, %v189_v21 }
 0x14a   :  { %3565 = vmatmul.mubr.bf16.vlgmr.msra.gmra.mrb[0].mxu1 %v190_v22 }
 0x14b   :  { %3604 = vmatprep.mubr.msk.bf16.mxu1 %vm5016_vm0, %v5015_v0  ;;  %3589 = vmatpush3.bf16.msra.mxu1 %v5172_v25 }
 0x14c   :  { %3590 = vmatprep.subr.bf16.mxu1 %v5015_v0 }
 0x14f   :  { %3591 = vmatpush3.bf16.msra.mxu1 %v5175_v26 }
 0x150   :  { %3592 = vmatprep.subr.bf16.mxu1 %v5015_v0 }
 0x153   :  { %3593 = vmatpush3.bf16.msra.mxu1 %v5179_v27 }
 0x154   :  { %3594 = vmatprep.subr.bf16.mxu1 %v5015_v0 }
 0x157   :  { %3595 = vmatpush3.bf16.msra.mxu1 %v5183_v28 }
 0x158   :  { %3596 = vmatprep.subr.bf16.mxu1 %v5015_v0 }
 0x15b   :  { %3597 = vmatpush3.bf16.msra.mxu1 %v5187_v29 }
 0x15c   :  { %3598 = vmatprep.subr.bf16.mxu1 %v5015_v0 }
 0x15f   :  { %3599 = vmatpush3.bf16.msra.mxu1 %v5191_v30 }
 0x160   :  { %3600 = vmatprep.subr.bf16.mxu1 %v5015_v0 }
 0x163   :  { %3601 = vmatpush3.bf16.msra.mxu1 %v5195_v31 }
 0x164   :  { %3602 = vmatprep.subr.bf16.mxu1 %v5015_v0 }
 0x167   :  { %3603 = vmatpush3.bf16.msra.mxu1 %v5205_v40 }
 0x168   :  { %3628 = vmatprep.subr.bf16.mxu1 %v5015_v0 }
 0x21d   :  { %v293_v33 = vpop.f32.mrb[0].mxu1 }
 0x21e   :  { %v294_v34 = vadd.f32 %v2983_v32, %v293_v33  ;;  %v3566_v35 = vpop.f32.mrb[1].mxu1 }
 0x21f   :  { %v296_v36 = vpop.f32.mrb[2].mxu1 }
 0x220   :  { %v299_v37 = vmax.f32 %v294_v34, 0.0  ;;  %v3567_v38 = vpop.f32.mrb[3].mxu1 }
 0x222   :  { %v300_v39 = vpack.c.bf16 %v299_v37, %v299_v37 }
 0x224   :  { %3585 = vmatmul.mubr.bf16.vlgmr.msra.gmra.mrb[4].mxu0 %v300_v39 }
 0x225   :  { %3624 = vmatprep.mubr.msk.bf16.mxu0 %vm5016_vm0, %v5015_v0  ;;  %3609 = vmatpush3.bf16.msra.mxu0 %v5209_v41 }
 0x226   :  { %3610 = vmatprep.subr.bf16.mxu0 %v5015_v0 }
 0x229   :  { %3611 = vmatpush3.bf16.msra.mxu0 %v5212_v42 }
 0x22a   :  { %3612 = vmatprep.subr.bf16.mxu0 %v5015_v0 }
 0x22d   :  { %3613 = vmatpush3.bf16.msra.mxu0 %v5216_v43 }
 0x22e   :  { %3614 = vmatprep.subr.bf16.mxu0 %v5015_v0 }
 0x231   :  { %3615 = vmatpush3.bf16.msra.mxu0 %v5220_v44 }
 0x232   :  { %3616 = vmatprep.subr.bf16.mxu0 %v5015_v0 }
 0x235   :  { %3617 = vmatpush3.bf16.msra.mxu0 %v5250_v52 }
 0x236   :  { %3618 = vmatprep.subr.bf16.mxu0 %v5015_v0 }
 0x239   :  { %3619 = vmatpush3.bf16.msra.mxu0 %v5254_v53 }
 0x23a   :  { %3620 = vmatprep.subr.bf16.mxu0 %v5015_v0 }
 0x23d   :  { %3621 = vmatpush3.bf16.msra.mxu0 %v5258_v54 }
 0x23e   :  { %3622 = vmatprep.subr.bf16.mxu0 %v5015_v0 }
 0x241   :  { %3623 = vmatpush3.bf16.msra.mxu0 %v5262_v55 }
 0x242   :  { %3648 = vmatprep.subr.bf16.mxu0 %v5015_v0 }
 0x2f7   :  { %v403_v46 = vpop.f32.mrb[4].mxu0 }
 0x2f8   :  { %v5228_v47 = vadd.f32 %v2992_v45, %v403_v46  ;;  %v3586_v48 = vpop.f32.mrb[5].mxu0 }
 0x2f9   :  { %v406_v49 = vpop.f32.mrb[6].mxu0 }
 0x2fa   :  { %v3587_v50 = vpop.f32.mrb[7].mxu0  ;;  %v451_v51 = vpack.c.bf16 %v5228_v47, %v5228_v47 }
 0x2fc   :  { %3605 = vmatmul.mubr.bf16.vlgmr.msra.gmra.mrb[4].mxu1 %v451_v51 }
 0x2fd   :  { %3629 = vmatpush3.bf16.msra.mxu1 %v5172_v25  ;;  %3644 = vmatprep.mubr.msk.bf16.mxu1 %vm5016_vm0, %v5015_v0 }
 0x2fe   :  { %3630 = vmatprep.subr.bf16.mxu1 %v5015_v0 }
 0x301   :  { %3631 = vmatpush3.bf16.msra.mxu1 %v5175_v26 }
 0x302   :  { %3632 = vmatprep.subr.bf16.mxu1 %v5015_v0 }
 0x305   :  { %3633 = vmatpush3.bf16.msra.mxu1 %v5179_v27 }
 0x306   :  { %3634 = vmatprep.subr.bf16.mxu1 %v5015_v0 }
 0x309   :  { %3635 = vmatpush3.bf16.msra.mxu1 %v5183_v28 }
 0x30a   :  { %3636 = vmatprep.subr.bf16.mxu1 %v5015_v0 }
 0x30d   :  { %3637 = vmatpush3.bf16.msra.mxu1 %v5187_v29 }
 0x30e   :  { %3638 = vmatprep.subr.bf16.mxu1 %v5015_v0 }
 0x311   :  { %3639 = vmatpush3.bf16.msra.mxu1 %v5191_v30 }
 0x312   :  { %3640 = vmatprep.subr.bf16.mxu1 %v5015_v0 }
 0x315   :  { %3641 = vmatpush3.bf16.msra.mxu1 %v5195_v31 }
 0x316   :  { %3642 = vmatprep.subr.bf16.mxu1 %v5015_v0 }
 0x319   :  { %3643 = vmatpush3.bf16.msra.mxu1 %v5205_v40 }
 0x31a   :  { %3668 = vmatprep.subr.bf16.mxu1 %v5015_v0 }
 0x3cf   :  { %v534_v57 = vpop.f32.mrb[4].mxu1 }
 0x3d0   :  { %v535_v58 = vadd.f32 %v5269_v56, %v534_v57  ;;  %v3606_v59 = vpop.f32.mrb[5].mxu1 }
 0x3d1   :  { %v537_v60 = vpop.f32.mrb[6].mxu1 }
 0x3d2   :  { %4751 = vtanh.f32 %v535_v58  ;;  %v3607_v61 = vpop.f32.mrb[7].mxu1 }
 0x3dc   :  { %v4752_v62 = vpop.eup %4751 }
 0x3dd   :  { %v541_v63 = vpack.c.bf16 %v4752_v62, %v4752_v62 }
 0x3df   :  { %3625 = vmatmul.mubr.bf16.vlgmr.msra.gmra.mrb[8].mxu0 %v541_v63 }
 0x3e0   :  { %3649 = vmatpush3.bf16.msra.mxu0 %v5209_v41  ;;  %3664 = vmatprep.mubr.msk.bf16.mxu0 %vm5016_vm0, %v5015_v0 }
 0x3e1   :  { %3650 = vmatprep.subr.bf16.mxu0 %v5015_v0 }
 0x3e4   :  { %3651 = vmatpush3.bf16.msra.mxu0 %v5212_v42 }
 0x3e5   :  { %3652 = vmatprep.subr.bf16.mxu0 %v5015_v0 }
 0x3e8   :  { %3653 = vmatpush3.bf16.msra.mxu0 %v5216_v43 }
 0x3e9   :  { %3654 = vmatprep.subr.bf16.mxu0 %v5015_v0 }
 0x3ec   :  { %3655 = vmatpush3.bf16.msra.mxu0 %v5220_v44 }
 0x3ed   :  { %3656 = vmatprep.subr.bf16.mxu0 %v5015_v0 }
 0x3f0   :  { %3657 = vmatpush3.bf16.msra.mxu0 %v5250_v52 }
 0x3f1   :  { %3658 = vmatprep.subr.bf16.mxu0 %v5015_v0 }
 0x3f4   :  { %3659 = vmatpush3.bf16.msra.mxu0 %v5254_v53 }
 0x3f5   :  { %3660 = vmatprep.subr.bf16.mxu0 %v5015_v0 }
 0x3f8   :  { %3661 = vmatpush3.bf16.msra.mxu0 %v5258_v54 }
 0x3f9   :  { %3662 = vmatprep.subr.bf16.mxu0 %v5015_v0 }
 0x3fc   :  { %3663 = vmatpush3.bf16.msra.mxu0 %v5262_v55 }
 0x3fd   :  { %3688 = vmatprep.subr.bf16.mxu0 %v5015_v0 }
 0x4b2   :  { %v624_v2 = vpop.f32.mrb[8].mxu0 }
 0x4b3   :  { %v5296_v3 = vadd.f32 %v5293_v1, %v624_v2  ;;  %v3626_v4 = vpop.f32.mrb[9].mxu0 }
 0x4b4   :  { %v627_v5 = vpop.f32.mrb[10].mxu0 }
 0x4b5   :  { %v630_v6 = vmul.f32 0.071428575, %v5296_v3  ;;  %v3627_v7 = vpop.f32.mrb[11].mxu0 }
 0x4b7   :  { %v631_v8 = vadd.f32 %v630_v6, %v5228_v47 }
 0x4b9   :  { %v632_v9 = vpack.c.bf16 %v631_v8, %v631_v8 }
 0x4bb   :  { %3645 = vmatmul.mubr.bf16.vlgmr.msra.gmra.mrb[8].mxu1 %v632_v9 }
 0x4bc   :  { %3669 = vmatpush3.bf16.msra.mxu1 %v5172_v25  ;;  %3684 = vmatprep.mubr.msk.bf16.mxu1 %vm5016_vm0, %v5015_v0 }
 0x4bd   :  { %3670 = vmatprep.subr.bf16.mxu1 %v5015_v0 }
 0x4c0   :  { %3671 = vmatpush3.bf16.msra.mxu1 %v5175_v26 }
 0x4c1   :  { %3672 = vmatprep.subr.bf16.mxu1 %v5015_v0 }
 0x4c4   :  { %3673 = vmatpush3.bf16.msra.mxu1 %v5179_v27 }
 0x4c5   :  { %3674 = vmatprep.subr.bf16.mxu1 %v5015_v0 }
 0x4c8   :  { %3675 = vmatpush3.bf16.msra.mxu1 %v5183_v28 }
 0x4c9   :  { %3676 = vmatprep.subr.bf16.mxu1 %v5015_v0 }
 0x4cc   :  { %3677 = vmatpush3.bf16.msra.mxu1 %v5187_v29 }
 0x4cd   :  { %3678 = vmatprep.subr.bf16.mxu1 %v5015_v0 }
 0x4d0   :  { %3679 = vmatpush3.bf16.msra.mxu1 %v5191_v30 }
 0x4d1   :  { %3680 = vmatprep.subr.bf16.mxu1 %v5015_v0 }
 0x4d4   :  { %3681 = vmatpush3.bf16.msra.mxu1 %v5195_v31 }
 0x4d5   :  { %3682 = vmatprep.subr.bf16.mxu1 %v5015_v0 }
 0x4d8   :  { %3683 = vmatpush3.bf16.msra.mxu1 %v5205_v40 }
 0x4d9   :  { %3708 = vmatprep.subr.bf16.mxu1 %v5015_v0 }
 0x58e   :  { %v667_v10 = vpop.f32.mrb[8].mxu1 }
 0x58f   :  { %v668_v11 = vadd.f32 %v5269_v56, %v667_v10  ;;  %v3646_v12 = vpop.f32.mrb[9].mxu1 }
 0x590   :  { %v670_v13 = vpop.f32.mrb[10].mxu1 }
 0x591   :  { %4753 = vtanh.f32 %v668_v11  ;;  %v3647_v14 = vpop.f32.mrb[11].mxu1 }
 0x59b   :  { %v4754_v15 = vpop.eup %4753 }
 0x59c   :  { %v674_v16 = vpack.c.bf16 %v4754_v15, %v4754_v15 }
 0x59e   :  { %3665 = vmatmul.mubr.bf16.vlgmr.msra.gmra.mrb[12].mxu0 %v674_v16 }
 0x59f   :  { %3689 = vmatpush3.bf16.msra.mxu0 %v5209_v41  ;;  %3704 = vmatprep.mubr.msk.bf16.mxu0 %vm5016_vm0, %v5015_v0 }
 0x5a0   :  { %3690 = vmatprep.subr.bf16.mxu0 %v5015_v0 }
 0x5a3   :  { %3691 = vmatpush3.bf16.msra.mxu0 %v5212_v42 }
 0x5a4   :  { %3692 = vmatprep.subr.bf16.mxu0 %v5015_v0 }
 0x5a7   :  { %3693 = vmatpush3.bf16.msra.mxu0 %v5216_v43 }
 0x5a8   :  { %3694 = vmatprep.subr.bf16.mxu0 %v5015_v0 }
 0x5ab   :  { %3695 = vmatpush3.bf16.msra.mxu0 %v5220_v44 }
 0x5ac   :  { %3696 = vmatprep.subr.bf16.mxu0 %v5015_v0 }
 0x5af   :  { %3697 = vmatpush3.bf16.msra.mxu0 %v5250_v52 }
 0x5b0   :  { %3698 = vmatprep.subr.bf16.mxu0 %v5015_v0 }
 0x5b3   :  { %3699 = vmatpush3.bf16.msra.mxu0 %v5254_v53 }
 0x5b4   :  { %3700 = vmatprep.subr.bf16.mxu0 %v5015_v0 }
 0x5b7   :  { %3701 = vmatpush3.bf16.msra.mxu0 %v5258_v54 }
 0x5b8   :  { %3702 = vmatprep.subr.bf16.mxu0 %v5015_v0 }
 0x5bb   :  { %3703 = vmatpush3.bf16.msra.mxu0 %v5262_v55 }
 0x5bc   :  { %3728 = vmatprep.subr.bf16.mxu0 %v5015_v0 }
 0x671   :  { %v709_v17 = vpop.f32.mrb[12].mxu0 }
 0x672   :  { %v710_v18 = vadd.f32 %v5293_v1, %v709_v17  ;;  %v3666_v19 = vpop.f32.mrb[13].mxu0 }
 0x673   :  { %v712_v20 = vpop.f32.mrb[14].mxu0 }
 0x674   :  { %v715_v21 = vmul.f32 0.071428575, %v710_v18  ;;  %v3667_v22 = vpop.f32.mrb[15].mxu0  ;;  %v885_v39 = vmul.f32 2.0, %v710_v18 }
 0x676   :  { %v716_v23 = vadd.f32 %v715_v21, %v5228_v47  ;;  %v886_v50 = vadd.f32 %v885_v39, %v5296_v3 }
 0x678   :  { %v717_v24 = vpack.c.bf16 %v716_v23, %v716_v23 }
 0x67a   :  { %3685 = vmatmul.mubr.bf16.vlgmr.msra.gmra.mrb[12].mxu1 %v717_v24 }
 0x67b   :  { %3709 = vmatpush3.bf16.msra.mxu1 %v5172_v25  ;;  %3724 = vmatprep.mubr.msk.bf16.mxu1 %vm5016_vm0, %v5015_v0 }
 0x67c   :  { %3710 = vmatprep.subr.bf16.mxu1 %v5015_v0 }
 0x67f   :  { %3711 = vmatpush3.bf16.msra.mxu1 %v5175_v26 }
 0x680   :  { %3712 = vmatprep.subr.bf16.mxu1 %v5015_v0 }
 0x683   :  { %3713 = vmatpush3.bf16.msra.mxu1 %v5179_v27 }
 0x684   :  { %3714 = vmatprep.subr.bf16.mxu1 %v5015_v0 }
 0x687   :  { %3715 = vmatpush3.bf16.msra.mxu1 %v5183_v28 }
 0x688   :  { %3716 = vmatprep.subr.bf16.mxu1 %v5015_v0 }
 0x68b   :  { %3717 = vmatpush3.bf16.msra.mxu1 %v5187_v29 }
 0x68c   :  { %3718 = vmatprep.subr.bf16.mxu1 %v5015_v0 }
 0x68f   :  { %3719 = vmatpush3.bf16.msra.mxu1 %v5191_v30 }
 0x690   :  { %3720 = vmatprep.subr.bf16.mxu1 %v5015_v0 }
 0x693   :  { %3721 = vmatpush3.bf16.msra.mxu1 %v5195_v31 }
 0x694   :  { %3722 = vmatprep.subr.bf16.mxu1 %v5015_v0 }
 0x697   :  { %3723 = vmatpush3.bf16.msra.mxu1 %v5205_v40 }
 0x698   :  { %3748 = vmatprep.subr.bf16.mxu1 %v5015_v0 }
 0x74d   :  { %v752_v32 = vpop.f32.mrb[12].mxu1 }
 0x74e   :  { %v753_v33 = vadd.f32 %v5269_v56, %v752_v32  ;;  %v3686_v34 = vpop.f32.mrb[13].mxu1 }
 0x74f   :  { %v755_v35 = vpop.f32.mrb[14].mxu1 }
 0x750   :  { %4755 = vtanh.f32 %v753_v33  ;;  %v3687_v36 = vpop.f32.mrb[15].mxu1 }
 0x75a   :  { %v4756_v37 = vpop.eup %4755 }
 0x75b   :  { %v759_v38 = vpack.c.bf16 %v4756_v37, %v4756_v37 }
 0x75d   :  { %3705 = vmatmul.mubr.bf16.vlgmr.msra.gmra.mrb[16].mxu0 %v759_v38 }
 0x75e   :  { %3729 = vmatpush3.bf16.msra.mxu0 %v5209_v41  ;;  %3744 = vmatprep.mubr.msk.bf16.mxu0 %vm5016_vm0, %v5015_v0 }
 0x75f   :  { %3730 = vmatprep.subr.bf16.mxu0 %v5015_v0 }
 0x762   :  { %3731 = vmatpush3.bf16.msra.mxu0 %v5212_v42 }
 0x763   :  { %3732 = vmatprep.subr.bf16.mxu0 %v5015_v0 }
 0x766   :  { %3733 = vmatpush3.bf16.msra.mxu0 %v5216_v43 }
 0x767   :  { %3734 = vmatprep.subr.bf16.mxu0 %v5015_v0 }
 0x76a   :  { %3735 = vmatpush3.bf16.msra.mxu0 %v5220_v44 }
 0x76b   :  { %3736 = vmatprep.subr.bf16.mxu0 %v5015_v0 }
 0x76e   :  { %3737 = vmatpush3.bf16.msra.mxu0 %v5250_v52 }
 0x76f   :  { %3738 = vmatprep.subr.bf16.mxu0 %v5015_v0 }
 0x772   :  { %3739 = vmatpush3.bf16.msra.mxu0 %v5254_v53 }
 0x773   :  { %3740 = vmatprep.subr.bf16.mxu0 %v5015_v0 }
 0x776   :  { %3741 = vmatpush3.bf16.msra.mxu0 %v5258_v54 }
 0x777   :  { %3742 = vmatprep.subr.bf16.mxu0 %v5015_v0 }
 0x77a   :  { %3743 = vmatpush3.bf16.msra.mxu0 %v5262_v55 }
 0x77b   :  { %3768 = vmatprep.subr.bf16.mxu0 %v5015_v0 }
 0x830   :  { %v794_v45 = vpop.f32.mrb[16].mxu0 }
 0x831   :  { %v795_v46 = vadd.f32 %v5293_v1, %v794_v45  ;;  %v3706_v48 = vpop.f32.mrb[17].mxu0 }
 0x832   :  { %v797_v49 = vpop.f32.mrb[18].mxu0 }
 0x833   :  { %v800_v51 = vmul.f32 0.14285715, %v795_v46  ;;  %v887_v57 = vmul.f32 2.0, %v795_v46  ;;  %v3707_v58 = vpop.f32.mrb[19].mxu0 }
 0x835   :  { %v801_v59 = vadd.f32 %v800_v51, %v5228_v47  ;;  %v888_v60 = vadd.f32 %v887_v57, %v886_v50 }
 0x837   :  { %v802_v61 = vpack.c.bf16 %v801_v59, %v801_v59 }
 0x839   :  { %3725 = vmatmul.mubr.bf16.vlgmr.msra.gmra.mrb[16].mxu1 %v802_v61 }
 0x83a   :  { %3749 = vmatpush3.bf16.msra.mxu1 %v5172_v25  ;;  %3764 = vmatprep.mubr.msk.bf16.mxu1 %vm5016_vm0, %v5015_v0 }
 0x83b   :  { %3750 = vmatprep.subr.bf16.mxu1 %v5015_v0 }
 0x83e   :  { %3751 = vmatpush3.bf16.msra.mxu1 %v5175_v26 }
 0x83f   :  { %3752 = vmatprep.subr.bf16.mxu1 %v5015_v0 }
 0x842   :  { %3753 = vmatpush3.bf16.msra.mxu1 %v5179_v27 }
 0x843   :  { %3754 = vmatprep.subr.bf16.mxu1 %v5015_v0 }
 0x846   :  { %3755 = vmatpush3.bf16.msra.mxu1 %v5183_v28 }
 0x847   :  { %3756 = vmatprep.subr.bf16.mxu1 %v5015_v0 }
 0x84a   :  { %3757 = vmatpush3.bf16.msra.mxu1 %v5187_v29 }
 0x84b   :  { %3758 = vmatprep.subr.bf16.mxu1 %v5015_v0 }
 0x84e   :  { %3759 = vmatpush3.bf16.msra.mxu1 %v5191_v30 }
 0x84f   :  { %3760 = vmatprep.subr.bf16.mxu1 %v5015_v0 }
 0x852   :  { %3761 = vmatpush3.bf16.msra.mxu1 %v5195_v31 }
 0x853   :  { %3762 = vmatprep.subr.bf16.mxu1 %v5015_v0 }
 0x856   :  { %3763 = vmatpush3.bf16.msra.mxu1 %v5205_v40 }
 0x857   :  { %3788 = vmatprep.subr.bf16.mxu1 %v5015_v0 }
 0x90c   :  { %v837_v62 = vpop.f32.mrb[16].mxu1 }
 0x90d   :  { %v838_v63 = vadd.f32 %v5269_v56, %v837_v62  ;;  %v3726_v2 = vpop.f32.mrb[17].mxu1 }
 0x90e   :  { %v840_v3 = vpop.f32.mrb[18].mxu1 }
 0x90f   :  { %4757 = vtanh.f32 %v838_v63  ;;  %v3727_v4 = vpop.f32.mrb[19].mxu1 }
 0x919   :  { %v4758_v5 = vpop.eup %4757 }
 0x91a   :  { %v844_v6 = vpack.c.bf16 %v4758_v5, %v4758_v5 }
 0x91c   :  { %3745 = vmatmul.mubr.bf16.vlgmr.msra.gmra.mrb[20].mxu0 %v844_v6 }
 0x91d   :  { %3769 = vmatpush3.bf16.msra.mxu0 %v5209_v41  ;;  %3784 = vmatprep.mubr.msk.bf16.mxu0 %vm5016_vm0, %v5015_v0 }
 0x91e   :  { %3770 = vmatprep.subr.bf16.mxu0 %v5015_v0 }
 0x921   :  { %3771 = vmatpush3.bf16.msra.mxu0 %v5212_v42 }
 0x922   :  { %3772 = vmatprep.subr.bf16.mxu0 %v5015_v0 }
 0x925   :  { %3773 = vmatpush3.bf16.msra.mxu0 %v5216_v43 }
 0x926   :  { %3774 = vmatprep.subr.bf16.mxu0 %v5015_v0 }
 0x929   :  { %3775 = vmatpush3.bf16.msra.mxu0 %v5220_v44 }
 0x92a   :  { %3776 = vmatprep.subr.bf16.mxu0 %v5015_v0 }
 0x92d   :  { %3777 = vmatpush3.bf16.msra.mxu0 %v5250_v52 }
 0x92e   :  { %3778 = vmatprep.subr.bf16.mxu0 %v5015_v0 }
 0x931   :  { %3779 = vmatpush3.bf16.msra.mxu0 %v5254_v53 }
 0x932   :  { %3780 = vmatprep.subr.bf16.mxu0 %v5015_v0 }
 0x935   :  { %3781 = vmatpush3.bf16.msra.mxu0 %v5258_v54 }
 0x936   :  { %3782 = vmatprep.subr.bf16.mxu0 %v5015_v0 }
 0x939   :  { %3783 = vmatpush3.bf16.msra.mxu0 %v5262_v55 }
 0x93a   :  { %3808 = vmatprep.subr.bf16.mxu0 %v5015_v0 }
 0x9ef   :  { %v879_v7 = vpop.f32.mrb[20].mxu0 }
 0x9f0   :  { %v880_v8 = vadd.f32 %v5293_v1, %v879_v7  ;;  %v3746_v9 = vpop.f32.mrb[21].mxu0 }
 0x9f1   :  { %v882_v10 = vpop.f32.mrb[22].mxu0 }
 0x9f2   :  { %v889_v11 = vadd.f32 %v888_v60, %v880_v8  ;;  %v3747_v12 = vpop.f32.mrb[23].mxu0 }
 0x9f4   :  { %v890_v13 = vmul.f32 0.023809524, %v889_v11 }
 0x9f6   :  { %v5418_v14 = vadd.f32 %v890_v13, %v5228_v47 }
 0x9f8   :  { %v892_v15 = vpack.c.bf16 %v5418_v14, %v5418_v14 }
 0x9fa   :  { %3765 = vmatmul.mubr.bf16.vlgmr.msra.gmra.mrb[20].mxu1 %v892_v15 }
 0x9fb   :  { %3789 = vmatpush3.bf16.msra.mxu1 %v5172_v25  ;;  %3804 = vmatprep.mubr.msk.bf16.mxu1 %vm5016_vm0, %v5015_v0 }
 0x9fc   :  { %3790 = vmatprep.subr.bf16.mxu1 %v5015_v0 }
 0x9ff   :  { %3791 = vmatpush3.bf16.msra.mxu1 %v5175_v26 }
 0xa00   :  { %3792 = vmatprep.subr.bf16.mxu1 %v5015_v0 }
 0xa03   :  { %3793 = vmatpush3.bf16.msra.mxu1 %v5179_v27 }
 0xa04   :  { %3794 = vmatprep.subr.bf16.mxu1 %v5015_v0 }
 0xa07   :  { %3795 = vmatpush3.bf16.msra.mxu1 %v5183_v28 }
 0xa08   :  { %3796 = vmatprep.subr.bf16.mxu1 %v5015_v0 }
 0xa0b   :  { %3797 = vmatpush3.bf16.msra.mxu1 %v5187_v29 }
 0xa0c   :  { %3798 = vmatprep.subr.bf16.mxu1 %v5015_v0 }
 0xa0f   :  { %3799 = vmatpush3.bf16.msra.mxu1 %v5191_v30 }
 0xa10   :  { %3800 = vmatprep.subr.bf16.mxu1 %v5015_v0 }
 0xa13   :  { %3801 = vmatpush3.bf16.msra.mxu1 %v5195_v31 }
 0xa14   :  { %3802 = vmatprep.subr.bf16.mxu1 %v5015_v0 }
 0xa17   :  { %3803 = vmatpush3.bf16.msra.mxu1 %v5205_v40 }
 0xa18   :  { %3828 = vmatprep.subr.bf16.mxu1 %v5015_v0 }
 0xacd   :  { %v927_v47 = vpop.f32.mrb[20].mxu1 }
 0xace   :  { %v928_v16 = vadd.f32 %v5269_v56, %v927_v47  ;;  %v3766_v17 = vpop.f32.mrb[21].mxu1 }
 0xacf   :  { %v930_v18 = vpop.f32.mrb[22].mxu1 }
 0xad0   :  { %4759 = vtanh.f32 %v928_v16  ;;  %v3767_v19 = vpop.f32.mrb[23].mxu1 }
 0xada   :  { %v4760_v20 = vpop.eup %4759 }
 0xadb   :  { %v934_v21 = vpack.c.bf16 %v4760_v20, %v4760_v20 }
 0xadd   :  { %3785 = vmatmul.mubr.bf16.vlgmr.msra.gmra.mrb[24].mxu0 %v934_v21 }
 0xade   :  { %3809 = vmatpush3.bf16.msra.mxu0 %v5209_v41  ;;  %3824 = vmatprep.mubr.msk.bf16.mxu0 %vm5016_vm0, %v5015_v0 }
 0xadf   :  { %3810 = vmatprep.subr.bf16.mxu0 %v5015_v0 }
 0xae2   :  { %3811 = vmatpush3.bf16.msra.mxu0 %v5212_v42 }
 0xae3   :  { %3812 = vmatprep.subr.bf16.mxu0 %v5015_v0 }
 0xae6   :  { %3813 = vmatpush3.bf16.msra.mxu0 %v5216_v43 }
 0xae7   :  { %3814 = vmatprep.subr.bf16.mxu0 %v5015_v0 }
 0xaea   :  { %3815 = vmatpush3.bf16.msra.mxu0 %v5220_v44 }
 0xaeb   :  { %3816 = vmatprep.subr.bf16.mxu0 %v5015_v0 }
 0xaee   :  { %3817 = vmatpush3.bf16.msra.mxu0 %v5250_v52 }
 0xaef   :  { %3818 = vmatprep.subr.bf16.mxu0 %v5015_v0 }
 0xaf2   :  { %3819 = vmatpush3.bf16.msra.mxu0 %v5254_v53 }
 0xaf3   :  { %3820 = vmatprep.subr.bf16.mxu0 %v5015_v0 }
 0xaf6   :  { %3821 = vmatpush3.bf16.msra.mxu0 %v5258_v54 }
 0xaf7   :  { %3822 = vmatprep.subr.bf16.mxu0 %v5015_v0 }
 0xafa   :  { %3823 = vmatpush3.bf16.msra.mxu0 %v5262_v55 }
 0xafb   :  { %3848 = vmatprep.subr.bf16.mxu0 %v5015_v0 }
 0xbb0   :  { %v969_v22 = vpop.f32.mrb[24].mxu0 }
 0xbb1   :  { %v5460_v23 = vadd.f32 %v5293_v1, %v969_v22  ;;  %v3786_v24 = vpop.f32.mrb[25].mxu0 }
 0xbb2   :  { %v972_v32 = vpop.f32.mrb[26].mxu0 }
 0xbb3   :  { %v975_v33 = vmul.f32 0.071428575, %v5460_v23  ;;  %v3787_v34 = vpop.f32.mrb[27].mxu0 }
 0xbb5   :  { %v976_v35 = vadd.f32 %v975_v33, %v5418_v14 }
 0xbb7   :  { %v977_v36 = vpack.c.bf16 %v976_v35, %v976_v35 }
 0xbb9   :  { %3805 = vmatmul.mubr.bf16.vlgmr.msra.gmra.mrb[24].mxu1 %v977_v36 }
 0xbba   :  { %3829 = vmatpush3.bf16.msra.mxu1 %v5172_v25  ;;  %3844 = vmatprep.mubr.msk.bf16.mxu1 %vm5016_vm0, %v5015_v0 }
 0xbbb   :  { %3830 = vmatprep.subr.bf16.mxu1 %v5015_v0 }
 0xbbe   :  { %3831 = vmatpush3.bf16.msra.mxu1 %v5175_v26 }
 0xbbf   :  { %3832 = vmatprep.subr.bf16.mxu1 %v5015_v0 }
 0xbc2   :  { %3833 = vmatpush3.bf16.msra.mxu1 %v5179_v27 }
 0xbc3   :  { %3834 = vmatprep.subr.bf16.mxu1 %v5015_v0 }
 0xbc6   :  { %3835 = vmatpush3.bf16.msra.mxu1 %v5183_v28 }
 0xbc7   :  { %3836 = vmatprep.subr.bf16.mxu1 %v5015_v0 }
 0xbca   :  { %3837 = vmatpush3.bf16.msra.mxu1 %v5187_v29 }
 0xbcb   :  { %3838 = vmatprep.subr.bf16.mxu1 %v5015_v0 }
 0xbce   :  { %3839 = vmatpush3.bf16.msra.mxu1 %v5191_v30 }
 0xbcf   :  { %3840 = vmatprep.subr.bf16.mxu1 %v5015_v0 }
 0xbd2   :  { %3841 = vmatpush3.bf16.msra.mxu1 %v5195_v31 }
 0xbd3   :  { %3842 = vmatprep.subr.bf16.mxu1 %v5015_v0 }
 0xbd6   :  { %3843 = vmatpush3.bf16.msra.mxu1 %v5205_v40 }
 0xbd7   :  { %3868 = vmatprep.subr.bf16.mxu1 %v5015_v0 }
 0xc8c   :  { %v1012_v37 = vpop.f32.mrb[24].mxu1 }
 0xc8d   :  { %v1013_v38 = vadd.f32 %v5269_v56, %v1012_v37  ;;  %v3806_v39 = vpop.f32.mrb[25].mxu1 }
 0xc8e   :  { %v1015_v45 = vpop.f32.mrb[26].mxu1 }
 0xc8f   :  { %4761 = vtanh.f32 %v1013_v38  ;;  %v3807_v46 = vpop.f32.mrb[27].mxu1 }
 0xc99   :  { %v4762_v48 = vpop.eup %4761 }
 0xc9a   :  { %v1019_v49 = vpack.c.bf16 %v4762_v48, %v4762_v48 }
 0xc9c   :  { %3825 = vmatmul.mubr.bf16.vlgmr.msra.gmra.mrb[28].mxu0 %v1019_v49 }
 0xc9d   :  { %3849 = vmatpush3.bf16.msra.mxu0 %v5209_v41  ;;  %3864 = vmatprep.mubr.msk.bf16.mxu0 %vm5016_vm0, %v5015_v0 }
 0xc9e   :  { %3850 = vmatprep.subr.bf16.mxu0 %v5015_v0 }
 0xca1   :  { %3851 = vmatpush3.bf16.msra.mxu0 %v5212_v42 }
 0xca2   :  { %3852 = vmatprep.subr.bf16.mxu0 %v5015_v0 }
 0xca5   :  { %3853 = vmatpush3.bf16.msra.mxu0 %v5216_v43 }
 0xca6   :  { %3854 = vmatprep.subr.bf16.mxu0 %v5015_v0 }
 0xca9   :  { %3855 = vmatpush3.bf16.msra.mxu0 %v5220_v44 }
 0xcaa   :  { %3856 = vmatprep.subr.bf16.mxu0 %v5015_v0 }
 0xcad   :  { %3857 = vmatpush3.bf16.msra.mxu0 %v5250_v52 }
 0xcae   :  { %3858 = vmatprep.subr.bf16.mxu0 %v5015_v0 }
 0xcb1   :  { %3859 = vmatpush3.bf16.msra.mxu0 %v5254_v53 }
 0xcb2   :  { %3860 = vmatprep.subr.bf16.mxu0 %v5015_v0 }
 0xcb5   :  { %3861 = vmatpush3.bf16.msra.mxu0 %v5258_v54 }
 0xcb6   :  { %3862 = vmatprep.subr.bf16.mxu0 %v5015_v0 }
 0xcb9   :  { %3863 = vmatpush3.bf16.msra.mxu0 %v5262_v55 }
 0xcba   :  { %3888 = vmatprep.subr.bf16.mxu0 %v5015_v0 }
 0xd6f   :  { %v1054_v50 = vpop.f32.mrb[28].mxu0 }
 0xd70   :  { %v1055_v51 = vadd.f32 %v5293_v1, %v1054_v50  ;;  %v3826_v57 = vpop.f32.mrb[29].mxu0 }
 0xd71   :  { %v1057_v58 = vpop.f32.mrb[30].mxu0  ;;  %v5634_v57 = vld [vmem:[#allocation10 + $0x8] sm:$0xff]  }
 0xd72   :  { %v1060_v59 = vmul.f32 0.071428575, %v1055_v51  ;;  %v3827_v60 = vpop.f32.mrb[31].mxu0  ;;  %v1230_v8 = vmul.f32 2.0, %v1055_v51  ;;  %v5628_v51 = vld [vmem:[#allocation10] sm:$0xff]   ;;  %v5638_v58 = vld [vmem:[#allocation10 + $0x10] sm:$0xff]  }
 0xd73   :  { %v5646_v60 = vld [vmem:[#allocation10 + $0x20] sm:$0xff]  }
 0xd74   :  { %v1061_v61 = vadd.f32 %v1060_v59, %v5418_v14  ;;  %v1231_v13 = vadd.f32 %v1230_v8, %v5460_v23  ;;  %v5642_v59 = vld [vmem:[#allocation10 + $0x18] sm:$0xff]  }
 0xd76   :  { %v1062_v62 = vpack.c.bf16 %v1061_v61, %v1061_v61  ;;  %v5650_v61 = vld [vmem:[#allocation10 + $0x28] sm:$0xff]  }
 0xd78   :  { %3845 = vmatmul.mubr.bf16.vlgmr.msra.gmra.mrb[28].mxu1 %v1062_v62  ;;  %v5654_v62 = vld [vmem:[#allocation10 + $0x30] sm:$0xff]  }
 0xd79   :  { %3869 = vmatpush3.bf16.msra.mxu1 %v5172_v25  ;;  %3884 = vmatprep.mubr.msk.bf16.mxu1 %vm5016_vm0, %v5015_v0 }
 0xd7a   :  { %3870 = vmatprep.subr.bf16.mxu1 %v5015_v0 }
 0xd7d   :  { %3871 = vmatpush3.bf16.msra.mxu1 %v5175_v26 }
 0xd7e   :  { %3872 = vmatprep.subr.bf16.mxu1 %v5015_v0 }
 0xd81   :  { %3873 = vmatpush3.bf16.msra.mxu1 %v5179_v27 }
 0xd82   :  { %3874 = vmatprep.subr.bf16.mxu1 %v5015_v0 }
 0xd85   :  { %3875 = vmatpush3.bf16.msra.mxu1 %v5183_v28 }
 0xd86   :  { %3876 = vmatprep.subr.bf16.mxu1 %v5015_v0 }
 0xd89   :  { %3877 = vmatpush3.bf16.msra.mxu1 %v5187_v29 }
 0xd8a   :  { %3878 = vmatprep.subr.bf16.mxu1 %v5015_v0 }
 0xd8d   :  { %3879 = vmatpush3.bf16.msra.mxu1 %v5191_v30 }
 0xd8e   :  { %3880 = vmatprep.subr.bf16.mxu1 %v5015_v0 }
 0xd91   :  { %3881 = vmatpush3.bf16.msra.mxu1 %v5195_v31 }
 0xd92   :  { %3882 = vmatprep.subr.bf16.mxu1 %v5015_v0 }
 0xd95   :  { %3883 = vmatpush3.bf16.msra.mxu1 %v5205_v40 }
 0xd96   :  { %3908 = vmatprep.subr.bf16.mxu1 %v5015_v0 }
 0xe4b   :  { %v1097_v63 = vpop.f32.mrb[28].mxu1 }
 0xe4c   :  { %v1098_v2 = vadd.f32 %v5269_v56, %v1097_v63  ;;  %v3846_v3 = vpop.f32.mrb[29].mxu1  ;;  %v5658_v63 = vld [vmem:[#allocation10 + $0x38] sm:$0xff]  }
 0xe4d   :  { %v1100_v4 = vpop.f32.mrb[30].mxu1 }
 0xe4e   :  { %4763 = vtanh.f32 %v1098_v2  ;;  %v3847_v5 = vpop.f32.mrb[31].mxu1 }
 0xe58   :  { %v4764_v6 = vpop.eup %4763 }
 0xe59   :  { %v1104_v7 = vpack.c.bf16 %v4764_v6, %v4764_v6 }
 0xe5b   :  { %3865 = vmatmul.mubr.bf16.vlgmr.msra.gmra.mrb[32].mxu0 %v1104_v7 }
 0xe5c   :  { %3889 = vmatpush3.bf16.msra.mxu0 %v5209_v41  ;;  %3904 = vmatprep.mubr.msk.bf16.mxu0 %vm5016_vm0, %v5015_v0 }
 0xe5d   :  { %3890 = vmatprep.subr.bf16.mxu0 %v5015_v0 }
 0xe60   :  { %3891 = vmatpush3.bf16.msra.mxu0 %v5212_v42 }
 0xe61   :  { %3892 = vmatprep.subr.bf16.mxu0 %v5015_v0 }
 0xe64   :  { %3893 = vmatpush3.bf16.msra.mxu0 %v5216_v43 }
 0xe65   :  { %3894 = vmatprep.subr.bf16.mxu0 %v5015_v0 }
 0xe68   :  { %3895 = vmatpush3.bf16.msra.mxu0 %v5220_v44 }
 0xe69   :  { %3896 = vmatprep.subr.bf16.mxu0 %v5015_v0 }
 0xe6c   :  { %3897 = vmatpush3.bf16.msra.mxu0 %v5250_v52 }
 0xe6d   :  { %3898 = vmatprep.subr.bf16.mxu0 %v5015_v0 }
 0xe70   :  { %3899 = vmatpush3.bf16.msra.mxu0 %v5254_v53 }
 0xe71   :  { %3900 = vmatprep.subr.bf16.mxu0 %v5015_v0 }
 0xe74   :  { %3901 = vmatpush3.bf16.msra.mxu0 %v5258_v54 }
 0xe75   :  { %3902 = vmatprep.subr.bf16.mxu0 %v5015_v0 }
 0xe78   :  { %3903 = vmatpush3.bf16.msra.mxu0 %v5262_v55 }
 0xe79   :  { %3928 = vmatprep.subr.bf16.mxu0 %v5015_v0 }
 0xf2e   :  { %v1139_v9 = vpop.f32.mrb[32].mxu0 }
 0xf2f   :  { %v1140_v10 = vadd.f32 %v5293_v1, %v1139_v9  ;;  %v3866_v11 = vpop.f32.mrb[33].mxu0  ;;  %v5663_v9 = vld [vmem:[#allocation11] sm:$0xff]  }
 0xf30   :  { %v1142_v12 = vpop.f32.mrb[34].mxu0  ;;  %v5677_v11 = vld [vmem:[#allocation11 + $0x18] sm:$0xff]  }
 0xf31   :  { %v1145_v15 = vmul.f32 0.14285715, %v1140_v10  ;;  %v1232_v47 = vmul.f32 2.0, %v1140_v10  ;;  %v3867_v16 = vpop.f32.mrb[35].mxu0  ;;  %v5669_v10 = vld [vmem:[#allocation11 + $0x8] sm:$0xff]  }
 0xf33   :  { %v1146_v17 = vadd.f32 %v1145_v15, %v5418_v14  ;;  %v1233_v18 = vadd.f32 %v1232_v47, %v1231_v13 }
 0xf35   :  { %v1147_v19 = vpack.c.bf16 %v1146_v17, %v1146_v17 }
 0xf37   :  { %3885 = vmatmul.mubr.bf16.vlgmr.msra.gmra.mrb[32].mxu1 %v1147_v19 }
 0xf38   :  { %3909 = vmatpush3.bf16.msra.mxu1 %v5172_v25  ;;  %3924 = vmatprep.mubr.msk.bf16.mxu1 %vm5016_vm0, %v5015_v0 }
 0xf39   :  { %3910 = vmatprep.subr.bf16.mxu1 %v5015_v0 }
 0xf3c   :  { %3911 = vmatpush3.bf16.msra.mxu1 %v5175_v26 }
 0xf3d   :  { %3912 = vmatprep.subr.bf16.mxu1 %v5015_v0 }
 0xf40   :  { %3913 = vmatpush3.bf16.msra.mxu1 %v5179_v27 }
 0xf41   :  { %3914 = vmatprep.subr.bf16.mxu1 %v5015_v0 }
 0xf44   :  { %3915 = vmatpush3.bf16.msra.mxu1 %v5183_v28 }
 0xf45   :  { %3916 = vmatprep.subr.bf16.mxu1 %v5015_v0 }
 0xf48   :  { %3917 = vmatpush3.bf16.msra.mxu1 %v5187_v29 }
 0xf49   :  { %3918 = vmatprep.subr.bf16.mxu1 %v5015_v0 }
 0xf4c   :  { %3919 = vmatpush3.bf16.msra.mxu1 %v5191_v30 }
 0xf4d   :  { %3920 = vmatprep.subr.bf16.mxu1 %v5015_v0 }
 0xf50   :  { %3921 = vmatpush3.bf16.msra.mxu1 %v5195_v31 }
 0xf51   :  { %3922 = vmatprep.subr.bf16.mxu1 %v5015_v0 }
 0xf54   :  { %3923 = vmatpush3.bf16.msra.mxu1 %v5205_v40 }
 0xf55   :  { %3948 = vmatprep.subr.bf16.mxu1 %v5015_v0 }
0x100a   :  { %v1182_v20 = vpop.f32.mrb[32].mxu1 }
0x100b   :  { %v1183_v21 = vadd.f32 %v5269_v56, %v1182_v20  ;;  %v3886_v22 = vpop.f32.mrb[33].mxu1 }
0x100c   :  { %v1185_v23 = vpop.f32.mrb[34].mxu1 }
0x100d   :  { %4765 = vtanh.f32 %v1183_v21  ;;  %v3887_v24 = vpop.f32.mrb[35].mxu1  ;;  %v5725_v23 = vld [vmem:[#allocation11 + $0x20] sm:$0xff]  }
0x100e   :  { %v5729_v24 = vld [vmem:[#allocation11 + $0x28] sm:$0xff]  }
0x1017   :  { %v4766_v32 = vpop.eup %4765 }
0x1018   :  { %v1189_v33 = vpack.c.bf16 %v4766_v32, %v4766_v32  ;;  %v5733_v32 = vld [vmem:[#allocation11 + $0x30] sm:$0xff]  }
0x101a   :  { %3905 = vmatmul.mubr.bf16.vlgmr.msra.gmra.mrb[36].mxu0 %v1189_v33  ;;  %v5737_v33 = vld [vmem:[#allocation11 + $0x38] sm:$0xff]  }
0x101b   :  { %3929 = vmatpush3.bf16.msra.mxu0 %v5209_v41  ;;  %3944 = vmatprep.mubr.msk.bf16.mxu0 %vm5016_vm0, %v5015_v0 }
0x101c   :  { %3930 = vmatprep.subr.bf16.mxu0 %v5015_v0 }
0x101f   :  { %3931 = vmatpush3.bf16.msra.mxu0 %v5212_v42 }
0x1020   :  { %3932 = vmatprep.subr.bf16.mxu0 %v5015_v0 }
0x1023   :  { %3933 = vmatpush3.bf16.msra.mxu0 %v5216_v43 }
0x1024   :  { %3934 = vmatprep.subr.bf16.mxu0 %v5015_v0 }
0x1027   :  { %3935 = vmatpush3.bf16.msra.mxu0 %v5220_v44 }
0x1028   :  { %3936 = vmatprep.subr.bf16.mxu0 %v5015_v0 }
0x102b   :  { %3937 = vmatpush3.bf16.msra.mxu0 %v5250_v52 }
0x102c   :  { %3938 = vmatprep.subr.bf16.mxu0 %v5015_v0 }
0x102f   :  { %3939 = vmatpush3.bf16.msra.mxu0 %v5254_v53 }
0x1030   :  { %3940 = vmatprep.subr.bf16.mxu0 %v5015_v0 }
0x1033   :  { %3941 = vmatpush3.bf16.msra.mxu0 %v5258_v54 }
0x1034   :  { %3942 = vmatprep.subr.bf16.mxu0 %v5015_v0 }
0x1037   :  { %3943 = vmatpush3.bf16.msra.mxu0 %v5262_v55 }
0x1038   :  { %3968 = vmatprep.subr.bf16.mxu0 %v5015_v0 }
0x10ed   :  { %v1224_v34 = vpop.f32.mrb[36].mxu0 }
0x10ee   :  { %v1225_v35 = vadd.f32 %v5293_v1, %v1224_v34  ;;  %v3906_v36 = vpop.f32.mrb[37].mxu0 }
0x10ef   :  { %v1227_v37 = vpop.f32.mrb[38].mxu0  ;;  %v5744_v36 = vld [vmem:[%s6466_s6 + $0x4] ss:$0 sm:$0xff] }
0x10f0   :  { %v1234_v38 = vadd.f32 %v1233_v18, %v1225_v35  ;;  %v3907_v39 = vpop.f32.mrb[39].mxu0 }
0x10f2   :  { %v1235_v45 = vmul.f32 0.023809524, %v1234_v38 }
0x10f4   :  { %v5582_v46 = vadd.f32 %v1235_v45, %v5418_v14 }
0x10f6   :  { %v1237_v48 = vpack.c.bf16 %v5582_v46, %v5582_v46 }
0x10f8   :  { %3925 = vmatmul.mubr.bf16.vlgmr.msra.gmra.mrb[36].mxu1 %v1237_v48 }
0x10f9   :  { %3949 = vmatpush3.bf16.msra.mxu1 %v5172_v25  ;;  %3964 = vmatprep.mubr.msk.bf16.mxu1 %vm5016_vm0, %v5015_v0 }
0x10fa   :  { %3950 = vmatprep.subr.bf16.mxu1 %v5015_v0 }
0x10fd   :  { %3951 = vmatpush3.bf16.msra.mxu1 %v5175_v26 }
0x10fe   :  { %3952 = vmatprep.subr.bf16.mxu1 %v5015_v0 }
0x1101   :  { %3953 = vmatpush3.bf16.msra.mxu1 %v5179_v27 }
0x1102   :  { %3954 = vmatprep.subr.bf16.mxu1 %v5015_v0 }
0x1105   :  { %3955 = vmatpush3.bf16.msra.mxu1 %v5183_v28 }
0x1106   :  { %3956 = vmatprep.subr.bf16.mxu1 %v5015_v0 }
0x1109   :  { %3957 = vmatpush3.bf16.msra.mxu1 %v5187_v29 }
0x110a   :  { %3958 = vmatprep.subr.bf16.mxu1 %v5015_v0 }
0x110d   :  { %3959 = vmatpush3.bf16.msra.mxu1 %v5191_v30 }
0x110e   :  { %3960 = vmatprep.subr.bf16.mxu1 %v5015_v0 }
0x1111   :  { %3961 = vmatpush3.bf16.msra.mxu1 %v5195_v31 }
0x1112   :  { %3962 = vmatprep.subr.bf16.mxu1 %v5015_v0 }
0x1115   :  { %3963 = vmatpush3.bf16.msra.mxu1 %v5205_v40 }
0x1116   :  { %3988 = vmatprep.subr.bf16.mxu1 %v5015_v0 }
0x11cb   :  { %v1272_v25 = vpop.f32.mrb[36].mxu1 }
0x11cc   :  { %v1273_v26 = vadd.f32 %v5269_v56, %v1272_v25  ;;  %v3926_v27 = vpop.f32.mrb[37].mxu1 }
0x11cd   :  { %v1275_v28 = vpop.f32.mrb[38].mxu1 }
0x11ce   :  { %4767 = vtanh.f32 %v1273_v26  ;;  %v3927_v29 = vpop.f32.mrb[39].mxu1 }
0x11d8   :  { %v4768_v14 = vpop.eup %4767 }
0x11d9   :  { %v1279_v49 = vpack.c.bf16 %v4768_v14, %v4768_v14 }
0x11db   :  { %3945 = vmatmul.mubr.bf16.vlgmr.msra.gmra.mrb[40].mxu0 %v1279_v49 }
0x11dc   :  { %3969 = vmatpush3.bf16.msra.mxu0 %v5209_v41  ;;  %3984 = vmatprep.mubr.msk.bf16.mxu0 %vm5016_vm0, %v5015_v0 }
0x11dd   :  { %3970 = vmatprep.subr.bf16.mxu0 %v5015_v0 }
0x11e0   :  { %3971 = vmatpush3.bf16.msra.mxu0 %v5212_v42 }
0x11e1   :  { %3972 = vmatprep.subr.bf16.mxu0 %v5015_v0 }
0x11e4   :  { %3973 = vmatpush3.bf16.msra.mxu0 %v5216_v43 }
0x11e5   :  { %3974 = vmatprep.subr.bf16.mxu0 %v5015_v0 }
0x11e8   :  { %3975 = vmatpush3.bf16.msra.mxu0 %v5220_v44 }
0x11e9   :  { %3976 = vmatprep.subr.bf16.mxu0 %v5015_v0 }
0x11ec   :  { %3977 = vmatpush3.bf16.msra.mxu0 %v5250_v52 }
0x11ed   :  { %3978 = vmatprep.subr.bf16.mxu0 %v5015_v0 }
0x11f0   :  { %3979 = vmatpush3.bf16.msra.mxu0 %v5254_v53 }
0x11f1   :  { %3980 = vmatprep.subr.bf16.mxu0 %v5015_v0 }
0x11f4   :  { %3981 = vmatpush3.bf16.msra.mxu0 %v5258_v54 }
0x11f5   :  { %3982 = vmatprep.subr.bf16.mxu0 %v5015_v0 }
0x11f8   :  { %3983 = vmatpush3.bf16.msra.mxu0 %v5262_v55 }
0x11f9   :  { %4008 = vmatprep.subr.bf16.mxu0 %v5015_v0 }
0x12ae   :  { %v1314_v30 = vpop.f32.mrb[40].mxu0 }
0x12af   :  { %v5624_v31 = vadd.f32 %v5293_v1, %v1314_v30  ;;  %v3946_v40 = vpop.f32.mrb[41].mxu0 }
0x12b0   :  { %v1317_v41 = vpop.f32.mrb[42].mxu0 }
0x12b1   :  { %v1320_v42 = vmul.f32 0.071428575, %v5624_v31  ;;  %v3947_v43 = vpop.f32.mrb[43].mxu0 }
0x12b3   :  { %v1321_v44 = vadd.f32 %v1320_v42, %v5582_v46 }
0x12b5   :  { %v1322_v50 = vpack.c.bf16 %v1321_v44, %v1321_v44 }
0x12b7   :  { %3965 = vmatmul.mubr.bf16.vlgmr.msra.gmra.mrb[40].mxu1 %v1322_v50 }
0x12b8   :  { %3989 = vmatpush3.bf16.msra.mxu1 %v5628_v51  ;;  %4004 = vmatprep.mubr.msk.bf16.mxu1 %vm5016_vm0, %v5015_v0 }
0x12b9   :  { %3990 = vmatprep.subr.bf16.mxu1 %v5015_v0 }
0x12bc   :  { %3991 = vmatpush3.bf16.msra.mxu1 %v5634_v57 }
0x12bd   :  { %3992 = vmatprep.subr.bf16.mxu1 %v5015_v0 }
0x12c0   :  { %3993 = vmatpush3.bf16.msra.mxu1 %v5638_v58 }
0x12c1   :  { %3994 = vmatprep.subr.bf16.mxu1 %v5015_v0 }
0x12c4   :  { %3995 = vmatpush3.bf16.msra.mxu1 %v5642_v59 }
0x12c5   :  { %3996 = vmatprep.subr.bf16.mxu1 %v5015_v0 }
0x12c8   :  { %3997 = vmatpush3.bf16.msra.mxu1 %v5646_v60 }
0x12c9   :  { %3998 = vmatprep.subr.bf16.mxu1 %v5015_v0 }
0x12cc   :  { %3999 = vmatpush3.bf16.msra.mxu1 %v5650_v61 }
0x12cd   :  { %4000 = vmatprep.subr.bf16.mxu1 %v5015_v0 }
0x12d0   :  { %4001 = vmatpush3.bf16.msra.mxu1 %v5654_v62 }
0x12d1   :  { %4002 = vmatprep.subr.bf16.mxu1 %v5015_v0 }
0x12d4   :  { %4003 = vmatpush3.bf16.msra.mxu1 %v5658_v63 }
0x12d5   :  { %4028 = vmatprep.subr.bf16.mxu1 %v5015_v0 }
0x138a   :  { %v1357_v2 = vpop.f32.mrb[40].mxu1 }
0x138b   :  { %v1358_v3 = vadd.f32 %v5269_v56, %v1357_v2  ;;  %v3966_v4 = vpop.f32.mrb[41].mxu1  ;;  %v5673_v56 = vld [vmem:[#allocation11 + $0x10] sm:$0xff]  }
0x138c   :  { %v1360_v5 = vpop.f32.mrb[42].mxu1 }
0x138d   :  { %4769 = vtanh.f32 %v1358_v3  ;;  %v3967_v6 = vpop.f32.mrb[43].mxu1 }
0x1397   :  { %v4770_v7 = vpop.eup %4769 }
0x1398   :  { %v1364_v8 = vpack.c.bf16 %v4770_v7, %v4770_v7 }
0x139a   :  { %3985 = vmatmul.mubr.bf16.vlgmr.msra.gmra.mrb[44].mxu0 %v1364_v8 }
0x139b   :  { %4009 = vmatpush3.bf16.msra.mxu0 %v5663_v9  ;;  %4024 = vmatprep.mubr.msk.bf16.mxu0 %vm5016_vm0, %v5015_v0 }
0x139c   :  { %4010 = vmatprep.subr.bf16.mxu0 %v5015_v0 }
0x139f   :  { %4011 = vmatpush3.bf16.msra.mxu0 %v5669_v10 }
0x13a0   :  { %4012 = vmatprep.subr.bf16.mxu0 %v5015_v0 }
0x13a3   :  { %4013 = vmatpush3.bf16.msra.mxu0 %v5673_v56 }
0x13a4   :  { %4014 = vmatprep.subr.bf16.mxu0 %v5015_v0 }
0x13a7   :  { %4015 = vmatpush3.bf16.msra.mxu0 %v5677_v11 }
0x13a8   :  { %4016 = vmatprep.subr.bf16.mxu0 %v5015_v0 }
0x13ab   :  { %4017 = vmatpush3.bf16.msra.mxu0 %v5250_v52 }
0x13ac   :  { %4018 = vmatprep.subr.bf16.mxu0 %v5015_v0 }
0x13af   :  { %4019 = vmatpush3.bf16.msra.mxu0 %v5254_v53 }
0x13b0   :  { %4020 = vmatprep.subr.bf16.mxu0 %v5015_v0 }
0x13b3   :  { %4021 = vmatpush3.bf16.msra.mxu0 %v5258_v54 }
0x13b4   :  { %4022 = vmatprep.subr.bf16.mxu0 %v5015_v0 }
0x13b7   :  { %4023 = vmatpush3.bf16.msra.mxu0 %v5262_v55  ;;  %v5712_v55 = vld [vmem:[%s6466_s6 + $0x3] ss:$0 sm:$0xff] }
0x13b8   :  { %4048 = vmatprep.subr.bf16.mxu0 %v5015_v0 }
0x146d   :  { %v1399_v12 = vpop.f32.mrb[44].mxu0 }
0x146e   :  { %v1400_v13 = vadd.f32 %v5293_v1, %v1399_v12  ;;  %v3986_v15 = vpop.f32.mrb[45].mxu0 }
0x146f   :  { %v1402_v47 = vpop.f32.mrb[46].mxu0 }
0x1470   :  { %v1405_v52 = vmul.f32 0.071428575, %v1400_v13  ;;  %v3987_v16 = vpop.f32.mrb[47].mxu0  ;;  %v1575_v34 = vmul.f32 2.0, %v1400_v13 }
0x1472   :  { %v1406_v17 = vadd.f32 %v1405_v52, %v5582_v46  ;;  %v1576_v45 = vadd.f32 %v1575_v34, %v5624_v31 }
0x1474   :  { %v1407_v53 = vpack.c.bf16 %v1406_v17, %v1406_v17 }
0x1476   :  { %4005 = vmatmul.mubr.bf16.vlgmr.msra.gmra.mrb[44].mxu1 %v1407_v53 }
0x1477   :  { %4029 = vmatpush3.bf16.msra.mxu1 %v5628_v51  ;;  %4044 = vmatprep.mubr.msk.bf16.mxu1 %vm5016_vm0, %v5015_v0 }
0x1478   :  { %4030 = vmatprep.subr.bf16.mxu1 %v5015_v0 }
0x147b   :  { %4031 = vmatpush3.bf16.msra.mxu1 %v5634_v57 }
0x147c   :  { %4032 = vmatprep.subr.bf16.mxu1 %v5015_v0 }
0x147f   :  { %4033 = vmatpush3.bf16.msra.mxu1 %v5638_v58 }
0x1480   :  { %4034 = vmatprep.subr.bf16.mxu1 %v5015_v0 }
0x1483   :  { %4035 = vmatpush3.bf16.msra.mxu1 %v5642_v59 }
0x1484   :  { %4036 = vmatprep.subr.bf16.mxu1 %v5015_v0 }
0x1487   :  { %4037 = vmatpush3.bf16.msra.mxu1 %v5646_v60 }
0x1488   :  { %4038 = vmatprep.subr.bf16.mxu1 %v5015_v0 }
0x148b   :  { %4039 = vmatpush3.bf16.msra.mxu1 %v5650_v61 }
0x148c   :  { %4040 = vmatprep.subr.bf16.mxu1 %v5015_v0 }
0x148f   :  { %4041 = vmatpush3.bf16.msra.mxu1 %v5654_v62 }
0x1490   :  { %4042 = vmatprep.subr.bf16.mxu1 %v5015_v0 }
0x1493   :  { %4043 = vmatpush3.bf16.msra.mxu1 %v5658_v63 }
0x1494   :  { %4068 = vmatprep.subr.bf16.mxu1 %v5015_v0 }
0x1549   :  { %v1442_v54 = vpop.f32.mrb[44].mxu1 }
0x154a   :  { %v1443_v1 = vadd.f32 %v5712_v55, %v1442_v54  ;;  %v4006_v18 = vpop.f32.mrb[45].mxu1 }
0x154b   :  { %v1445_v19 = vpop.f32.mrb[46].mxu1 }
0x154c   :  { %4771 = vtanh.f32 %v1443_v1  ;;  %v4007_v20 = vpop.f32.mrb[47].mxu1 }
0x1556   :  { %v4772_v21 = vpop.eup %4771 }
0x1557   :  { %v1449_v22 = vpack.c.bf16 %v4772_v21, %v4772_v21 }
0x1559   :  { %4025 = vmatmul.mubr.bf16.vlgmr.msra.gmra.mrb[48].mxu0 %v1449_v22 }
0x155a   :  { %4049 = vmatpush3.bf16.msra.mxu0 %v5663_v9  ;;  %4064 = vmatprep.mubr.msk.bf16.mxu0 %vm5016_vm0, %v5015_v0 }
0x155b   :  { %4050 = vmatprep.subr.bf16.mxu0 %v5015_v0 }
0x155e   :  { %4051 = vmatpush3.bf16.msra.mxu0 %v5669_v10 }
0x155f   :  { %4052 = vmatprep.subr.bf16.mxu0 %v5015_v0 }
0x1562   :  { %4053 = vmatpush3.bf16.msra.mxu0 %v5673_v56 }
0x1563   :  { %4054 = vmatprep.subr.bf16.mxu0 %v5015_v0 }
0x1566   :  { %4055 = vmatpush3.bf16.msra.mxu0 %v5677_v11 }
0x1567   :  { %4056 = vmatprep.subr.bf16.mxu0 %v5015_v0 }
0x156a   :  { %4057 = vmatpush3.bf16.msra.mxu0 %v5725_v23 }
0x156b   :  { %4058 = vmatprep.subr.bf16.mxu0 %v5015_v0 }
0x156e   :  { %4059 = vmatpush3.bf16.msra.mxu0 %v5729_v24 }
0x156f   :  { %4060 = vmatprep.subr.bf16.mxu0 %v5015_v0 }
0x1572   :  { %4061 = vmatpush3.bf16.msra.mxu0 %v5733_v32 }
0x1573   :  { %4062 = vmatprep.subr.bf16.mxu0 %v5015_v0 }
0x1576   :  { %4063 = vmatpush3.bf16.msra.mxu0 %v5737_v33 }
0x1577   :  { %4088 = vmatprep.subr.bf16.mxu0 %v5015_v0 }
0x162c   :  { %v1484_v35 = vpop.f32.mrb[48].mxu0 }
0x162d   :  { %v1485_v37 = vadd.f32 %v5744_v36, %v1484_v35  ;;  %v4026_v38 = vpop.f32.mrb[49].mxu0 }
0x162e   :  { %v1487_v39 = vpop.f32.mrb[50].mxu0 }
0x162f   :  { %v1490_v48 = vmul.f32 0.14285715, %v1485_v37  ;;  %v1577_v25 = vmul.f32 2.0, %v1485_v37  ;;  %v4027_v26 = vpop.f32.mrb[51].mxu0 }
0x1631   :  { %v1491_v27 = vadd.f32 %v1490_v48, %v5582_v46  ;;  %v1578_v28 = vadd.f32 %v1577_v25, %v1576_v45 }
0x1633   :  { %v1492_v29 = vpack.c.bf16 %v1491_v27, %v1491_v27 }
0x1635   :  { %4045 = vmatmul.mubr.bf16.vlgmr.msra.gmra.mrb[48].mxu1 %v1492_v29 }
0x1636   :  { %4069 = vmatpush3.bf16.msra.mxu1 %v5628_v51  ;;  %4084 = vmatprep.mubr.msk.bf16.mxu1 %vm5016_vm0, %v5015_v0 }
0x1637   :  { %4070 = vmatprep.subr.bf16.mxu1 %v5015_v0 }
0x163a   :  { %4071 = vmatpush3.bf16.msra.mxu1 %v5634_v57 }
0x163b   :  { %4072 = vmatprep.subr.bf16.mxu1 %v5015_v0 }
0x163e   :  { %4073 = vmatpush3.bf16.msra.mxu1 %v5638_v58 }
0x163f   :  { %4074 = vmatprep.subr.bf16.mxu1 %v5015_v0 }
0x1642   :  { %4075 = vmatpush3.bf16.msra.mxu1 %v5642_v59 }
0x1643   :  { %4076 = vmatprep.subr.bf16.mxu1 %v5015_v0 }
0x1646   :  { %4077 = vmatpush3.bf16.msra.mxu1 %v5646_v60 }
0x1647   :  { %4078 = vmatprep.subr.bf16.mxu1 %v5015_v0 }
0x164a   :  { %4079 = vmatpush3.bf16.msra.mxu1 %v5650_v61 }
0x164b   :  { %4080 = vmatprep.subr.bf16.mxu1 %v5015_v0 }
0x164e   :  { %4081 = vmatpush3.bf16.msra.mxu1 %v5654_v62 }
0x164f   :  { %4082 = vmatprep.subr.bf16.mxu1 %v5015_v0 }
0x1652   :  { %4083 = vmatpush3.bf16.msra.mxu1 %v5658_v63 }
0x1653   :  { %4108 = vmatprep.subr.bf16.mxu1 %v5015_v0 }
0x1708   :  { %v1527_v14 = vpop.f32.mrb[48].mxu1 }
0x1709   :  { %v1528_v49 = vadd.f32 %v5712_v55, %v1527_v14  ;;  %v4046_v30 = vpop.f32.mrb[49].mxu1 }
0x170a   :  { %v1530_v31 = vpop.f32.mrb[50].mxu1 }
0x170b   :  { %4773 = vtanh.f32 %v1528_v49  ;;  %v4047_v40 = vpop.f32.mrb[51].mxu1 }
0x1715   :  { %v4774_v41 = vpop.eup %4773 }
0x1716   :  { %v1534_v42 = vpack.c.bf16 %v4774_v41, %v4774_v41 }
0x1718   :  { %4065 = vmatmul.mubr.bf16.vlgmr.msra.gmra.mrb[52].mxu0 %v1534_v42 }
0x1719   :  { %4089 = vmatpush3.bf16.msra.mxu0 %v5663_v9  ;;  %4104 = vmatprep.mubr.msk.bf16.mxu0 %vm5016_vm0, %v5015_v0 }
0x171a   :  { %4090 = vmatprep.subr.bf16.mxu0 %v5015_v0 }
0x171d   :  { %4091 = vmatpush3.bf16.msra.mxu0 %v5669_v10 }
0x171e   :  { %4092 = vmatprep.subr.bf16.mxu0 %v5015_v0 }
0x1721   :  { %4093 = vmatpush3.bf16.msra.mxu0 %v5673_v56 }
0x1722   :  { %4094 = vmatprep.subr.bf16.mxu0 %v5015_v0 }
0x1725   :  { %4095 = vmatpush3.bf16.msra.mxu0 %v5677_v11 }
0x1726   :  { %4096 = vmatprep.subr.bf16.mxu0 %v5015_v0 }
0x1729   :  { %4097 = vmatpush3.bf16.msra.mxu0 %v5725_v23 }
0x172a   :  { %4098 = vmatprep.subr.bf16.mxu0 %v5015_v0 }
0x172d   :  { %4099 = vmatpush3.bf16.msra.mxu0 %v5729_v24 }
0x172e   :  { %4100 = vmatprep.subr.bf16.mxu0 %v5015_v0 }
0x1731   :  { %4101 = vmatpush3.bf16.msra.mxu0 %v5733_v32 }
0x1732   :  { %4102 = vmatprep.subr.bf16.mxu0 %v5015_v0 }
0x1735   :  { %4103 = vmatpush3.bf16.msra.mxu0 %v5737_v33 }
0x1736   :  { %4128 = vmatprep.subr.bf16.mxu0 %v5015_v0 }
0x17eb   :  { %v1569_v43 = vpop.f32.mrb[52].mxu0 }
0x17ec   :  { %v1570_v44 = vadd.f32 %v5744_v36, %v1569_v43  ;;  %v4066_v50 = vpop.f32.mrb[53].mxu0 }
0x17ed   :  { %v1572_v2 = vpop.f32.mrb[54].mxu0 }
0x17ee   :  { %v1579_v3 = vadd.f32 %v1578_v28, %v1570_v44  ;;  %v4067_v4 = vpop.f32.mrb[55].mxu0 }
0x17f0   :  { %v1580_v5 = vmul.f32 0.023809524, %v1579_v3 }
0x17f2   :  { %v5788_v6 = vadd.f32 %v1580_v5, %v5582_v46 }
0x17f4   :  { %v1582_v7 = vpack.c.bf16 %v5788_v6, %v5788_v6 }
0x17f6   :  { %4085 = vmatmul.mubr.bf16.vlgmr.msra.gmra.mrb[52].mxu1 %v1582_v7 }
0x17f7   :  { %4109 = vmatpush3.bf16.msra.mxu1 %v5628_v51  ;;  %4124 = vmatprep.mubr.msk.bf16.mxu1 %vm5016_vm0, %v5015_v0 }
0x17f8   :  { %4110 = vmatprep.subr.bf16.mxu1 %v5015_v0 }
0x17fb   :  { %4111 = vmatpush3.bf16.msra.mxu1 %v5634_v57 }
0x17fc   :  { %4112 = vmatprep.subr.bf16.mxu1 %v5015_v0 }
0x17ff   :  { %4113 = vmatpush3.bf16.msra.mxu1 %v5638_v58 }
0x1800   :  { %4114 = vmatprep.subr.bf16.mxu1 %v5015_v0 }
0x1803   :  { %4115 = vmatpush3.bf16.msra.mxu1 %v5642_v59 }
0x1804   :  { %4116 = vmatprep.subr.bf16.mxu1 %v5015_v0 }
0x1807   :  { %4117 = vmatpush3.bf16.msra.mxu1 %v5646_v60 }
0x1808   :  { %4118 = vmatprep.subr.bf16.mxu1 %v5015_v0 }
0x180b   :  { %4119 = vmatpush3.bf16.msra.mxu1 %v5650_v61 }
0x180c   :  { %4120 = vmatprep.subr.bf16.mxu1 %v5015_v0 }
0x180f   :  { %4121 = vmatpush3.bf16.msra.mxu1 %v5654_v62 }
0x1810   :  { %4122 = vmatprep.subr.bf16.mxu1 %v5015_v0 }
0x1813   :  { %4123 = vmatpush3.bf16.msra.mxu1 %v5658_v63 }
0x1814   :  { %4148 = vmatprep.subr.bf16.mxu1 %v5015_v0 }
0x18c9   :  { %v1617_v46 = vpop.f32.mrb[52].mxu1 }
0x18ca   :  { %v1618_v8 = vadd.f32 %v5712_v55, %v1617_v46  ;;  %v4086_v12 = vpop.f32.mrb[53].mxu1 }
0x18cb   :  { %v1620_v13 = vpop.f32.mrb[54].mxu1 }
0x18cc   :  { %4775 = vtanh.f32 %v1618_v8  ;;  %v4087_v15 = vpop.f32.mrb[55].mxu1 }
0x18d6   :  { %v4776_v47 = vpop.eup %4775 }
0x18d7   :  { %v1624_v52 = vpack.c.bf16 %v4776_v47, %v4776_v47 }
0x18d9   :  { %4105 = vmatmul.mubr.bf16.vlgmr.msra.gmra.mrb[56].mxu0 %v1624_v52 }
0x18da   :  { %4129 = vmatpush3.bf16.msra.mxu0 %v5663_v9  ;;  %4144 = vmatprep.mubr.msk.bf16.mxu0 %vm5016_vm0, %v5015_v0 }
0x18db   :  { %4130 = vmatprep.subr.bf16.mxu0 %v5015_v0 }
0x18de   :  { %4131 = vmatpush3.bf16.msra.mxu0 %v5669_v10 }
0x18df   :  { %4132 = vmatprep.subr.bf16.mxu0 %v5015_v0 }
0x18e2   :  { %4133 = vmatpush3.bf16.msra.mxu0 %v5673_v56 }
0x18e3   :  { %4134 = vmatprep.subr.bf16.mxu0 %v5015_v0 }
0x18e6   :  { %4135 = vmatpush3.bf16.msra.mxu0 %v5677_v11 }
0x18e7   :  { %4136 = vmatprep.subr.bf16.mxu0 %v5015_v0 }
0x18ea   :  { %4137 = vmatpush3.bf16.msra.mxu0 %v5725_v23 }
0x18eb   :  { %4138 = vmatprep.subr.bf16.mxu0 %v5015_v0 }
0x18ee   :  { %4139 = vmatpush3.bf16.msra.mxu0 %v5729_v24 }
0x18ef   :  { %4140 = vmatprep.subr.bf16.mxu0 %v5015_v0 }
0x18f2   :  { %4141 = vmatpush3.bf16.msra.mxu0 %v5733_v32 }
0x18f3   :  { %4142 = vmatprep.subr.bf16.mxu0 %v5015_v0 }
0x18f6   :  { %4143 = vmatpush3.bf16.msra.mxu0 %v5737_v33 }
0x18f7   :  { %4168 = vmatprep.subr.bf16.mxu0 %v5015_v0 }
0x19ac   :  { %v1659_v16 = vpop.f32.mrb[56].mxu0 }
0x19ad   :  { %v5830_v17 = vadd.f32 %v5744_v36, %v1659_v16  ;;  %v4106_v53 = vpop.f32.mrb[57].mxu0 }
0x19ae   :  { %v1662_v54 = vpop.f32.mrb[58].mxu0 }
0x19af   :  { %v1665_v1 = vmul.f32 0.071428575, %v5830_v17  ;;  %v4107_v18 = vpop.f32.mrb[59].mxu0 }
0x19b1   :  { %v1666_v19 = vadd.f32 %v1665_v1, %v5788_v6 }
0x19b3   :  { %v1667_v20 = vpack.c.bf16 %v1666_v19, %v1666_v19 }
0x19b5   :  { %4125 = vmatmul.mubr.bf16.vlgmr.msra.gmra.mrb[56].mxu1 %v1667_v20 }
0x19b6   :  { %4149 = vmatpush3.bf16.msra.mxu1 %v5628_v51  ;;  %4164 = vmatprep.mubr.msk.bf16.mxu1 %vm5016_vm0, %v5015_v0 }
0x19b7   :  { %4150 = vmatprep.subr.bf16.mxu1 %v5015_v0 }
0x19ba   :  { %4151 = vmatpush3.bf16.msra.mxu1 %v5634_v57 }
0x19bb   :  { %4152 = vmatprep.subr.bf16.mxu1 %v5015_v0 }
0x19be   :  { %4153 = vmatpush3.bf16.msra.mxu1 %v5638_v58 }
0x19bf   :  { %4154 = vmatprep.subr.bf16.mxu1 %v5015_v0 }
0x19c2   :  { %4155 = vmatpush3.bf16.msra.mxu1 %v5642_v59 }
0x19c3   :  { %4156 = vmatprep.subr.bf16.mxu1 %v5015_v0 }
0x19c6   :  { %4157 = vmatpush3.bf16.msra.mxu1 %v5646_v60 }
0x19c7   :  { %4158 = vmatprep.subr.bf16.mxu1 %v5015_v0 }
0x19ca   :  { %4159 = vmatpush3.bf16.msra.mxu1 %v5650_v61 }
0x19cb   :  { %4160 = vmatprep.subr.bf16.mxu1 %v5015_v0 }
0x19ce   :  { %4161 = vmatpush3.bf16.msra.mxu1 %v5654_v62 }
0x19cf   :  { %4162 = vmatprep.subr.bf16.mxu1 %v5015_v0 }
0x19d2   :  { %4163 = vmatpush3.bf16.msra.mxu1 %v5658_v63 }
0x19d3   :  { %4188 = vmatprep.subr.bf16.mxu1 %v5015_v0 }
0x1a88   :  { %v1702_v21 = vpop.f32.mrb[56].mxu1 }
0x1a89   :  { %v1703_v22 = vadd.f32 %v5712_v55, %v1702_v21  ;;  %v4126_v34 = vpop.f32.mrb[57].mxu1 }
0x1a8a   :  { %v1705_v35 = vpop.f32.mrb[58].mxu1 }
0x1a8b   :  { %4777 = vtanh.f32 %v1703_v22  ;;  %v4127_v37 = vpop.f32.mrb[59].mxu1 }
0x1a95   :  { %v4778_v38 = vpop.eup %4777 }
0x1a96   :  { %v1709_v39 = vpack.c.bf16 %v4778_v38, %v4778_v38 }
0x1a98   :  { %4145 = vmatmul.mubr.bf16.vlgmr.msra.gmra.mrb[60].mxu0 %v1709_v39 }
0x1a99   :  { %4169 = vmatpush3.bf16.msra.mxu0 %v5663_v9  ;;  %4184 = vmatprep.mubr.msk.bf16.mxu0 %vm5016_vm0, %v5015_v0 }
0x1a9a   :  { %4170 = vmatprep.subr.bf16.mxu0 %v5015_v0 }
0x1a9d   :  { %4171 = vmatpush3.bf16.msra.mxu0 %v5669_v10 }
0x1a9e   :  { %4172 = vmatprep.subr.bf16.mxu0 %v5015_v0 }
0x1aa1   :  { %4173 = vmatpush3.bf16.msra.mxu0 %v5673_v56 }
0x1aa2   :  { %4174 = vmatprep.subr.bf16.mxu0 %v5015_v0 }
0x1aa5   :  { %4175 = vmatpush3.bf16.msra.mxu0 %v5677_v11 }
0x1aa6   :  { %4176 = vmatprep.subr.bf16.mxu0 %v5015_v0 }
0x1aa9   :  { %4177 = vmatpush3.bf16.msra.mxu0 %v5725_v23 }
0x1aaa   :  { %4178 = vmatprep.subr.bf16.mxu0 %v5015_v0 }
0x1aad   :  { %4179 = vmatpush3.bf16.msra.mxu0 %v5729_v24 }
0x1aae   :  { %4180 = vmatprep.subr.bf16.mxu0 %v5015_v0 }
0x1ab1   :  { %4181 = vmatpush3.bf16.msra.mxu0 %v5733_v32 }
0x1ab2   :  { %4182 = vmatprep.subr.bf16.mxu0 %v5015_v0 }
0x1ab5   :  { %4183 = vmatpush3.bf16.msra.mxu0 %v5737_v33 }
0x1ab6   :  { %4208 = vmatprep.subr.bf16.mxu0 %v5015_v0 }
0x1b6b   :  { %v1744_v45 = vpop.f32.mrb[60].mxu0 }
0x1b6c   :  { %v1745_v48 = vadd.f32 %v5744_v36, %v1744_v45  ;;  %v4146_v25 = vpop.f32.mrb[61].mxu0 }
0x1b6d   :  { %v1747_v26 = vpop.f32.mrb[62].mxu0 }
0x1b6e   :  { %v1750_v27 = vmul.f32 0.071428575, %v1745_v48  ;;  %v4147_v28 = vpop.f32.mrb[63].mxu0  ;;  %v1920_v44 = vmul.f32 2.0, %v1745_v48 }
0x1b70   :  { %v1751_v29 = vadd.f32 %v1750_v27, %v5788_v6  ;;  %v1921_v5 = vadd.f32 %v1920_v44, %v5830_v17 }
0x1b72   :  { %v1752_v14 = vpack.c.bf16 %v1751_v29, %v1751_v29 }
0x1b74   :  { %4165 = vmatmul.mubr.bf16.vlgmr.msra.gmra.mrb[60].mxu1 %v1752_v14 }
0x1b75   :  { %4189 = vmatpush3.bf16.msra.mxu1 %v5628_v51  ;;  %4204 = vmatprep.mubr.msk.bf16.mxu1 %vm5016_vm0, %v5015_v0 }
0x1b76   :  { %4190 = vmatprep.subr.bf16.mxu1 %v5015_v0 }
0x1b79   :  { %4191 = vmatpush3.bf16.msra.mxu1 %v5634_v57 }
0x1b7a   :  { %4192 = vmatprep.subr.bf16.mxu1 %v5015_v0 }
0x1b7d   :  { %4193 = vmatpush3.bf16.msra.mxu1 %v5638_v58 }
0x1b7e   :  { %4194 = vmatprep.subr.bf16.mxu1 %v5015_v0 }
0x1b81   :  { %4195 = vmatpush3.bf16.msra.mxu1 %v5642_v59 }
0x1b82   :  { %4196 = vmatprep.subr.bf16.mxu1 %v5015_v0 }
0x1b85   :  { %4197 = vmatpush3.bf16.msra.mxu1 %v5646_v60 }
0x1b86   :  { %4198 = vmatprep.subr.bf16.mxu1 %v5015_v0 }
0x1b89   :  { %4199 = vmatpush3.bf16.msra.mxu1 %v5650_v61 }
0x1b8a   :  { %4200 = vmatprep.subr.bf16.mxu1 %v5015_v0 }
0x1b8d   :  { %4201 = vmatpush3.bf16.msra.mxu1 %v5654_v62 }
0x1b8e   :  { %4202 = vmatprep.subr.bf16.mxu1 %v5015_v0 }
0x1b91   :  { %4203 = vmatpush3.bf16.msra.mxu1 %v5658_v63 }
0x1b92   :  { %4228 = vmatprep.subr.bf16.mxu1 %v5015_v0 }
0x1c47   :  { %v1787_v49 = vpop.f32.mrb[60].mxu1 }
0x1c48   :  { %v1788_v30 = vadd.f32 %v5712_v55, %v1787_v49  ;;  %v4166_v31 = vpop.f32.mrb[61].mxu1 }
0x1c49   :  { %v1790_v40 = vpop.f32.mrb[62].mxu1 }
0x1c4a   :  { %4779 = vtanh.f32 %v1788_v30  ;;  %v4167_v41 = vpop.f32.mrb[63].mxu1 }
0x1c54   :  { %v4780_v42 = vpop.eup %4779 }
0x1c55   :  { %v1794_v43 = vpack.c.bf16 %v4780_v42, %v4780_v42 }
0x1c57   :  { %4185 = vmatmul.mubr.bf16.vlgmr.msra.gmra.mrb[64].mxu0 %v1794_v43 }
0x1c58   :  { %4209 = vmatpush3.bf16.msra.mxu0 %v5663_v9  ;;  %4224 = vmatprep.mubr.msk.bf16.mxu0 %vm5016_vm0, %v5015_v0 }
0x1c59   :  { %4210 = vmatprep.subr.bf16.mxu0 %v5015_v0 }
0x1c5c   :  { %4211 = vmatpush3.bf16.msra.mxu0 %v5669_v10 }
0x1c5d   :  { %4212 = vmatprep.subr.bf16.mxu0 %v5015_v0 }
0x1c60   :  { %4213 = vmatpush3.bf16.msra.mxu0 %v5673_v56 }
0x1c61   :  { %4214 = vmatprep.subr.bf16.mxu0 %v5015_v0 }
0x1c64   :  { %4215 = vmatpush3.bf16.msra.mxu0 %v5677_v11 }
0x1c65   :  { %4216 = vmatprep.subr.bf16.mxu0 %v5015_v0 }
0x1c68   :  { %4217 = vmatpush3.bf16.msra.mxu0 %v5725_v23 }
0x1c69   :  { %4218 = vmatprep.subr.bf16.mxu0 %v5015_v0 }
0x1c6c   :  { %4219 = vmatpush3.bf16.msra.mxu0 %v5729_v24 }
0x1c6d   :  { %4220 = vmatprep.subr.bf16.mxu0 %v5015_v0 }
0x1c70   :  { %4221 = vmatpush3.bf16.msra.mxu0 %v5733_v32 }
0x1c71   :  { %4222 = vmatprep.subr.bf16.mxu0 %v5015_v0 }
0x1c74   :  { %4223 = vmatpush3.bf16.msra.mxu0 %v5737_v33 }
0x1c75   :  { %4248 = vmatprep.subr.bf16.mxu0 %v5015_v0 }
0x1d2a   :  { %v1829_v50 = vpop.f32.mrb[64].mxu0 }
0x1d2b   :  { %v1830_v2 = vadd.f32 %v5744_v36, %v1829_v50  ;;  %v4186_v3 = vpop.f32.mrb[65].mxu0 }
0x1d2c   :  { %v1832_v4 = vpop.f32.mrb[66].mxu0 }
0x1d2d   :  { %v1835_v7 = vmul.f32 0.14285715, %v1830_v2  ;;  %v1922_v46 = vmul.f32 2.0, %v1830_v2  ;;  %v4187_v8 = vpop.f32.mrb[67].mxu0 }
0x1d2f   :  { %v1836_v12 = vadd.f32 %v1835_v7, %v5788_v6  ;;  %v1923_v13 = vadd.f32 %v1922_v46, %v1921_v5 }
0x1d31   :  { %v1837_v15 = vpack.c.bf16 %v1836_v12, %v1836_v12 }
0x1d33   :  { %4205 = vmatmul.mubr.bf16.vlgmr.msra.gmra.mrb[64].mxu1 %v1837_v15 }
0x1d34   :  { %4229 = vmatpush3.bf16.msra.mxu1 %v5628_v51  ;;  %4244 = vmatprep.mubr.msk.bf16.mxu1 %vm5016_vm0, %v5015_v0 }
0x1d35   :  { %4230 = vmatprep.subr.bf16.mxu1 %v5015_v0 }
0x1d38   :  { %4231 = vmatpush3.bf16.msra.mxu1 %v5634_v57 }
0x1d39   :  { %4232 = vmatprep.subr.bf16.mxu1 %v5015_v0 }
0x1d3c   :  { %4233 = vmatpush3.bf16.msra.mxu1 %v5638_v58 }
0x1d3d   :  { %4234 = vmatprep.subr.bf16.mxu1 %v5015_v0 }
0x1d40   :  { %4235 = vmatpush3.bf16.msra.mxu1 %v5642_v59 }
0x1d41   :  { %4236 = vmatprep.subr.bf16.mxu1 %v5015_v0 }
0x1d44   :  { %4237 = vmatpush3.bf16.msra.mxu1 %v5646_v60 }
0x1d45   :  { %4238 = vmatprep.subr.bf16.mxu1 %v5015_v0 }
0x1d48   :  { %4239 = vmatpush3.bf16.msra.mxu1 %v5650_v61 }
0x1d49   :  { %4240 = vmatprep.subr.bf16.mxu1 %v5015_v0 }
0x1d4c   :  { %4241 = vmatpush3.bf16.msra.mxu1 %v5654_v62 }
0x1d4d   :  { %4242 = vmatprep.subr.bf16.mxu1 %v5015_v0 }
0x1d50   :  { %4243 = vmatpush3.bf16.msra.mxu1 %v5658_v63 }
0x1d51   :  { %4268 = vmatprep.subr.bf16.mxu1 %v5015_v0 }
0x1e06   :  { %v1872_v47 = vpop.f32.mrb[64].mxu1 }
0x1e07   :  { %v1873_v52 = vadd.f32 %v5712_v55, %v1872_v47  ;;  %v4206_v16 = vpop.f32.mrb[65].mxu1 }
0x1e08   :  { %v1875_v17 = vpop.f32.mrb[66].mxu1 }
0x1e09   :  { %4781 = vtanh.f32 %v1873_v52  ;;  %v4207_v53 = vpop.f32.mrb[67].mxu1 }
0x1e13   :  { %v4782_v54 = vpop.eup %4781 }
0x1e14   :  { %v1879_v1 = vpack.c.bf16 %v4782_v54, %v4782_v54 }
0x1e16   :  { %4225 = vmatmul.mubr.bf16.vlgmr.msra.gmra.mrb[68].mxu0 %v1879_v1 }
0x1e17   :  { %4249 = vmatpush3.bf16.msra.mxu0 %v5663_v9  ;;  %4264 = vmatprep.mubr.msk.bf16.mxu0 %vm5016_vm0, %v5015_v0 }
0x1e18   :  { %4250 = vmatprep.subr.bf16.mxu0 %v5015_v0 }
0x1e1b   :  { %4251 = vmatpush3.bf16.msra.mxu0 %v5669_v10 }
0x1e1c   :  { %4252 = vmatprep.subr.bf16.mxu0 %v5015_v0 }
0x1e1f   :  { %4253 = vmatpush3.bf16.msra.mxu0 %v5673_v56 }
0x1e20   :  { %4254 = vmatprep.subr.bf16.mxu0 %v5015_v0 }
0x1e23   :  { %4255 = vmatpush3.bf16.msra.mxu0 %v5677_v11 }
0x1e24   :  { %4256 = vmatprep.subr.bf16.mxu0 %v5015_v0 }
0x1e27   :  { %4257 = vmatpush3.bf16.msra.mxu0 %v5725_v23 }
0x1e28   :  { %4258 = vmatprep.subr.bf16.mxu0 %v5015_v0 }
0x1e2b   :  { %4259 = vmatpush3.bf16.msra.mxu0 %v5729_v24 }
0x1e2c   :  { %4260 = vmatprep.subr.bf16.mxu0 %v5015_v0 }
0x1e2f   :  { %4261 = vmatpush3.bf16.msra.mxu0 %v5733_v32 }
0x1e30   :  { %4262 = vmatprep.subr.bf16.mxu0 %v5015_v0 }
0x1e33   :  { %4263 = vmatpush3.bf16.msra.mxu0 %v5737_v33 }
0x1e34   :  { %4288 = vmatprep.subr.bf16.mxu0 %v5015_v0 }
0x1ee9   :  { %v1914_v18 = vpop.f32.mrb[68].mxu0 }
0x1eea   :  { %v1915_v19 = vadd.f32 %v5744_v36, %v1914_v18  ;;  %v4226_v20 = vpop.f32.mrb[69].mxu0 }
0x1eeb   :  { %v1917_v21 = vpop.f32.mrb[70].mxu0  ;;  %v6083_v20 = vld [vmem:[#allocation10 + $0x8] sm:$0xff]  }
0x1eec   :  { %v1924_v22 = vadd.f32 %v1923_v13, %v1915_v19  ;;  %v4227_v34 = vpop.f32.mrb[71].mxu0  ;;  %v6077_v19 = vld [vmem:[#allocation10] sm:$0xff]   ;;  %v6087_v21 = vld [vmem:[#allocation10 + $0x10] sm:$0xff]  }
0x1eed   :  { %v6095_v34 = vld [vmem:[#allocation10 + $0x20] sm:$0xff]  }
0x1eee   :  { %v1925_v35 = vmul.f32 0.023809524, %v1924_v22  ;;  %v6091_v22 = vld [vmem:[#allocation10 + $0x18] sm:$0xff]  }
0x1ef0   :  { %v5952_v37 = vadd.f32 %v1925_v35, %v5788_v6  ;;  %v6099_v35 = vld [vmem:[#allocation10 + $0x28] sm:$0xff]  }
0x1ef2   :  { %v1927_v38 = vpack.c.bf16 %v5952_v37, %v5952_v37 }
0x1ef4   :  { %4245 = vmatmul.mubr.bf16.vlgmr.msra.gmra.mrb[68].mxu1 %v1927_v38  ;;  %v6103_v38 = vld [vmem:[#allocation10 + $0x30] sm:$0xff]  }
0x1ef5   :  { %4269 = vmatpush3.bf16.msra.mxu1 %v5628_v51  ;;  %4284 = vmatprep.mubr.msk.bf16.mxu1 %vm5016_vm0, %v5015_v0 }
0x1ef6   :  { %4270 = vmatprep.subr.bf16.mxu1 %v5015_v0 }
0x1ef9   :  { %4271 = vmatpush3.bf16.msra.mxu1 %v5634_v57 }
0x1efa   :  { %4272 = vmatprep.subr.bf16.mxu1 %v5015_v0 }
0x1efd   :  { %4273 = vmatpush3.bf16.msra.mxu1 %v5638_v58 }
0x1efe   :  { %4274 = vmatprep.subr.bf16.mxu1 %v5015_v0 }
0x1f01   :  { %4275 = vmatpush3.bf16.msra.mxu1 %v5642_v59 }
0x1f02   :  { %4276 = vmatprep.subr.bf16.mxu1 %v5015_v0 }
0x1f05   :  { %4277 = vmatpush3.bf16.msra.mxu1 %v5646_v60 }
0x1f06   :  { %4278 = vmatprep.subr.bf16.mxu1 %v5015_v0 }
0x1f09   :  { %4279 = vmatpush3.bf16.msra.mxu1 %v5650_v61 }
0x1f0a   :  { %4280 = vmatprep.subr.bf16.mxu1 %v5015_v0 }
0x1f0d   :  { %4281 = vmatpush3.bf16.msra.mxu1 %v5654_v62 }
0x1f0e   :  { %4282 = vmatprep.subr.bf16.mxu1 %v5015_v0 }
0x1f11   :  { %4283 = vmatpush3.bf16.msra.mxu1 %v5658_v63 }
0x1f12   :  { %4308 = vmatprep.subr.bf16.mxu1 %v5015_v0 }
0x1fc7   :  { %v1962_v6 = vpop.f32.mrb[68].mxu1 }
0x1fc8   :  { %v1963_v39 = vadd.f32 %v5712_v55, %v1962_v6  ;;  %v4246_v45 = vpop.f32.mrb[69].mxu1  ;;  %v6107_v6 = vld [vmem:[#allocation10 + $0x38] sm:$0xff]  }
0x1fc9   :  { %v1965_v48 = vpop.f32.mrb[70].mxu1 }
0x1fca   :  { %4783 = vtanh.f32 %v1963_v39  ;;  %v4247_v25 = vpop.f32.mrb[71].mxu1 }
0x1fd4   :  { %v4784_v26 = vpop.eup %4783 }
0x1fd5   :  { %v1969_v27 = vpack.c.bf16 %v4784_v26, %v4784_v26 }
0x1fd7   :  { %4265 = vmatmul.mubr.bf16.vlgmr.msra.gmra.mrb[72].mxu0 %v1969_v27 }
0x1fd8   :  { %4289 = vmatpush3.bf16.msra.mxu0 %v5663_v9  ;;  %4304 = vmatprep.mubr.msk.bf16.mxu0 %vm5016_vm0, %v5015_v0 }
0x1fd9   :  { %4290 = vmatprep.subr.bf16.mxu0 %v5015_v0 }
0x1fdc   :  { %4291 = vmatpush3.bf16.msra.mxu0 %v5669_v10 }
0x1fdd   :  { %4292 = vmatprep.subr.bf16.mxu0 %v5015_v0 }
0x1fe0   :  { %4293 = vmatpush3.bf16.msra.mxu0 %v5673_v56 }
0x1fe1   :  { %4294 = vmatprep.subr.bf16.mxu0 %v5015_v0 }
0x1fe4   :  { %4295 = vmatpush3.bf16.msra.mxu0 %v5677_v11 }
0x1fe5   :  { %4296 = vmatprep.subr.bf16.mxu0 %v5015_v0 }
0x1fe8   :  { %4297 = vmatpush3.bf16.msra.mxu0 %v5725_v23 }
0x1fe9   :  { %4298 = vmatprep.subr.bf16.mxu0 %v5015_v0 }
0x1fec   :  { %4299 = vmatpush3.bf16.msra.mxu0 %v5729_v24 }
0x1fed   :  { %4300 = vmatprep.subr.bf16.mxu0 %v5015_v0 }
0x1ff0   :  { %4301 = vmatpush3.bf16.msra.mxu0 %v5733_v32 }
0x1ff1   :  { %4302 = vmatprep.subr.bf16.mxu0 %v5015_v0 }
0x1ff4   :  { %4303 = vmatpush3.bf16.msra.mxu0 %v5737_v33 }
0x1ff5   :  { %4328 = vmatprep.subr.bf16.mxu0 %v5015_v0 }
0x20aa   :  { %v2004_v28 = vpop.f32.mrb[72].mxu0 }
0x20ab   :  { %v5994_v29 = vadd.f32 %v5744_v36, %v2004_v28  ;;  %v4266_v14 = vpop.f32.mrb[73].mxu0 }
0x20ac   :  { %v2007_v49 = vpop.f32.mrb[74].mxu0  ;;  %v6118_v14 = vld [vmem:[#allocation11 + $0x8] sm:$0xff]  }
0x20ad   :  { %v2010_v30 = vmul.f32 0.071428575, %v5994_v29  ;;  %v4267_v31 = vpop.f32.mrb[75].mxu0  ;;  %v6126_v49 = vld [vmem:[#allocation11 + $0x18] sm:$0xff]  }
0x20af   :  { %v2011_v40 = vadd.f32 %v2010_v30, %v5952_v37 }
0x20b1   :  { %v2012_v41 = vpack.c.bf16 %v2011_v40, %v2011_v40 }
0x20b3   :  { %4285 = vmatmul.mubr.bf16.vlgmr.msra.gmra.mrb[72].mxu1 %v2012_v41 }
0x20b4   :  { %4309 = vmatpush3.bf16.msra.mxu1 %v5628_v51  ;;  %4324 = vmatprep.mubr.msk.bf16.mxu1 %vm5016_vm0, %v5015_v0 }
0x20b5   :  { %4310 = vmatprep.subr.bf16.mxu1 %v5015_v0 }
0x20b8   :  { %4311 = vmatpush3.bf16.msra.mxu1 %v5634_v57 }
0x20b9   :  { %4312 = vmatprep.subr.bf16.mxu1 %v5015_v0 }
0x20bc   :  { %4313 = vmatpush3.bf16.msra.mxu1 %v5638_v58 }
0x20bd   :  { %4314 = vmatprep.subr.bf16.mxu1 %v5015_v0 }
0x20c0   :  { %4315 = vmatpush3.bf16.msra.mxu1 %v5642_v59 }
0x20c1   :  { %4316 = vmatprep.subr.bf16.mxu1 %v5015_v0 }
0x20c4   :  { %4317 = vmatpush3.bf16.msra.mxu1 %v5646_v60 }
0x20c5   :  { %4318 = vmatprep.subr.bf16.mxu1 %v5015_v0 }
0x20c8   :  { %4319 = vmatpush3.bf16.msra.mxu1 %v5650_v61 }
0x20c9   :  { %4320 = vmatprep.subr.bf16.mxu1 %v5015_v0 }
0x20cc   :  { %4321 = vmatpush3.bf16.msra.mxu1 %v5654_v62 }
0x20cd   :  { %4322 = vmatprep.subr.bf16.mxu1 %v5015_v0 }
0x20d0   :  { %4323 = vmatpush3.bf16.msra.mxu1 %v5658_v63 }
0x20d1   :  { %4348 = vmatprep.subr.bf16.mxu1 %v5015_v0 }
0x2186   :  { %v2047_v42 = vpop.f32.mrb[72].mxu1 }
0x2187   :  { %v2048_v43 = vadd.f32 %v5712_v55, %v2047_v42  ;;  %v4286_v44 = vpop.f32.mrb[73].mxu1 }
0x2188   :  { %v2050_v50 = vpop.f32.mrb[74].mxu1 }
0x2189   :  { %4785 = vtanh.f32 %v2048_v43  ;;  %v4287_v2 = vpop.f32.mrb[75].mxu1 }
0x2193   :  { %v4786_v3 = vpop.eup %4785 }
0x2194   :  { %v2054_v4 = vpack.c.bf16 %v4786_v3, %v4786_v3 }
0x2196   :  { %4305 = vmatmul.mubr.bf16.vlgmr.msra.gmra.mrb[76].mxu0 %v2054_v4 }
0x2197   :  { %4329 = vmatpush3.bf16.msra.mxu0 %v5663_v9  ;;  %4344 = vmatprep.mubr.msk.bf16.mxu0 %vm5016_vm0, %v5015_v0 }
0x2198   :  { %4330 = vmatprep.subr.bf16.mxu0 %v5015_v0 }
0x219b   :  { %4331 = vmatpush3.bf16.msra.mxu0 %v5669_v10 }
0x219c   :  { %4332 = vmatprep.subr.bf16.mxu0 %v5015_v0 }
0x219f   :  { %4333 = vmatpush3.bf16.msra.mxu0 %v5673_v56 }
0x21a0   :  { %4334 = vmatprep.subr.bf16.mxu0 %v5015_v0 }
0x21a3   :  { %4335 = vmatpush3.bf16.msra.mxu0 %v5677_v11 }
0x21a4   :  { %4336 = vmatprep.subr.bf16.mxu0 %v5015_v0 }
0x21a7   :  { %4337 = vmatpush3.bf16.msra.mxu0 %v5725_v23 }
0x21a8   :  { %4338 = vmatprep.subr.bf16.mxu0 %v5015_v0 }
0x21ab   :  { %4339 = vmatpush3.bf16.msra.mxu0 %v5729_v24 }
0x21ac   :  { %4340 = vmatprep.subr.bf16.mxu0 %v5015_v0 }
0x21af   :  { %4341 = vmatpush3.bf16.msra.mxu0 %v5733_v32 }
0x21b0   :  { %4342 = vmatprep.subr.bf16.mxu0 %v5015_v0 }
0x21b3   :  { %4343 = vmatpush3.bf16.msra.mxu0 %v5737_v33 }
0x21b4   :  { %4368 = vmatprep.subr.bf16.mxu0 %v5015_v0 }
0x2269   :  { %v2089_v5 = vpop.f32.mrb[76].mxu0 }
0x226a   :  { %v2090_v7 = vadd.f32 %v5744_v36, %v2089_v5  ;;  %v4306_v46 = vpop.f32.mrb[77].mxu0  ;;  %v6178_v5 = vld [vmem:[#allocation11 + $0x20] sm:$0xff]  }
0x226b   :  { %v2092_v8 = vpop.f32.mrb[78].mxu0  ;;  %v6186_v46 = vld [vmem:[#allocation11 + $0x30] sm:$0xff]  }
0x226c   :  { %v2095_v12 = vmul.f32 0.071428575, %v2090_v7  ;;  %v4307_v13 = vpop.f32.mrb[79].mxu0  ;;  %v6190_v8 = vld [vmem:[#allocation11 + $0x38] sm:$0xff]  }
0x226d   :  { %v6197_v13 = vld [vmem:[%s6466_s6 + $0x4] ss:$0 sm:$0xff] }
0x226e   :  { %v2096_v15 = vadd.f32 %v2095_v12, %v5952_v37 }
0x2270   :  { %v2097_v47 = vpack.c.bf16 %v2096_v15, %v2096_v15 }
0x2272   :  { %4325 = vmatmul.mubr.bf16.vlgmr.msra.gmra.mrb[76].mxu1 %v2097_v47 }
0x2273   :  { %4349 = vmatpush3.bf16.msra.mxu1 %v5628_v51  ;;  %4364 = vmatprep.mubr.msk.bf16.mxu1 %vm5016_vm0, %v5015_v0 }
0x2274   :  { %4350 = vmatprep.subr.bf16.mxu1 %v5015_v0 }
0x2277   :  { %4351 = vmatpush3.bf16.msra.mxu1 %v5634_v57 }
0x2278   :  { %4352 = vmatprep.subr.bf16.mxu1 %v5015_v0 }
0x227b   :  { %4353 = vmatpush3.bf16.msra.mxu1 %v5638_v58 }
0x227c   :  { %4354 = vmatprep.subr.bf16.mxu1 %v5015_v0 }
0x227f   :  { %4355 = vmatpush3.bf16.msra.mxu1 %v5642_v59 }
0x2280   :  { %4356 = vmatprep.subr.bf16.mxu1 %v5015_v0 }
0x2283   :  { %4357 = vmatpush3.bf16.msra.mxu1 %v5646_v60 }
0x2284   :  { %4358 = vmatprep.subr.bf16.mxu1 %v5015_v0 }
0x2287   :  { %4359 = vmatpush3.bf16.msra.mxu1 %v5650_v61  ;;  %v2265_v61 = vmul.f32 2.0, %v2090_v7  ;;  %v6182_v7 = vld [vmem:[#allocation11 + $0x28] sm:$0xff]  }
0x2288   :  { %4360 = vmatprep.subr.bf16.mxu1 %v5015_v0 }
0x228b   :  { %4361 = vmatpush3.bf16.msra.mxu1 %v5654_v62 }
0x228c   :  { %4362 = vmatprep.subr.bf16.mxu1 %v5015_v0 }
0x228f   :  { %4363 = vmatpush3.bf16.msra.mxu1 %v5658_v63 }
0x2290   :  { %4388 = vmatprep.subr.bf16.mxu1 %v5015_v0 }
0x2345   :  { %v2132_v51 = vpop.f32.mrb[76].mxu1 }
0x2346   :  { %v2133_v57 = vadd.f32 %v5712_v55, %v2132_v51  ;;  %v4326_v58 = vpop.f32.mrb[77].mxu1 }
0x2347   :  { %v2135_v59 = vpop.f32.mrb[78].mxu1 }
0x2348   :  { %4787 = vtanh.f32 %v2133_v57  ;;  %v4327_v60 = vpop.f32.mrb[79].mxu1 }
0x2352   :  { %v4788_v52 = vpop.eup %4787 }
0x2353   :  { %v2139_v16 = vpack.c.bf16 %v4788_v52, %v4788_v52 }
0x2355   :  { %4345 = vmatmul.mubr.bf16.vlgmr.msra.gmra.mrb[80].mxu0 %v2139_v16 }
0x2356   :  { %4369 = vmatpush3.bf16.msra.mxu0 %v5663_v9  ;;  %4384 = vmatprep.mubr.msk.bf16.mxu0 %vm5016_vm0, %v5015_v0 }
0x2357   :  { %4370 = vmatprep.subr.bf16.mxu0 %v5015_v0 }
0x235a   :  { %4371 = vmatpush3.bf16.msra.mxu0 %v5669_v10 }
0x235b   :  { %4372 = vmatprep.subr.bf16.mxu0 %v5015_v0 }
0x235e   :  { %4373 = vmatpush3.bf16.msra.mxu0 %v5673_v56  ;;  %v2266_v56 = vadd.f32 %v2265_v61, %v5994_v29  ;;  %v6112_v29 = vld [vmem:[#allocation11] sm:$0xff]  }
0x235f   :  { %4374 = vmatprep.subr.bf16.mxu0 %v5015_v0 }
0x2362   :  { %4375 = vmatpush3.bf16.msra.mxu0 %v5677_v11 }
0x2363   :  { %4376 = vmatprep.subr.bf16.mxu0 %v5015_v0 }
0x2366   :  { %4377 = vmatpush3.bf16.msra.mxu0 %v5725_v23 }
0x2367   :  { %4378 = vmatprep.subr.bf16.mxu0 %v5015_v0 }
0x236a   :  { %4379 = vmatpush3.bf16.msra.mxu0 %v5729_v24 }
0x236b   :  { %4380 = vmatprep.subr.bf16.mxu0 %v5015_v0 }
0x236e   :  { %4381 = vmatpush3.bf16.msra.mxu0 %v5733_v32 }
0x236f   :  { %4382 = vmatprep.subr.bf16.mxu0 %v5015_v0 }
0x2372   :  { %4383 = vmatpush3.bf16.msra.mxu0 %v5737_v33 }
0x2373   :  { %4408 = vmatprep.subr.bf16.mxu0 %v5015_v0 }
0x2428   :  { %v2174_v62 = vpop.f32.mrb[80].mxu0 }
0x2429   :  { %v2175_v63 = vadd.f32 %v5744_v36, %v2174_v62  ;;  %v4346_v9 = vpop.f32.mrb[81].mxu0 }
0x242a   :  { %v2177_v10 = vpop.f32.mrb[82].mxu0 }
0x242b   :  { %v2180_v11 = vmul.f32 0.14285715, %v2175_v63  ;;  %v2267_v17 = vmul.f32 2.0, %v2175_v63  ;;  %v4347_v53 = vpop.f32.mrb[83].mxu0 }
0x242d   :  { %v2181_v54 = vadd.f32 %v2180_v11, %v5952_v37  ;;  %v2268_v1 = vadd.f32 %v2267_v17, %v2266_v56 }
0x242f   :  { %v2182_v18 = vpack.c.bf16 %v2181_v54, %v2181_v54 }
0x2431   :  { %4365 = vmatmul.mubr.bf16.vlgmr.msra.gmra.mrb[80].mxu1 %v2182_v18 }
0x2432   :  { %4389 = vmatpush3.bf16.msra.mxu1 %v6077_v19  ;;  %4404 = vmatprep.mubr.msk.bf16.mxu1 %vm5016_vm0, %v5015_v0 }
0x2433   :  { %4390 = vmatprep.subr.bf16.mxu1 %v5015_v0 }
0x2436   :  { %4391 = vmatpush3.bf16.msra.mxu1 %v6083_v20 }
0x2437   :  { %4392 = vmatprep.subr.bf16.mxu1 %v5015_v0 }
0x243a   :  { %4393 = vmatpush3.bf16.msra.mxu1 %v6087_v21 }
0x243b   :  { %4394 = vmatprep.subr.bf16.mxu1 %v5015_v0 }
0x243e   :  { %4395 = vmatpush3.bf16.msra.mxu1 %v6091_v22 }
0x243f   :  { %4396 = vmatprep.subr.bf16.mxu1 %v5015_v0 }
0x2442   :  { %4397 = vmatpush3.bf16.msra.mxu1 %v6095_v34 }
0x2443   :  { %4398 = vmatprep.subr.bf16.mxu1 %v5015_v0 }
0x2446   :  { %4399 = vmatpush3.bf16.msra.mxu1 %v6099_v35 }
0x2447   :  { %4400 = vmatprep.subr.bf16.mxu1 %v5015_v0 }
0x244a   :  { %4401 = vmatpush3.bf16.msra.mxu1 %v6103_v38 }
0x244b   :  { %4402 = vmatprep.subr.bf16.mxu1 %v5015_v0 }
0x244e   :  { %4403 = vmatpush3.bf16.msra.mxu1 %v6107_v6 }
0x244f   :  { %4428 = vmatprep.subr.bf16.mxu1 %v5015_v0 }
0x2504   :  { %v2217_v39 = vpop.f32.mrb[80].mxu1 }
0x2505   :  { %v2218_v45 = vadd.f32 %v5712_v55, %v2217_v39  ;;  %v4366_v48 = vpop.f32.mrb[81].mxu1  ;;  %v6122_v55 = vld [vmem:[#allocation11 + $0x10] sm:$0xff]  }
0x2506   :  { %v2220_v25 = vpop.f32.mrb[82].mxu1 }
0x2507   :  { %4789 = vtanh.f32 %v2218_v45  ;;  %v4367_v26 = vpop.f32.mrb[83].mxu1 }
0x2511   :  { %v4790_v27 = vpop.eup %4789 }
0x2512   :  { %v2224_v28 = vpack.c.bf16 %v4790_v27, %v4790_v27 }
0x2514   :  { %4385 = vmatmul.mubr.bf16.vlgmr.msra.gmra.mrb[84].mxu0 %v2224_v28 }
0x2515   :  { %4409 = vmatpush3.bf16.msra.mxu0 %v6112_v29  ;;  %4424 = vmatprep.mubr.msk.bf16.mxu0 %vm5016_vm0, %v5015_v0 }
0x2516   :  { %4410 = vmatprep.subr.bf16.mxu0 %v5015_v0 }
0x2519   :  { %4411 = vmatpush3.bf16.msra.mxu0 %v6118_v14 }
0x251a   :  { %4412 = vmatprep.subr.bf16.mxu0 %v5015_v0 }
0x251d   :  { %4413 = vmatpush3.bf16.msra.mxu0 %v6122_v55 }
0x251e   :  { %4414 = vmatprep.subr.bf16.mxu0 %v5015_v0 }
0x2521   :  { %4415 = vmatpush3.bf16.msra.mxu0 %v6126_v49 }
0x2522   :  { %4416 = vmatprep.subr.bf16.mxu0 %v5015_v0 }
0x2525   :  { %4417 = vmatpush3.bf16.msra.mxu0 %v5725_v23 }
0x2526   :  { %4418 = vmatprep.subr.bf16.mxu0 %v5015_v0 }
0x2529   :  { %4419 = vmatpush3.bf16.msra.mxu0 %v5729_v24 }
0x252a   :  { %4420 = vmatprep.subr.bf16.mxu0 %v5015_v0 }
0x252d   :  { %4421 = vmatpush3.bf16.msra.mxu0 %v5733_v32 }
0x252e   :  { %4422 = vmatprep.subr.bf16.mxu0 %v5015_v0 }
0x2531   :  { %4423 = vmatpush3.bf16.msra.mxu0 %v5737_v33 }
0x2532   :  { %4448 = vmatprep.subr.bf16.mxu0 %v5015_v0 }
0x25e7   :  { %v2259_v30 = vpop.f32.mrb[84].mxu0 }
0x25e8   :  { %v2260_v31 = vadd.f32 %v5744_v36, %v2259_v30  ;;  %v4386_v40 = vpop.f32.mrb[85].mxu0  ;;  %v6165_v36 = vld [vmem:[%s6466_s6 + $0x3] ss:$0 sm:$0xff]  ;;  %s5017_s6 = smov [#allocation13]  }
0x25e9   :  { %v2262_v41 = vpop.f32.mrb[86].mxu0  ;;  %s2969_s14 = sshll.u32 %s5017_s6, 4  ;;  %s2970_s14 = int_to_ptr.vmem [resolvable:$true] %s2969_s14 }
0x25ea   :  { %v2269_v23 = vadd.f32 %v2268_v1, %v2260_v31  ;;  %v4387_v42 = vpop.f32.mrb[87].mxu0  ;;  %s4975_s15 = scalar_lea.vmem %s2970_s14, 128  ;;  %p4980_p7 = scmp.lt.s32.totalorder %s2970_s14, %s2970_s14 }
0x25eb   :  { %p4976_p6 = scmp.ne.s32.totalorder %s2970_s14, %s4975_s15  ;;  %p4981_p8 = scmp.lt.s32.totalorder %s4975_s15, %s4975_s15 }
0x25ec   :  { %v2270_v43 = vmul.f32 0.023809524, %v2269_v23 }
0x25ed   :  { %p4982_p9 = por %p4981_p8, %p4980_p7 }
0x25ee   :  { %v6140_v24 = vadd.f32 %v2270_v43, %v5952_v37 }
0x25ef   :  { %p4983_p10 = pnand %p4982_p9, %p4976_p6 }
0x25f0   :  { %v2272_v32 = vpack.c.bf16 %v6140_v24, %v6140_v24 }
0x25f2   :  { %4405 = vmatmul.mubr.bf16.vlgmr.msra.gmra.mrb[84].mxu1 %v2272_v32 }
0x25f3   :  { %4429 = vmatpush3.bf16.msra.mxu1 %v6077_v19  ;;  %4444 = vmatprep.mubr.msk.bf16.mxu1 %vm5016_vm0, %v5015_v0 }
0x25f4   :  { %4430 = vmatprep.subr.bf16.mxu1 %v5015_v0 }
0x25f7   :  { %4431 = vmatpush3.bf16.msra.mxu1 %v6083_v20 }
0x25f8   :  { %4432 = vmatprep.subr.bf16.mxu1 %v5015_v0 }
0x25fb   :  { %4433 = vmatpush3.bf16.msra.mxu1 %v6087_v21 }
0x25fc   :  { %4434 = vmatprep.subr.bf16.mxu1 %v5015_v0 }
0x25ff   :  { %4435 = vmatpush3.bf16.msra.mxu1 %v6091_v22 }
0x2600   :  { %4436 = vmatprep.subr.bf16.mxu1 %v5015_v0 }
0x2603   :  { %4437 = vmatpush3.bf16.msra.mxu1 %v6095_v34 }
0x2604   :  { %4438 = vmatprep.subr.bf16.mxu1 %v5015_v0 }
0x2607   :  { %4439 = vmatpush3.bf16.msra.mxu1 %v6099_v35 }
0x2608   :  { %4440 = vmatprep.subr.bf16.mxu1 %v5015_v0 }
0x260b   :  { %4441 = vmatpush3.bf16.msra.mxu1 %v6103_v38 }
0x260c   :  { %4442 = vmatprep.subr.bf16.mxu1 %v5015_v0 }
0x260f   :  { %4443 = vmatpush3.bf16.msra.mxu1 %v6107_v6 }
0x2610   :  { %4468 = vmatprep.subr.bf16.mxu1 %v5015_v0 }
0x26c5   :  { %v2307_v33 = vpop.f32.mrb[84].mxu1 }
0x26c6   :  { %v2308_v37 = vadd.f32 %v6165_v36, %v2307_v33  ;;  %v4406_v44 = vpop.f32.mrb[85].mxu1 }
0x26c7   :  { %v2310_v50 = vpop.f32.mrb[86].mxu1 }
0x26c8   :  { %4791 = vtanh.f32 %v2308_v37  ;;  %v4407_v2 = vpop.f32.mrb[87].mxu1 }
0x26d2   :  { %v4792_v3 = vpop.eup %4791 }
0x26d3   :  { %v2314_v4 = vpack.c.bf16 %v4792_v3, %v4792_v3 }
0x26d5   :  { %4425 = vmatmul.mubr.bf16.vlgmr.msra.gmra.mrb[88].mxu0 %v2314_v4 }
0x26d6   :  { %4449 = vmatpush3.bf16.msra.mxu0 %v6112_v29  ;;  %4464 = vmatprep.mubr.msk.bf16.mxu0 %vm5016_vm0, %v5015_v0 }
0x26d7   :  { %4450 = vmatprep.subr.bf16.mxu0 %v5015_v0 }
0x26da   :  { %4451 = vmatpush3.bf16.msra.mxu0 %v6118_v14 }
0x26db   :  { %4452 = vmatprep.subr.bf16.mxu0 %v5015_v0 }
0x26de   :  { %4453 = vmatpush3.bf16.msra.mxu0 %v6122_v55 }
0x26df   :  { %4454 = vmatprep.subr.bf16.mxu0 %v5015_v0 }
0x26e2   :  { %4455 = vmatpush3.bf16.msra.mxu0 %v6126_v49 }
0x26e3   :  { %4456 = vmatprep.subr.bf16.mxu0 %v5015_v0 }
0x26e6   :  { %4457 = vmatpush3.bf16.msra.mxu0 %v6178_v5 }
0x26e7   :  { %4458 = vmatprep.subr.bf16.mxu0 %v5015_v0 }
0x26ea   :  { %4459 = vmatpush3.bf16.msra.mxu0 %v6182_v7 }
0x26eb   :  { %4460 = vmatprep.subr.bf16.mxu0 %v5015_v0 }
0x26ee   :  { %4461 = vmatpush3.bf16.msra.mxu0 %v6186_v46 }
0x26ef   :  { %4462 = vmatprep.subr.bf16.mxu0 %v5015_v0 }
0x26f2   :  { %4463 = vmatpush3.bf16.msra.mxu0 %v6190_v8 }
0x26f3   :  { %4488 = vmatprep.subr.bf16.mxu0 %v5015_v0 }
0x27a8   :  { %v2349_v12 = vpop.f32.mrb[88].mxu0 }
0x27a9   :  { %v6200_v15 = vadd.f32 %v6197_v13, %v2349_v12  ;;  %v4426_v47 = vpop.f32.mrb[89].mxu0 }
0x27aa   :  { %v2352_v51 = vpop.f32.mrb[90].mxu0 }
0x27ab   :  { %v2355_v57 = vmul.f32 0.071428575, %v6200_v15  ;;  %v4427_v58 = vpop.f32.mrb[91].mxu0 }
0x27ad   :  { %v2356_v59 = vadd.f32 %v2355_v57, %v6140_v24 }
0x27af   :  { %v2357_v60 = vpack.c.bf16 %v2356_v59, %v2356_v59 }
0x27b1   :  { %4445 = vmatmul.mubr.bf16.vlgmr.msra.gmra.mrb[88].mxu1 %v2357_v60 }
0x27b2   :  { %4469 = vmatpush3.bf16.msra.mxu1 %v6077_v19  ;;  %4484 = vmatprep.mubr.msk.bf16.mxu1 %vm5016_vm0, %v5015_v0 }
0x27b3   :  { %4470 = vmatprep.subr.bf16.mxu1 %v5015_v0 }
0x27b6   :  { %4471 = vmatpush3.bf16.msra.mxu1 %v6083_v20 }
0x27b7   :  { %4472 = vmatprep.subr.bf16.mxu1 %v5015_v0 }
0x27ba   :  { %4473 = vmatpush3.bf16.msra.mxu1 %v6087_v21 }
0x27bb   :  { %4474 = vmatprep.subr.bf16.mxu1 %v5015_v0 }
0x27be   :  { %4475 = vmatpush3.bf16.msra.mxu1 %v6091_v22 }
0x27bf   :  { %4476 = vmatprep.subr.bf16.mxu1 %v5015_v0 }
0x27c2   :  { %4477 = vmatpush3.bf16.msra.mxu1 %v6095_v34 }
0x27c3   :  { %4478 = vmatprep.subr.bf16.mxu1 %v5015_v0 }
0x27c6   :  { %4479 = vmatpush3.bf16.msra.mxu1 %v6099_v35 }
0x27c7   :  { %4480 = vmatprep.subr.bf16.mxu1 %v5015_v0 }
0x27ca   :  { %4481 = vmatpush3.bf16.msra.mxu1 %v6103_v38 }
0x27cb   :  { %4482 = vmatprep.subr.bf16.mxu1 %v5015_v0 }
0x27ce   :  { %4483 = vmatpush3.bf16.msra.mxu1 %v6107_v6 }
0x27cf   :  { %4508 = vmatprep.subr.bf16.mxu1 %v5015_v0 }
0x2884   :  { %v2392_v52 = vpop.f32.mrb[88].mxu1 }
0x2885   :  { %v2393_v16 = vadd.f32 %v6165_v36, %v2392_v52  ;;  %v4446_v61 = vpop.f32.mrb[89].mxu1 }
0x2886   :  { %v2395_v62 = vpop.f32.mrb[90].mxu1 }
0x2887   :  { %4793 = vtanh.f32 %v2393_v16  ;;  %v4447_v63 = vpop.f32.mrb[91].mxu1 }
0x2891   :  { %v4794_v9 = vpop.eup %4793 }
0x2892   :  { %v2399_v10 = vpack.c.bf16 %v4794_v9, %v4794_v9 }
0x2894   :  { %4465 = vmatmul.mubr.bf16.vlgmr.msra.gmra.mrb[92].mxu0 %v2399_v10 }
0x2895   :  { %4489 = vmatpush3.bf16.msra.mxu0 %v6112_v29  ;;  %4504 = vmatprep.mubr.msk.bf16.mxu0 %vm5016_vm0, %v5015_v0 }
0x2896   :  { %4490 = vmatprep.subr.bf16.mxu0 %v5015_v0 }
0x2899   :  { %4491 = vmatpush3.bf16.msra.mxu0 %v6118_v14 }
0x289a   :  { %4492 = vmatprep.subr.bf16.mxu0 %v5015_v0 }
0x289d   :  { %4493 = vmatpush3.bf16.msra.mxu0 %v6122_v55 }
0x289e   :  { %4494 = vmatprep.subr.bf16.mxu0 %v5015_v0 }
0x28a1   :  { %4495 = vmatpush3.bf16.msra.mxu0 %v6126_v49 }
0x28a2   :  { %4496 = vmatprep.subr.bf16.mxu0 %v5015_v0 }
0x28a5   :  { %4497 = vmatpush3.bf16.msra.mxu0 %v6178_v5 }
0x28a6   :  { %4498 = vmatprep.subr.bf16.mxu0 %v5015_v0 }
0x28a9   :  { %4499 = vmatpush3.bf16.msra.mxu0 %v6182_v7 }
0x28aa   :  { %4500 = vmatprep.subr.bf16.mxu0 %v5015_v0 }
0x28ad   :  { %4501 = vmatpush3.bf16.msra.mxu0 %v6186_v46 }
0x28ae   :  { %4502 = vmatprep.subr.bf16.mxu0 %v5015_v0 }
0x28b1   :  { %4503 = vmatpush3.bf16.msra.mxu0 %v6190_v8 }
0x28b2   :  { %4528 = vmatprep.subr.bf16.mxu0 %v5015_v0 }
0x2967   :  { %v2434_v56 = vpop.f32.mrb[92].mxu0 }
0x2968   :  { %v2435_v11 = vadd.f32 %v6197_v13, %v2434_v56  ;;  %v4466_v17 = vpop.f32.mrb[93].mxu0 }
0x2969   :  { %v2437_v53 = vpop.f32.mrb[94].mxu0 }
0x296a   :  { %v2440_v54 = vmul.f32 0.071428575, %v2435_v11  ;;  %v4467_v1 = vpop.f32.mrb[95].mxu0  ;;  %v2610_v31 = vmul.f32 2.0, %v2435_v11 }
0x296c   :  { %v2441_v18 = vadd.f32 %v2440_v54, %v6140_v24  ;;  %v2611_v43 = vadd.f32 %v2610_v31, %v6200_v15 }
0x296e   :  { %v2442_v39 = vpack.c.bf16 %v2441_v18, %v2441_v18 }
0x2970   :  { %4485 = vmatmul.mubr.bf16.vlgmr.msra.gmra.mrb[92].mxu1 %v2442_v39 }
0x2971   :  { %4509 = vmatpush3.bf16.msra.mxu1 %v6077_v19  ;;  %4524 = vmatprep.mubr.msk.bf16.mxu1 %vm5016_vm0, %v5015_v0 }
0x2972   :  { %4510 = vmatprep.subr.bf16.mxu1 %v5015_v0 }
0x2975   :  { %4511 = vmatpush3.bf16.msra.mxu1 %v6083_v20 }
0x2976   :  { %4512 = vmatprep.subr.bf16.mxu1 %v5015_v0 }
0x2979   :  { %4513 = vmatpush3.bf16.msra.mxu1 %v6087_v21 }
0x297a   :  { %4514 = vmatprep.subr.bf16.mxu1 %v5015_v0 }
0x297d   :  { %4515 = vmatpush3.bf16.msra.mxu1 %v6091_v22 }
0x297e   :  { %4516 = vmatprep.subr.bf16.mxu1 %v5015_v0 }
0x2981   :  { %4517 = vmatpush3.bf16.msra.mxu1 %v6095_v34 }
0x2982   :  { %4518 = vmatprep.subr.bf16.mxu1 %v5015_v0 }
0x2985   :  { %4519 = vmatpush3.bf16.msra.mxu1 %v6099_v35 }
0x2986   :  { %4520 = vmatprep.subr.bf16.mxu1 %v5015_v0 }
0x2989   :  { %4521 = vmatpush3.bf16.msra.mxu1 %v6103_v38 }
0x298a   :  { %4522 = vmatprep.subr.bf16.mxu1 %v5015_v0 }
0x298d   :  { %4523 = vmatpush3.bf16.msra.mxu1 %v6107_v6 }
0x298e   :  { %4548 = vmatprep.subr.bf16.mxu1 %v5015_v0 }
0x2a43   :  { %v2477_v45 = vpop.f32.mrb[92].mxu1 }
0x2a44   :  { %v2478_v48 = vadd.f32 %v6165_v36, %v2477_v45  ;;  %v4486_v25 = vpop.f32.mrb[93].mxu1 }
0x2a45   :  { %v2480_v26 = vpop.f32.mrb[94].mxu1 }
0x2a46   :  { %4795 = vtanh.f32 %v2478_v48  ;;  %v4487_v27 = vpop.f32.mrb[95].mxu1 }
0x2a50   :  { %v4796_v28 = vpop.eup %4795 }
0x2a51   :  { %v2484_v30 = vpack.c.bf16 %v4796_v28, %v4796_v28 }
0x2a53   :  { %4505 = vmatmul.mubr.bf16.vlgmr.msra.gmra.mrb[96].mxu0 %v2484_v30 }
0x2a54   :  { %4529 = vmatpush3.bf16.msra.mxu0 %v6112_v29  ;;  %4544 = vmatprep.mubr.msk.bf16.mxu0 %vm5016_vm0, %v5015_v0 }
0x2a55   :  { %4530 = vmatprep.subr.bf16.mxu0 %v5015_v0 }
0x2a58   :  { %4531 = vmatpush3.bf16.msra.mxu0 %v6118_v14 }
0x2a59   :  { %4532 = vmatprep.subr.bf16.mxu0 %v5015_v0 }
0x2a5c   :  { %4533 = vmatpush3.bf16.msra.mxu0 %v6122_v55 }
0x2a5d   :  { %4534 = vmatprep.subr.bf16.mxu0 %v5015_v0 }
0x2a60   :  { %4535 = vmatpush3.bf16.msra.mxu0 %v6126_v49 }
0x2a61   :  { %4536 = vmatprep.subr.bf16.mxu0 %v5015_v0 }
0x2a64   :  { %4537 = vmatpush3.bf16.msra.mxu0 %v6178_v5 }
0x2a65   :  { %4538 = vmatprep.subr.bf16.mxu0 %v5015_v0 }
0x2a68   :  { %4539 = vmatpush3.bf16.msra.mxu0 %v6182_v7 }
0x2a69   :  { %4540 = vmatprep.subr.bf16.mxu0 %v5015_v0 }
0x2a6c   :  { %4541 = vmatpush3.bf16.msra.mxu0 %v6186_v46 }
0x2a6d   :  { %4542 = vmatprep.subr.bf16.mxu0 %v5015_v0 }
0x2a70   :  { %4543 = vmatpush3.bf16.msra.mxu0 %v6190_v8 }
0x2a71   :  { %4568 = vmatprep.subr.bf16.mxu0 %v5015_v0 }
0x2b26   :  { %v2519_v40 = vpop.f32.mrb[96].mxu0 }
0x2b27   :  { %v2520_v41 = vadd.f32 %v6197_v13, %v2519_v40  ;;  %v4506_v23 = vpop.f32.mrb[97].mxu0 }
0x2b28   :  { %v2522_v42 = vpop.f32.mrb[98].mxu0 }
0x2b29   :  { %v2525_v32 = vmul.f32 0.14285715, %v2520_v41  ;;  %v2612_v33 = vmul.f32 2.0, %v2520_v41  ;;  %v4507_v37 = vpop.f32.mrb[99].mxu0 }
0x2b2b   :  { %v2526_v44 = vadd.f32 %v2525_v32, %v6140_v24  ;;  %v2613_v50 = vadd.f32 %v2612_v33, %v2611_v43 }
0x2b2d   :  { %v2527_v2 = vpack.c.bf16 %v2526_v44, %v2526_v44 }
0x2b2f   :  { %4525 = vmatmul.mubr.bf16.vlgmr.msra.gmra.mrb[96].mxu1 %v2527_v2 }
0x2b30   :  { %4549 = vmatpush3.bf16.msra.mxu1 %v6077_v19  ;;  %4564 = vmatprep.mubr.msk.bf16.mxu1 %vm5016_vm0, %v5015_v0 }
0x2b31   :  { %4550 = vmatprep.subr.bf16.mxu1 %v5015_v0 }
0x2b34   :  { %4551 = vmatpush3.bf16.msra.mxu1 %v6083_v20 }
0x2b35   :  { %4552 = vmatprep.subr.bf16.mxu1 %v5015_v0 }
0x2b38   :  { %4553 = vmatpush3.bf16.msra.mxu1 %v6087_v21 }
0x2b39   :  { %4554 = vmatprep.subr.bf16.mxu1 %v5015_v0 }
0x2b3c   :  { %4555 = vmatpush3.bf16.msra.mxu1 %v6091_v22 }
0x2b3d   :  { %4556 = vmatprep.subr.bf16.mxu1 %v5015_v0 }
0x2b40   :  { %4557 = vmatpush3.bf16.msra.mxu1 %v6095_v34 }
0x2b41   :  { %4558 = vmatprep.subr.bf16.mxu1 %v5015_v0 }
0x2b44   :  { %4559 = vmatpush3.bf16.msra.mxu1 %v6099_v35 }
0x2b45   :  { %4560 = vmatprep.subr.bf16.mxu1 %v5015_v0 }
0x2b48   :  { %4561 = vmatpush3.bf16.msra.mxu1 %v6103_v38 }
0x2b49   :  { %4562 = vmatprep.subr.bf16.mxu1 %v5015_v0 }
0x2b4c   :  { %4563 = vmatpush3.bf16.msra.mxu1 %v6107_v6 }
0x2b4d   :  { %4588 = vmatprep.subr.bf16.mxu1 %v5015_v0 }
0x2c02   :  { %v2562_v3 = vpop.f32.mrb[96].mxu1 }
0x2c03   :  { %v2563_v4 = vadd.f32 %v6165_v36, %v2562_v3  ;;  %v4526_v12 = vpop.f32.mrb[97].mxu1 }
0x2c04   :  { %v2565_v15 = vpop.f32.mrb[98].mxu1 }
0x2c05   :  { %4797 = vtanh.f32 %v2563_v4  ;;  %v4527_v47 = vpop.f32.mrb[99].mxu1 }
0x2c0f   :  { %v4798_v51 = vpop.eup %4797 }
0x2c10   :  { %v2569_v57 = vpack.c.bf16 %v4798_v51, %v4798_v51 }
0x2c12   :  { %4545 = vmatmul.mubr.bf16.vlgmr.msra.gmra.mrb[100].mxu0 %v2569_v57 }
0x2c13   :  { %4569 = vmatpush3.bf16.msra.mxu0 %v6112_v29  ;;  %4584 = vmatprep.mubr.msk.bf16.mxu0 %vm5016_vm0, %v5015_v0 }
0x2c14   :  { %4570 = vmatprep.subr.bf16.mxu0 %v5015_v0 }
0x2c17   :  { %4571 = vmatpush3.bf16.msra.mxu0 %v6118_v14 }
0x2c18   :  { %4572 = vmatprep.subr.bf16.mxu0 %v5015_v0 }
0x2c1b   :  { %4573 = vmatpush3.bf16.msra.mxu0 %v6122_v55 }
0x2c1c   :  { %4574 = vmatprep.subr.bf16.mxu0 %v5015_v0 }
0x2c1f   :  { %4575 = vmatpush3.bf16.msra.mxu0 %v6126_v49 }
0x2c20   :  { %4576 = vmatprep.subr.bf16.mxu0 %v5015_v0 }
0x2c23   :  { %4577 = vmatpush3.bf16.msra.mxu0 %v6178_v5 }
0x2c24   :  { %4578 = vmatprep.subr.bf16.mxu0 %v5015_v0 }
0x2c27   :  { %4579 = vmatpush3.bf16.msra.mxu0 %v6182_v7 }
0x2c28   :  { %4580 = vmatprep.subr.bf16.mxu0 %v5015_v0 }
0x2c2b   :  { %4581 = vmatpush3.bf16.msra.mxu0 %v6186_v46 }
0x2c2c   :  { %4582 = vmatprep.subr.bf16.mxu0 %v5015_v0 }
0x2c2f   :  { %4583 = vmatpush3.bf16.msra.mxu0 %v6190_v8 }
0x2c30   :  { %4608 = vmatprep.subr.bf16.mxu0 %v5015_v0 }
0x2ce5   :  { %v2604_v58 = vpop.f32.mrb[100].mxu0 }
0x2ce6   :  { %v2605_v59 = vadd.f32 %v6197_v13, %v2604_v58  ;;  %v4546_v60 = vpop.f32.mrb[101].mxu0 }
0x2ce7   :  { %v2607_v52 = vpop.f32.mrb[102].mxu0 }
0x2ce8   :  { %v2614_v16 = vadd.f32 %v2613_v50, %v2605_v59  ;;  %v4547_v61 = vpop.f32.mrb[103].mxu0 }
0x2cea   :  { %v2615_v62 = vmul.f32 0.023809524, %v2614_v16 }
0x2cec   :  { %v6322_v63 = vadd.f32 %v2615_v62, %v6140_v24 }
0x2cee   :  { %v2617_v9 = vpack.c.bf16 %v6322_v63, %v6322_v63 }
0x2cf0   :  { %4565 = vmatmul.mubr.bf16.vlgmr.msra.gmra.mrb[100].mxu1 %v2617_v9 }
0x2cf1   :  { %4589 = vmatpush3.bf16.msra.mxu1 %v6077_v19  ;;  %4604 = vmatprep.mubr.msk.bf16.mxu1 %vm5016_vm0, %v5015_v0 }
0x2cf2   :  { %4590 = vmatprep.subr.bf16.mxu1 %v5015_v0 }
0x2cf5   :  { %4591 = vmatpush3.bf16.msra.mxu1 %v6083_v20 }
0x2cf6   :  { %4592 = vmatprep.subr.bf16.mxu1 %v5015_v0 }
0x2cf9   :  { %4593 = vmatpush3.bf16.msra.mxu1 %v6087_v21 }
0x2cfa   :  { %4594 = vmatprep.subr.bf16.mxu1 %v5015_v0 }
0x2cfd   :  { %4595 = vmatpush3.bf16.msra.mxu1 %v6091_v22 }
0x2cfe   :  { %4596 = vmatprep.subr.bf16.mxu1 %v5015_v0 }
0x2d01   :  { %4597 = vmatpush3.bf16.msra.mxu1 %v6095_v34 }
0x2d02   :  { %4598 = vmatprep.subr.bf16.mxu1 %v5015_v0 }
0x2d05   :  { %4599 = vmatpush3.bf16.msra.mxu1 %v6099_v35 }
0x2d06   :  { %4600 = vmatprep.subr.bf16.mxu1 %v5015_v0 }
0x2d09   :  { %4601 = vmatpush3.bf16.msra.mxu1 %v6103_v38 }
0x2d0a   :  { %4602 = vmatprep.subr.bf16.mxu1 %v5015_v0 }
0x2d0d   :  { %4603 = vmatpush3.bf16.msra.mxu1 %v6107_v6 }
0x2d0e   :  { %4628 = vmatprep.subr.bf16.mxu1 %v5015_v0 }
0x2dc3   :  { %v2652_v24 = vpop.f32.mrb[100].mxu1 }
0x2dc4   :  { %v2653_v10 = vadd.f32 %v6165_v36, %v2652_v24  ;;  %v4566_v56 = vpop.f32.mrb[101].mxu1 }
0x2dc5   :  { %v2655_v11 = vpop.f32.mrb[102].mxu1 }
0x2dc6   :  { %4799 = vtanh.f32 %v2653_v10  ;;  %v4567_v17 = vpop.f32.mrb[103].mxu1 }
0x2dd0   :  { %v4800_v53 = vpop.eup %4799 }
0x2dd1   :  { %v2659_v54 = vpack.c.bf16 %v4800_v53, %v4800_v53 }
0x2dd3   :  { %4585 = vmatmul.mubr.bf16.vlgmr.msra.gmra.mrb[104].mxu0 %v2659_v54 }
0x2dd4   :  { %4609 = vmatpush3.bf16.msra.mxu0 %v6112_v29  ;;  %4624 = vmatprep.mubr.msk.bf16.mxu0 %vm5016_vm0, %v5015_v0 }
0x2dd5   :  { %4610 = vmatprep.subr.bf16.mxu0 %v5015_v0 }
0x2dd8   :  { %4611 = vmatpush3.bf16.msra.mxu0 %v6118_v14 }
0x2dd9   :  { %4612 = vmatprep.subr.bf16.mxu0 %v5015_v0 }
0x2ddc   :  { %4613 = vmatpush3.bf16.msra.mxu0 %v6122_v55 }
0x2ddd   :  { %4614 = vmatprep.subr.bf16.mxu0 %v5015_v0 }
0x2de0   :  { %4615 = vmatpush3.bf16.msra.mxu0 %v6126_v49 }
0x2de1   :  { %4616 = vmatprep.subr.bf16.mxu0 %v5015_v0 }
0x2de4   :  { %4617 = vmatpush3.bf16.msra.mxu0 %v6178_v5 }
0x2de5   :  { %4618 = vmatprep.subr.bf16.mxu0 %v5015_v0 }
0x2de8   :  { %4619 = vmatpush3.bf16.msra.mxu0 %v6182_v7 }
0x2de9   :  { %4620 = vmatprep.subr.bf16.mxu0 %v5015_v0 }
0x2dec   :  { %4621 = vmatpush3.bf16.msra.mxu0 %v6186_v46 }
0x2ded   :  { %4622 = vmatprep.subr.bf16.mxu0 %v5015_v0 }
0x2df0   :  { %4623 = vmatpush3.bf16.msra.mxu0 %v6190_v8 }
0x2df1   :  { %4648 = vmatprep.subr.bf16.mxu0 %v5015_v0 }
0x2ea6   :  { %v2694_v1 = vpop.f32.mrb[104].mxu0 }
0x2ea7   :  { %v6364_v18 = vadd.f32 %v6197_v13, %v2694_v1  ;;  %v4586_v39 = vpop.f32.mrb[105].mxu0 }
0x2ea8   :  { %v2697_v45 = vpop.f32.mrb[106].mxu0 }
0x2ea9   :  { %v2700_v48 = vmul.f32 0.071428575, %v6364_v18  ;;  %v4587_v25 = vpop.f32.mrb[107].mxu0 }
0x2eab   :  { %v2701_v26 = vadd.f32 %v2700_v48, %v6322_v63 }
0x2ead   :  { %v2702_v27 = vpack.c.bf16 %v2701_v26, %v2701_v26 }
0x2eaf   :  { %4605 = vmatmul.mubr.bf16.vlgmr.msra.gmra.mrb[104].mxu1 %v2702_v27 }
0x2eb0   :  { %4629 = vmatpush3.bf16.msra.mxu1 %v6077_v19  ;;  %4644 = vmatprep.mubr.msk.bf16.mxu1 %vm5016_vm0, %v5015_v0 }
0x2eb1   :  { %4630 = vmatprep.subr.bf16.mxu1 %v5015_v0 }
0x2eb4   :  { %4631 = vmatpush3.bf16.msra.mxu1 %v6083_v20 }
0x2eb5   :  { %4632 = vmatprep.subr.bf16.mxu1 %v5015_v0 }
0x2eb8   :  { %4633 = vmatpush3.bf16.msra.mxu1 %v6087_v21 }
0x2eb9   :  { %4634 = vmatprep.subr.bf16.mxu1 %v5015_v0 }
0x2ebc   :  { %4635 = vmatpush3.bf16.msra.mxu1 %v6091_v22 }
0x2ebd   :  { %4636 = vmatprep.subr.bf16.mxu1 %v5015_v0 }
0x2ec0   :  { %4637 = vmatpush3.bf16.msra.mxu1 %v6095_v34 }
0x2ec1   :  { %4638 = vmatprep.subr.bf16.mxu1 %v5015_v0 }
0x2ec4   :  { %4639 = vmatpush3.bf16.msra.mxu1 %v6099_v35 }
0x2ec5   :  { %4640 = vmatprep.subr.bf16.mxu1 %v5015_v0 }
0x2ec8   :  { %4641 = vmatpush3.bf16.msra.mxu1 %v6103_v38 }
0x2ec9   :  { %4642 = vmatprep.subr.bf16.mxu1 %v5015_v0 }
0x2ecc   :  { %4643 = vmatpush3.bf16.msra.mxu1 %v6107_v6 }
0x2ecd   :  { %4668 = vmatprep.subr.bf16.mxu1 %v5015_v0 }
0x2f82   :  { %v2737_v28 = vpop.f32.mrb[104].mxu1 }
0x2f83   :  { %v2738_v30 = vadd.f32 %v6165_v36, %v2737_v28  ;;  %v4606_v31 = vpop.f32.mrb[105].mxu1 }
0x2f84   :  { %v2740_v40 = vpop.f32.mrb[106].mxu1 }
0x2f85   :  { %4801 = vtanh.f32 %v2738_v30  ;;  %v4607_v41 = vpop.f32.mrb[107].mxu1 }
0x2f8f   :  { %v4802_v23 = vpop.eup %4801 }
0x2f90   :  { %v2744_v42 = vpack.c.bf16 %v4802_v23, %v4802_v23 }
0x2f92   :  { %4625 = vmatmul.mubr.bf16.vlgmr.msra.gmra.mrb[108].mxu0 %v2744_v42 }
0x2f93   :  { %4649 = vmatpush3.bf16.msra.mxu0 %v6112_v29  ;;  %4664 = vmatprep.mubr.msk.bf16.mxu0 %vm5016_vm0, %v5015_v0 }
0x2f94   :  { %4650 = vmatprep.subr.bf16.mxu0 %v5015_v0 }
0x2f97   :  { %4651 = vmatpush3.bf16.msra.mxu0 %v6118_v14 }
0x2f98   :  { %4652 = vmatprep.subr.bf16.mxu0 %v5015_v0 }
0x2f9b   :  { %4653 = vmatpush3.bf16.msra.mxu0 %v6122_v55 }
0x2f9c   :  { %4654 = vmatprep.subr.bf16.mxu0 %v5015_v0 }
0x2f9f   :  { %4655 = vmatpush3.bf16.msra.mxu0 %v6126_v49 }
0x2fa0   :  { %4656 = vmatprep.subr.bf16.mxu0 %v5015_v0 }
0x2fa3   :  { %4657 = vmatpush3.bf16.msra.mxu0 %v6178_v5 }
0x2fa4   :  { %4658 = vmatprep.subr.bf16.mxu0 %v5015_v0 }
0x2fa7   :  { %4659 = vmatpush3.bf16.msra.mxu0 %v6182_v7 }
0x2fa8   :  { %4660 = vmatprep.subr.bf16.mxu0 %v5015_v0 }
0x2fab   :  { %4661 = vmatpush3.bf16.msra.mxu0 %v6186_v46 }
0x2fac   :  { %4662 = vmatprep.subr.bf16.mxu0 %v5015_v0 }
0x2faf   :  { %4663 = vmatpush3.bf16.msra.mxu0 %v6190_v8 }
0x2fb0   :  { %4688 = vmatprep.subr.bf16.mxu0 %v5015_v0 }
0x3065   :  { %v2779_v43 = vpop.f32.mrb[108].mxu0 }
0x3066   :  { %v2780_v32 = vadd.f32 %v6197_v13, %v2779_v43  ;;  %v4626_v33 = vpop.f32.mrb[109].mxu0 }
0x3067   :  { %v2782_v37 = vpop.f32.mrb[110].mxu0 }
0x3068   :  { %v2785_v44 = vmul.f32 0.071428575, %v2780_v32  ;;  %v4627_v50 = vpop.f32.mrb[111].mxu0 }
0x306a   :  { %v2786_v2 = vadd.f32 %v2785_v44, %v6322_v63 }
0x306c   :  { %v2787_v3 = vpack.c.bf16 %v2786_v2, %v2786_v2 }
0x306e   :  { %4645 = vmatmul.mubr.bf16.vlgmr.msra.gmra.mrb[108].mxu1 %v2787_v3 }
0x306f   :  { %4669 = vmatpush3.bf16.msra.mxu1 %v6077_v19  ;;  %4684 = vmatprep.mubr.msk.bf16.mxu1 %vm5016_vm0, %v5015_v0 }
0x3070   :  { %4670 = vmatprep.subr.bf16.mxu1 %v5015_v0 }
0x3073   :  { %4671 = vmatpush3.bf16.msra.mxu1 %v6083_v20 }
0x3074   :  { %4672 = vmatprep.subr.bf16.mxu1 %v5015_v0 }
0x3077   :  { %4673 = vmatpush3.bf16.msra.mxu1 %v6087_v21 }
0x3078   :  { %4674 = vmatprep.subr.bf16.mxu1 %v5015_v0 }
0x307b   :  { %4675 = vmatpush3.bf16.msra.mxu1 %v6091_v22 }
0x307c   :  { %4676 = vmatprep.subr.bf16.mxu1 %v5015_v0 }
0x307f   :  { %4677 = vmatpush3.bf16.msra.mxu1 %v6095_v34 }
0x3080   :  { %4678 = vmatprep.subr.bf16.mxu1 %v5015_v0 }
0x3083   :  { %4679 = vmatpush3.bf16.msra.mxu1 %v6099_v35  ;;  %v2955_v35 = vmul.f32 2.0, %v2780_v32 }
0x3084   :  { %4680 = vmatprep.subr.bf16.mxu1 %v5015_v0 }
0x3087   :  { %4681 = vmatpush3.bf16.msra.mxu1 %v6103_v38 }
0x3088   :  { %4682 = vmatprep.subr.bf16.mxu1 %v5015_v0 }
0x308b   :  { %4683 = vmatpush3.bf16.msra.mxu1 %v6107_v6 }
0x3141   :  { %v2822_v19 = vpop.f32.mrb[108].mxu1 }
0x3142   :  { %v2823_v20 = vadd.f32 %v6165_v36, %v2822_v19  ;;  %v4646_v21 = vpop.f32.mrb[109].mxu1 }
0x3143   :  { %v2825_v22 = vpop.f32.mrb[110].mxu1 }
0x3144   :  { %4803 = vtanh.f32 %v2823_v20  ;;  %v4647_v4 = vpop.f32.mrb[111].mxu1 }
0x314e   :  { %v4804_v34 = vpop.eup %4803 }
0x314f   :  { %v2829_v12 = vpack.c.bf16 %v4804_v34, %v4804_v34 }
0x3151   :  { %4665 = vmatmul.mubr.bf16.vlgmr.msra.gmra.mrb[112].mxu0 %v2829_v12 }
0x3152   :  { %4689 = vmatpush3.bf16.msra.mxu0 %v6112_v29  ;;  %4704 = vmatprep.mubr.msk.bf16.mxu0 %vm5016_vm0, %v5015_v0 }
0x3153   :  { %4690 = vmatprep.subr.bf16.mxu0 %v5015_v0 }
0x3156   :  { %4691 = vmatpush3.bf16.msra.mxu0 %v6118_v14 }
0x3157   :  { %4692 = vmatprep.subr.bf16.mxu0 %v5015_v0 }
0x315a   :  { %4693 = vmatpush3.bf16.msra.mxu0 %v6122_v55  ;;  %v2956_v55 = vadd.f32 %v2955_v35, %v6364_v18 }
0x315b   :  { %4694 = vmatprep.subr.bf16.mxu0 %v5015_v0 }
0x315e   :  { %4695 = vmatpush3.bf16.msra.mxu0 %v6126_v49 }
0x315f   :  { %4696 = vmatprep.subr.bf16.mxu0 %v5015_v0 }
0x3162   :  { %4697 = vmatpush3.bf16.msra.mxu0 %v6178_v5 }
0x3163   :  { %4698 = vmatprep.subr.bf16.mxu0 %v5015_v0 }
0x3166   :  { %4699 = vmatpush3.bf16.msra.mxu0 %v6182_v7 }
0x3167   :  { %4700 = vmatprep.subr.bf16.mxu0 %v5015_v0 }
0x316a   :  { %4701 = vmatpush3.bf16.msra.mxu0 %v6186_v46 }
0x316b   :  { %4702 = vmatprep.subr.bf16.mxu0 %v5015_v0 }
0x316e   :  { %4703 = vmatpush3.bf16.msra.mxu0 %v6190_v8 }
0x3224   :  { %v2864_v38 = vpop.f32.mrb[112].mxu0 }
0x3225   :  { %v2865_v6 = vadd.f32 %v6197_v13, %v2864_v38  ;;  %v4666_v29 = vpop.f32.mrb[113].mxu0 }
0x3226   :  { %v2867_v14 = vpop.f32.mrb[114].mxu0 }
0x3227   :  { %v2870_v49 = vmul.f32 0.14285715, %v2865_v6  ;;  %v2957_v5 = vmul.f32 2.0, %v2865_v6  ;;  %v4667_v15 = vpop.f32.mrb[115].mxu0 }
0x3229   :  { %v2871_v7 = vadd.f32 %v2870_v49, %v6322_v63  ;;  %v2958_v47 = vadd.f32 %v2957_v5, %v2956_v55 }
0x322b   :  { %v2872_v51 = vpack.c.bf16 %v2871_v7, %v2871_v7 }
0x322d   :  { %4685 = vmatmul.mubr.bf16.vlgmr.msra.gmra.mrb[112].mxu1 %v2872_v51 }
0x3300   :  { %v2907_v46 = vpop.f32.mrb[112].mxu1 }
0x3301   :  { %v2908_v0 = vadd.f32 %v6165_v36, %v2907_v46  ;;  %v4686_v8 = vpop.f32.mrb[113].mxu1 }
0x3302   :  { %v2910_v57 = vpop.f32.mrb[114].mxu1 }
0x3303   :  { %4805 = vtanh.f32 %v2908_v0  ;;  %v4687_v58 = vpop.f32.mrb[115].mxu1 }
0x330d   :  { %v4806_v59 = vpop.eup %4805 }
0x330e   :  { %v2914_v60 = vpack.c.bf16 %v4806_v59, %v4806_v59 }
0x3310   :  { %4705 = vmatmul.mubr.bf16.vlgmr.msra.gmra.mrb[116].mxu0 %v2914_v60 }
0x33e3   :  { %v2949_v52 = vpop.f32.mrb[116].mxu0 }
0x33e4   :  { %v2950_v16 = vadd.f32 %v6197_v13, %v2949_v52  ;;  %v4706_v61 = vpop.f32.mrb[117].mxu0 }
0x33e5   :  { %v2952_v62 = vpop.f32.mrb[118].mxu0 }
0x33e6   :  { %v2959_v9 = vadd.f32 %v2958_v47, %v2950_v16  ;;  %v4707_v24 = vpop.f32.mrb[119].mxu0 }
0x33e8   :  { %v2960_v10 = vmul.f32 0.023809524, %v2959_v9 }
0x33ea   :  { %v2961_v56 = vadd.f32 %v2960_v10, %v6322_v63 }
0x33ec   :  { %2962 = vst [vmem:[#allocation13] sm:$0xff] %v2961_v56 }
0x33ed   :  { %4986 = shalt.err (!%p4983_p10)
}
0x33ee   :  { %s4987_s20 = scalar_lea.hbm %s6467_s7, 128 }
0x33ef   :  { %p4988_p11 = scmp.ne.s32.totalorder %s6467_s7, %s4987_s20  ;;  %p4991_p12 = scmp.lt.u32.totalorder %s4987_s20, %s6467_s7 }
0x33f1   :  { %p4993_p13 = pnand %p4991_p12, %p4988_p11 }
0x33f3   :  { %4996 = shalt.err (!%p4993_p13)
}
0x33f4   :  { %2972 = dma.vmem_to_hbm [thread:$0]  %s2970_s14, 128, %s6467_s7, [#allocation4]  }
0x33f5   :  { %5005 = dma.done.wait [#allocation4], 128  }
0x33f6   :  { %5006 = vsyncadd [#allocation4], 4294967168 }
0x33f7   :  { %2976 = vsyncpa [#allocation3], 1 }
0x33f8   :  { %2977 = vsyncpa [#allocation6], 1 }
0x33f9   :  { %2978 = vsyncpa [#allocation9], 1 }
0x33fa   :  { %2979 = vsyncpa [#allocation12], 1 }
0x33fb   :  { %2980 = vsyncpa [#allocation4], 1 }

</bundles_post_ra>
